<compile_context>
chip_gen: v7x
topology: tpu7x:2x2x1
jax: 0.10.0
libtpu: 0.0.40
codegen_flags: <defaults>
</compile_context>

<pallas_src>
import functools

import jax
import jax.numpy as jnp
from jax.experimental import pallas as pl
from jax.experimental.pallas import tpu as pltpu

_EPS = 1e-5
_LAYER_SPECS = [(3, 32), (32, 64), (64, 128), (128, 256)]   # (Cin, Cout) per conv
_LAYER_CIN_PAD = [8, 32, 64, 128]                           # Cin padded for lane density
_LAYER_HW = [16, 8, 4, 2]                                   # spatial size at each conv input


def _round_up(v, m):
    return ((v + m - 1) // m) * m


# ---------------------------------------------------------------------------
# Fused Pallas kernel (one grid step = TB images, rows stacked h-major)
# ---------------------------------------------------------------------------
def _cnn_kernel(x_ref,
                bw1_ref, bw2_ref, bw3_ref, bw4_ref,
                c1_ref, c2_ref, c3_ref,
                shifts_ref,
                o_ref, *, tb):
    f32, bf16 = jnp.float32, jnp.bfloat16

    def conv_bn_relu(a, bw_ref, shift):
        # a: (H*tb, W*Cin) bf16, rows ordered h-major (row = h*tb + image).
        # 3x3 conv = one fused band matmul: lanes [up | centre | down] against the
        # host-stacked (3*W*Cin, W*Cout) weight (dx taps, horizontal zero padding and
        # BN scale folded in).  The +-1-row (dy) shift is a tile-aligned slab copy
        # with a zero slab at the image border (no MXU work, no cross-image leakage).
        m, k = a.shape
        zrow = jnp.zeros((tb, k), bf16)
        up = jnp.concatenate([zrow, a[: m - tb, :]], axis=0)   # input row h-1 (0 at top)
        dn = jnp.concatenate([a[tb:, :], zrow], axis=0)        # input row h+1 (0 at bottom)
        band = jnp.concatenate([up, a, dn], axis=-1)           # (m, 3*W*Cin)
        acc = jnp.dot(band, bw_ref[...], preferred_element_type=f32)
        return jnp.maximum(acc + shift, 0.0)                   # (m, W*Cout) f32

    def maxpool2x2(y, h, c_ref):
        # Rows: max of adjacent h-slabs (tb-row, tile-aligned chunks) -> VPU only.
        yv = jnp.concatenate(
            [jnp.maximum(y[(2 * p) * tb:(2 * p + 1) * tb, :],
                         y[(2 * p + 1) * tb:(2 * p + 2) * tb, :])
             for p in range(h // 2)], axis=0).astype(bf16)      # (h//2*tb, W*C)
        # Columns: exact 0/1 selection matmuls over the lane-folded (w, c) axis.
        return jnp.maximum(
            jnp.dot(yv, c_ref[0], preferred_element_type=f32),
            jnp.dot(yv, c_ref[1], preferred_element_type=f32)).astype(bf16)

    a = x_ref[...]                                                          # (16*tb, 128)
    a = maxpool2x2(conv_bn_relu(a, bw1_ref, shifts_ref[0]), 16, c1_ref)     # (8*tb, 256)
    a = maxpool2x2(conv_bn_relu(a, bw2_ref, shifts_ref[1]), 8, c2_ref)      # (4*tb, 256)
    a = maxpool2x2(conv_bn_relu(a, bw3_ref, shifts_ref[2]), 4, c3_ref)      # (2*tb, 256)
    y4 = conv_bn_relu(a, bw4_ref, shifts_ref[3])                            # (2*tb, 512)
    # Global average pool over the 2x2 spatial grid: two h-slabs x two w lane-blocks.
    o_ref[...] = 0.25 * (y4[0:tb, 0:256] + y4[0:tb, 256:512]
                         + y4[tb:2 * tb, 0:256] + y4[tb:2 * tb, 256:512])   # (tb, 256)


def _const_spec(a):
    # Full-array block whose index never changes across the batch grid ->
    # loaded once, resident in VMEM for all grid steps.
    idx = (0,) * a.ndim
    return pl.BlockSpec(a.shape, lambda i, _idx=idx: _idx)


# ---------------------------------------------------------------------------
# Host-side parameter folding (plain JAX, done once)
# ---------------------------------------------------------------------------
def prepare_inference_params(params):
    """Fold BN into conv weights / shifts and build the matmul-only operators."""
    bws, shift_rows = [], []
    for hw, (cin, cout), cin_p, (w, b, gamma, beta, mean, var) in zip(
            _LAYER_HW, _LAYER_SPECS, _LAYER_CIN_PAD, params):
        scale = gamma / jnp.sqrt(var + _EPS)                 # [Cout]
        shift = beta - mean * scale + b * scale              # conv bias folded into BN shift
        wf = w * scale[None, None, None, :]                  # (3,3,Cin,Cout), BN scale folded
        if cin_p != cin:                                     # layer 1: pad Cin 3 -> 8 (zeros)
            wf = jnp.pad(wf, ((0, 0), (0, 0), (0, cin_p - cin), (0, 0)))

        # Band weight: BW_dy[wi*Cin+ci, wo*Cout+co] = wf[dy, wi-wo+1, ci, co]
        # (zero outside the 3-tap band -> implements the horizontal zero padding).
        wi = jnp.arange(hw)[:, None, None]
        wo = jnp.arange(hw)[None, :, None]
        dx = jnp.arange(3)[None, None, :]
        sel = (wi == wo + dx - 1).astype(jnp.float32)        # (W, W, 3)
        bw = jnp.concatenate([
            jnp.einsum("IOd,dic->IiOc", sel, wf[dy]).reshape(hw * cin_p, hw * cout)
            for dy in range(3)
        ], axis=0)                                           # (3*W*Cin, W*Cout) - K-fused
        bws.append(bw.astype(jnp.bfloat16))

        shift_rows.append(jnp.tile(shift, hw)[None, :].astype(jnp.float32))   # (1, 512)

    shifts = jnp.stack(shift_rows)                           # (4, 1, 512) f32

    # MaxPool2x2 column-selection operators (lane-folded (w, c) axis) for layers 1-3.
    cs = []
    for hw, c in [(16, 32), (8, 64), (4, 128)]:              # pool input (H=W, C)
        ho = hw // 2
        eye_c = jnp.eye(c, dtype=jnp.float32)
        we = (jnp.arange(hw)[:, None] == 2 * jnp.arange(ho)[None, :]).astype(jnp.float32)
        wo_ = (jnp.arange(hw)[:, None] == 2 * jnp.arange(ho)[None, :] + 1).astype(jnp.float32)
        ce = jnp.einsum("wW,cC->wcWC", we, eye_c).reshape(hw * c, ho * c)
        co = jnp.einsum("wW,cC->wcWC", wo_, eye_c).reshape(hw * c, ho * c)
        cs.append(jnp.stack([ce, co]).astype(jnp.bfloat16))   # (2, 512, 256)

    return bws + cs + [shifts]


# ---------------------------------------------------------------------------
# Forward (single fused pallas_call, TB images per grid step)
# ---------------------------------------------------------------------------
def custom_cnn_forward(x_nchw, prep, *, tb=None):
    n = x_nchw.shape[0]
    if tb is None:
        # Aim for >=2 grid steps when the batch allows it (v7x has 2 TensorCores),
        # cap at 128 so everything fits the 32 MiB scoped VMEM on every generation.
        tb = max(8, min(128, _round_up((n + 1) // 2, 8)))
    tb = _round_up(max(int(tb), 8), 8)
    n_pad = _round_up(n, tb)
    g = n_pad // tb

    # NCHW -> NHWC, pad Cin 3->8, lane-fold (w, c) -> (N_pad, 16, 128).
    x = jnp.transpose(x_nchw, (0, 2, 3, 1))
    x = jnp.pad(x, ((0, n_pad - n), (0, 0), (0, 0), (0, 8 - 3)))
    x = x.reshape(n_pad, 16, 16 * 8)
    # Per grid block: stack TB images h-major along the sublane axis (row = h*TB + img).
    x = (x.reshape(g, tb, 16, 128)
           .transpose(0, 2, 1, 3)
           .reshape(g * 16 * tb, 128)
           .astype(jnp.bfloat16))

    in_specs = [pl.BlockSpec((16 * tb, 128), lambda i: (i, 0))]
    in_specs += [_const_spec(a) for a in prep]

    out = pl.pallas_call(
        functools.partial(_cnn_kernel, tb=tb),
        out_shape=jax.ShapeDtypeStruct((n_pad, 256), jnp.float32),
        grid=(g,),
        in_specs=in_specs,
        out_specs=pl.BlockSpec((tb, 256), lambda i: (i, 0)),
        compiler_params=pltpu.CompilerParams(
            dimension_semantics=("parallel",),          # batch grid axis -> megacore split
            vmem_limit_bytes=32 * 1024 * 1024,
        ),
    )(x, *prep)
    return out[:n].reshape(n, 256, 1, 1)                # [N, 256, 1, 1], matches PyTorch


# ---------------------------------------------------------------------------
# Deterministic parameter init + pure-JAX reference (for verification)
# ---------------------------------------------------------------------------
def init_params(key):
    params = []
    for i, (cin, cout) in enumerate(_LAYER_SPECS):
        k = jax.random.fold_in(key, i)
        kw, kb, kg, kbe, km, kv = jax.random.split(k, 6)
        fan_in = 9 * cin
        w = jax.random.normal(kw, (3, 3, cin, cout), jnp.float32) * (2.0 / fan_in) ** 0.5
        b = 0.01 * jax.random.normal(kb, (cout,), jnp.float32)
        gamma = 1.0 + 0.1 * jax.random.normal(kg, (cout,), jnp.float32)
        beta = 0.1 * jax.random.normal(kbe, (cout,), jnp.float32)
        mean = 0.1 * jax.random.normal(km, (cout,), jnp.float32)
        var = 1.0 + 0.1 * jax.random.uniform(kv, (cout,), jnp.float32)
        params.append((w, b, gamma, beta, mean, var))
    return params


def reference_forward(x_nchw, params):
    x = jnp.transpose(x_nchw, (0, 2, 3, 1))
    for i, (w, b, gamma, beta, mean, var) in enumerate(params):
        y = jax.lax.conv_general_dilated(
            x, w, window_strides=(1, 1), padding="SAME",
            dimension_numbers=("NHWC", "HWIO", "NHWC")) + b
        scale = gamma / jnp.sqrt(var + _EPS)
        y = jnp.maximum((y - mean) * scale + beta, 0.0)
        if i < 3:
            nb, h, wd, c = y.shape
            y = y.reshape(nb, h // 2, 2, wd // 2, 2, c).max(axis=(2, 4))
        x = y
    return jnp.mean(x, axis=(1, 2))[:, :, None, None]


if __name__ == "__main__":
    key = jax.random.PRNGKey(0)
    kx, kp = jax.random.split(key)
    x = jax.random.normal(kx, (2, 3, 16, 16), jnp.float32)   # NCHW like PyTorch
    params = init_params(kp)
    prep = prepare_inference_params(params)

    fwd = jax.jit(custom_cnn_forward)
    out = jax.block_until_ready(fwd(x, prep))

    assert out.shape == (2, 256, 1, 1), out.shape
    assert out.dtype == jnp.float32
    assert bool(jnp.all(jnp.isfinite(out)))

    ref = reference_forward(x, params)
    rel = float(jnp.max(jnp.abs(out - ref) / jnp.maximum(jnp.abs(ref), 1.0)))
    assert rel < 5e-2, f"mismatch vs reference: {rel}"   # bf16 weights/activations
    print("KERNEL_OK")
</pallas_src>

<mosaic_0001>
module attributes {stable_mosaic.version = 11 : i64} {
  func.func @_cnn_kernel(%arg0: i32, %arg1: memref<128x128xbf16, #tpu.memory_space<vmem>>, %arg2: memref<384x512xbf16, #tpu.memory_space<vmem>>, %arg3: memref<768x512xbf16, #tpu.memory_space<vmem>>, %arg4: memref<768x512xbf16, #tpu.memory_space<vmem>>, %arg5: memref<768x512xbf16, #tpu.memory_space<vmem>>, %arg6: memref<2x512x256xbf16, #tpu.memory_space<vmem>>, %arg7: memref<2x512x256xbf16, #tpu.memory_space<vmem>>, %arg8: memref<2x512x256xbf16, #tpu.memory_space<vmem>>, %arg9: memref<4x1x512xf32, #tpu.memory_space<vmem>>, %arg10: memref<8x256xf32, #tpu.memory_space<vmem>>) attributes {dimension_semantics = [#tpu.dimension_semantics<parallel>], iteration_bounds = array<i64: 1>, scalar_prefetch = 0 : i64, scratch_operands = 0 : i64, tpu.core_type = #tpu.core_type<tc>, window_params = [{transform_indices = @transform_0, window_bounds = array<i64: 128, 128>}, {pipeline_mode = #tpu.pipeline_mode<synchronous>, transform_indices = @transform_1, window_bounds = array<i64: 384, 512>}, {pipeline_mode = #tpu.pipeline_mode<synchronous>, transform_indices = @transform_2, window_bounds = array<i64: 768, 512>}, {pipeline_mode = #tpu.pipeline_mode<synchronous>, transform_indices = @transform_3, window_bounds = array<i64: 768, 512>}, {pipeline_mode = #tpu.pipeline_mode<synchronous>, transform_indices = @transform_4, window_bounds = array<i64: 768, 512>}, {pipeline_mode = #tpu.pipeline_mode<synchronous>, transform_indices = @transform_5, window_bounds = array<i64: 2, 512, 256>}, {pipeline_mode = #tpu.pipeline_mode<synchronous>, transform_indices = @transform_6, window_bounds = array<i64: 2, 512, 256>}, {pipeline_mode = #tpu.pipeline_mode<synchronous>, transform_indices = @transform_7, window_bounds = array<i64: 2, 512, 256>}, {pipeline_mode = #tpu.pipeline_mode<synchronous>, transform_indices = @transform_8, window_bounds = array<i64: 4, 1, 512>}, {transform_indices = @transform_9, window_bounds = array<i64: 8, 256>}]} {
    %c0 = arith.constant 0 : index
    %c0_0 = arith.constant 0 : index
    %0 = vector.load %arg1[%c0, %c0_0] : memref<128x128xbf16, #tpu.memory_space<vmem>>, vector<128x128xbf16>
    %c0_1 = arith.constant 0 : index
    %c0_2 = arith.constant 0 : index
    %c0_3 = arith.constant 0 : index
    %1 = vector.load %arg9[%c0_1, %c0_2, %c0_3] : memref<4x1x512xf32, #tpu.memory_space<vmem>>, vector<1x1x512xf32>
    %2 = vector.shape_cast %1 : vector<1x1x512xf32> to vector<1x512xf32>
    %cst = arith.constant 0.000000e+00 : bf16
    %3 = vector.broadcast %cst : bf16 to vector<8x128xbf16>
    %4 = vector.extract_strided_slice %0 {offsets = [0, 0], sizes = [120, 128], strides = [1, 1]} : vector<128x128xbf16> to vector<120x128xbf16>
    %5 = tpu.concatenate %3, %4 in 0 : vector<8x128xbf16>, vector<120x128xbf16> -> vector<128x128xbf16>
    %6 = vector.extract_strided_slice %0 {offsets = [8, 0], sizes = [120, 128], strides = [1, 1]} : vector<128x128xbf16> to vector<120x128xbf16>
    %7 = tpu.concatenate %6, %3 in 0 : vector<120x128xbf16>, vector<8x128xbf16> -> vector<128x128xbf16>
    %8 = tpu.concatenate %5, %0, %7 in 1 : vector<128x128xbf16>, vector<128x128xbf16>, vector<128x128xbf16> -> vector<128x384xbf16>
    %c0_4 = arith.constant 0 : index
    %c0_5 = arith.constant 0 : index
    %9 = vector.load %arg2[%c0_4, %c0_5] : memref<384x512xbf16, #tpu.memory_space<vmem>>, vector<384x512xbf16>
    %cst_6 = arith.constant dense<0.000000e+00> : vector<128x512xf32>
    %10 = tpu.matmul %8, %9, %cst_6 {dimension_numbers = #tpu.dot_dimension_numbers<[1], [0], [0], [1], [0, 0, 1, 1], [], []>} : vector<128x384xbf16>, vector<384x512xbf16>, vector<128x512xf32> -> vector<128x512xf32>
    %11 = vector.broadcast %2 : vector<1x512xf32> to vector<128x512xf32>
    %12 = arith.addf %10, %11 : vector<128x512xf32>
    %cst_7 = arith.constant 0.000000e+00 : f32
    %13 = vector.broadcast %cst_7 : f32 to vector<128x512xf32>
    %14 = arith.maximumf %12, %13 : vector<128x512xf32>
    %15 = vector.extract_strided_slice %14 {offsets = [0, 0], sizes = [8, 512], strides = [1, 1]} : vector<128x512xf32> to vector<8x512xf32>
    %16 = vector.extract_strided_slice %14 {offsets = [8, 0], sizes = [8, 512], strides = [1, 1]} : vector<128x512xf32> to vector<8x512xf32>
    %17 = arith.maximumf %15, %16 : vector<8x512xf32>
    %18 = vector.extract_strided_slice %14 {offsets = [16, 0], sizes = [8, 512], strides = [1, 1]} : vector<128x512xf32> to vector<8x512xf32>
    %19 = vector.extract_strided_slice %14 {offsets = [24, 0], sizes = [8, 512], strides = [1, 1]} : vector<128x512xf32> to vector<8x512xf32>
    %20 = arith.maximumf %18, %19 : vector<8x512xf32>
    %21 = vector.extract_strided_slice %14 {offsets = [32, 0], sizes = [8, 512], strides = [1, 1]} : vector<128x512xf32> to vector<8x512xf32>
    %22 = vector.extract_strided_slice %14 {offsets = [40, 0], sizes = [8, 512], strides = [1, 1]} : vector<128x512xf32> to vector<8x512xf32>
    %23 = arith.maximumf %21, %22 : vector<8x512xf32>
    %24 = vector.extract_strided_slice %14 {offsets = [48, 0], sizes = [8, 512], strides = [1, 1]} : vector<128x512xf32> to vector<8x512xf32>
    %25 = vector.extract_strided_slice %14 {offsets = [56, 0], sizes = [8, 512], strides = [1, 1]} : vector<128x512xf32> to vector<8x512xf32>
    %26 = arith.maximumf %24, %25 : vector<8x512xf32>
    %27 = vector.extract_strided_slice %14 {offsets = [64, 0], sizes = [8, 512], strides = [1, 1]} : vector<128x512xf32> to vector<8x512xf32>
    %28 = vector.extract_strided_slice %14 {offsets = [72, 0], sizes = [8, 512], strides = [1, 1]} : vector<128x512xf32> to vector<8x512xf32>
    %29 = arith.maximumf %27, %28 : vector<8x512xf32>
    %30 = vector.extract_strided_slice %14 {offsets = [80, 0], sizes = [8, 512], strides = [1, 1]} : vector<128x512xf32> to vector<8x512xf32>
    %31 = vector.extract_strided_slice %14 {offsets = [88, 0], sizes = [8, 512], strides = [1, 1]} : vector<128x512xf32> to vector<8x512xf32>
    %32 = arith.maximumf %30, %31 : vector<8x512xf32>
    %33 = vector.extract_strided_slice %14 {offsets = [96, 0], sizes = [8, 512], strides = [1, 1]} : vector<128x512xf32> to vector<8x512xf32>
    %34 = vector.extract_strided_slice %14 {offsets = [104, 0], sizes = [8, 512], strides = [1, 1]} : vector<128x512xf32> to vector<8x512xf32>
    %35 = arith.maximumf %33, %34 : vector<8x512xf32>
    %36 = vector.extract_strided_slice %14 {offsets = [112, 0], sizes = [8, 512], strides = [1, 1]} : vector<128x512xf32> to vector<8x512xf32>
    %37 = vector.extract_strided_slice %14 {offsets = [120, 0], sizes = [8, 512], strides = [1, 1]} : vector<128x512xf32> to vector<8x512xf32>
    %38 = arith.maximumf %36, %37 : vector<8x512xf32>
    %39 = tpu.concatenate %17, %20, %23, %26, %29, %32, %35, %38 in 0 : vector<8x512xf32>, vector<8x512xf32>, vector<8x512xf32>, vector<8x512xf32>, vector<8x512xf32>, vector<8x512xf32>, vector<8x512xf32>, vector<8x512xf32> -> vector<64x512xf32>
    %40 = arith.truncf %39 : vector<64x512xf32> to vector<64x512xbf16>
    %c0_8 = arith.constant 0 : index
    %c0_9 = arith.constant 0 : index
    %c0_10 = arith.constant 0 : index
    %41 = vector.load %arg6[%c0_8, %c0_9, %c0_10] : memref<2x512x256xbf16, #tpu.memory_space<vmem>>, vector<1x512x256xbf16>
    %42 = vector.shape_cast %41 : vector<1x512x256xbf16> to vector<512x256xbf16>
    %cst_11 = arith.constant dense<0.000000e+00> : vector<64x256xf32>
    %43 = tpu.matmul %40, %42, %cst_11 {dimension_numbers = #tpu.dot_dimension_numbers<[1], [0], [0], [1], [0, 0, 1, 1], [], []>} : vector<64x512xbf16>, vector<512x256xbf16>, vector<64x256xf32> -> vector<64x256xf32>
    %c1 = arith.constant 1 : index
    %c0_12 = arith.constant 0 : index
    %c0_13 = arith.constant 0 : index
    %44 = vector.load %arg6[%c1, %c0_12, %c0_13] : memref<2x512x256xbf16, #tpu.memory_space<vmem>>, vector<1x512x256xbf16>
    %45 = vector.shape_cast %44 : vector<1x512x256xbf16> to vector<512x256xbf16>
    %cst_14 = arith.constant dense<0.000000e+00> : vector<64x256xf32>
    %46 = tpu.matmul %40, %45, %cst_14 {dimension_numbers = #tpu.dot_dimension_numbers<[1], [0], [0], [1], [0, 0, 1, 1], [], []>} : vector<64x512xbf16>, vector<512x256xbf16>, vector<64x256xf32> -> vector<64x256xf32>
    %47 = arith.maximumf %43, %46 : vector<64x256xf32>
    %48 = arith.truncf %47 : vector<64x256xf32> to vector<64x256xbf16>
    %c1_15 = arith.constant 1 : index
    %c0_16 = arith.constant 0 : index
    %c0_17 = arith.constant 0 : index
    %49 = vector.load %arg9[%c1_15, %c0_16, %c0_17] : memref<4x1x512xf32, #tpu.memory_space<vmem>>, vector<1x1x512xf32>
    %50 = vector.shape_cast %49 : vector<1x1x512xf32> to vector<1x512xf32>
    %cst_18 = arith.constant 0.000000e+00 : bf16
    %51 = vector.broadcast %cst_18 : bf16 to vector<8x256xbf16>
    %52 = vector.extract_strided_slice %48 {offsets = [0, 0], sizes = [56, 256], strides = [1, 1]} : vector<64x256xbf16> to vector<56x256xbf16>
    %53 = tpu.concatenate %51, %52 in 0 : vector<8x256xbf16>, vector<56x256xbf16> -> vector<64x256xbf16>
    %54 = vector.extract_strided_slice %48 {offsets = [8, 0], sizes = [56, 256], strides = [1, 1]} : vector<64x256xbf16> to vector<56x256xbf16>
    %55 = tpu.concatenate %54, %51 in 0 : vector<56x256xbf16>, vector<8x256xbf16> -> vector<64x256xbf16>
    %56 = tpu.concatenate %53, %48, %55 in 1 : vector<64x256xbf16>, vector<64x256xbf16>, vector<64x256xbf16> -> vector<64x768xbf16>
    %c0_19 = arith.constant 0 : index
    %c0_20 = arith.constant 0 : index
    %57 = vector.load %arg3[%c0_19, %c0_20] : memref<768x512xbf16, #tpu.memory_space<vmem>>, vector<768x512xbf16>
    %cst_21 = arith.constant dense<0.000000e+00> : vector<64x512xf32>
    %58 = tpu.matmul %56, %57, %cst_21 {dimension_numbers = #tpu.dot_dimension_numbers<[1], [0], [0], [1], [0, 0, 1, 1], [], []>} : vector<64x768xbf16>, vector<768x512xbf16>, vector<64x512xf32> -> vector<64x512xf32>
    %59 = vector.broadcast %50 : vector<1x512xf32> to vector<64x512xf32>
    %60 = arith.addf %58, %59 : vector<64x512xf32>
    %cst_22 = arith.constant 0.000000e+00 : f32
    %61 = vector.broadcast %cst_22 : f32 to vector<64x512xf32>
    %62 = arith.maximumf %60, %61 : vector<64x512xf32>
    %63 = vector.extract_strided_slice %62 {offsets = [0, 0], sizes = [8, 512], strides = [1, 1]} : vector<64x512xf32> to vector<8x512xf32>
    %64 = vector.extract_strided_slice %62 {offsets = [8, 0], sizes = [8, 512], strides = [1, 1]} : vector<64x512xf32> to vector<8x512xf32>
    %65 = arith.maximumf %63, %64 : vector<8x512xf32>
    %66 = vector.extract_strided_slice %62 {offsets = [16, 0], sizes = [8, 512], strides = [1, 1]} : vector<64x512xf32> to vector<8x512xf32>
    %67 = vector.extract_strided_slice %62 {offsets = [24, 0], sizes = [8, 512], strides = [1, 1]} : vector<64x512xf32> to vector<8x512xf32>
    %68 = arith.maximumf %66, %67 : vector<8x512xf32>
    %69 = vector.extract_strided_slice %62 {offsets = [32, 0], sizes = [8, 512], strides = [1, 1]} : vector<64x512xf32> to vector<8x512xf32>
    %70 = vector.extract_strided_slice %62 {offsets = [40, 0], sizes = [8, 512], strides = [1, 1]} : vector<64x512xf32> to vector<8x512xf32>
    %71 = arith.maximumf %69, %70 : vector<8x512xf32>
    %72 = vector.extract_strided_slice %62 {offsets = [48, 0], sizes = [8, 512], strides = [1, 1]} : vector<64x512xf32> to vector<8x512xf32>
    %73 = vector.extract_strided_slice %62 {offsets = [56, 0], sizes = [8, 512], strides = [1, 1]} : vector<64x512xf32> to vector<8x512xf32>
    %74 = arith.maximumf %72, %73 : vector<8x512xf32>
    %75 = tpu.concatenate %65, %68, %71, %74 in 0 : vector<8x512xf32>, vector<8x512xf32>, vector<8x512xf32>, vector<8x512xf32> -> vector<32x512xf32>
    %76 = arith.truncf %75 : vector<32x512xf32> to vector<32x512xbf16>
    %c0_23 = arith.constant 0 : index
    %c0_24 = arith.constant 0 : index
    %c0_25 = arith.constant 0 : index
    %77 = vector.load %arg7[%c0_23, %c0_24, %c0_25] : memref<2x512x256xbf16, #tpu.memory_space<vmem>>, vector<1x512x256xbf16>
    %78 = vector.shape_cast %77 : vector<1x512x256xbf16> to vector<512x256xbf16>
    %cst_26 = arith.constant dense<0.000000e+00> : vector<32x256xf32>
    %79 = tpu.matmul %76, %78, %cst_26 {dimension_numbers = #tpu.dot_dimension_numbers<[1], [0], [0], [1], [0, 0, 1, 1], [], []>} : vector<32x512xbf16>, vector<512x256xbf16>, vector<32x256xf32> -> vector<32x256xf32>
    %c1_27 = arith.constant 1 : index
    %c0_28 = arith.constant 0 : index
    %c0_29 = arith.constant 0 : index
    %80 = vector.load %arg7[%c1_27, %c0_28, %c0_29] : memref<2x512x256xbf16, #tpu.memory_space<vmem>>, vector<1x512x256xbf16>
    %81 = vector.shape_cast %80 : vector<1x512x256xbf16> to vector<512x256xbf16>
    %cst_30 = arith.constant dense<0.000000e+00> : vector<32x256xf32>
    %82 = tpu.matmul %76, %81, %cst_30 {dimension_numbers = #tpu.dot_dimension_numbers<[1], [0], [0], [1], [0, 0, 1, 1], [], []>} : vector<32x512xbf16>, vector<512x256xbf16>, vector<32x256xf32> -> vector<32x256xf32>
    %83 = arith.maximumf %79, %82 : vector<32x256xf32>
    %84 = arith.truncf %83 : vector<32x256xf32> to vector<32x256xbf16>
    %c2 = arith.constant 2 : index
    %c0_31 = arith.constant 0 : index
    %c0_32 = arith.constant 0 : index
    %85 = vector.load %arg9[%c2, %c0_31, %c0_32] : memref<4x1x512xf32, #tpu.memory_space<vmem>>, vector<1x1x512xf32>
    %86 = vector.shape_cast %85 : vector<1x1x512xf32> to vector<1x512xf32>
    %cst_33 = arith.constant 0.000000e+00 : bf16
    %87 = vector.broadcast %cst_33 : bf16 to vector<8x256xbf16>
    %88 = vector.extract_strided_slice %84 {offsets = [0, 0], sizes = [24, 256], strides = [1, 1]} : vector<32x256xbf16> to vector<24x256xbf16>
    %89 = tpu.concatenate %87, %88 in 0 : vector<8x256xbf16>, vector<24x256xbf16> -> vector<32x256xbf16>
    %90 = vector.extract_strided_slice %84 {offsets = [8, 0], sizes = [24, 256], strides = [1, 1]} : vector<32x256xbf16> to vector<24x256xbf16>
    %91 = tpu.concatenate %90, %87 in 0 : vector<24x256xbf16>, vector<8x256xbf16> -> vector<32x256xbf16>
    %92 = tpu.concatenate %89, %84, %91 in 1 : vector<32x256xbf16>, vector<32x256xbf16>, vector<32x256xbf16> -> vector<32x768xbf16>
    %c0_34 = arith.constant 0 : index
    %c0_35 = arith.constant 0 : index
    %93 = vector.load %arg4[%c0_34, %c0_35] : memref<768x512xbf16, #tpu.memory_space<vmem>>, vector<768x512xbf16>
    %cst_36 = arith.constant dense<0.000000e+00> : vector<32x512xf32>
    %94 = tpu.matmul %92, %93, %cst_36 {dimension_numbers = #tpu.dot_dimension_numbers<[1], [0], [0], [1], [0, 0, 1, 1], [], []>} : vector<32x768xbf16>, vector<768x512xbf16>, vector<32x512xf32> -> vector<32x512xf32>
    %95 = vector.broadcast %86 : vector<1x512xf32> to vector<32x512xf32>
    %96 = arith.addf %94, %95 : vector<32x512xf32>
    %cst_37 = arith.constant 0.000000e+00 : f32
    %97 = vector.broadcast %cst_37 : f32 to vector<32x512xf32>
    %98 = arith.maximumf %96, %97 : vector<32x512xf32>
    %99 = vector.extract_strided_slice %98 {offsets = [0, 0], sizes = [8, 512], strides = [1, 1]} : vector<32x512xf32> to vector<8x512xf32>
    %100 = vector.extract_strided_slice %98 {offsets = [8, 0], sizes = [8, 512], strides = [1, 1]} : vector<32x512xf32> to vector<8x512xf32>
    %101 = arith.maximumf %99, %100 : vector<8x512xf32>
    %102 = vector.extract_strided_slice %98 {offsets = [16, 0], sizes = [8, 512], strides = [1, 1]} : vector<32x512xf32> to vector<8x512xf32>
    %103 = vector.extract_strided_slice %98 {offsets = [24, 0], sizes = [8, 512], strides = [1, 1]} : vector<32x512xf32> to vector<8x512xf32>
    %104 = arith.maximumf %102, %103 : vector<8x512xf32>
    %105 = tpu.concatenate %101, %104 in 0 : vector<8x512xf32>, vector<8x512xf32> -> vector<16x512xf32>
    %106 = arith.truncf %105 : vector<16x512xf32> to vector<16x512xbf16>
    %c0_38 = arith.constant 0 : index
    %c0_39 = arith.constant 0 : index
    %c0_40 = arith.constant 0 : index
    %107 = vector.load %arg8[%c0_38, %c0_39, %c0_40] : memref<2x512x256xbf16, #tpu.memory_space<vmem>>, vector<1x512x256xbf16>
    %108 = vector.shape_cast %107 : vector<1x512x256xbf16> to vector<512x256xbf16>
    %cst_41 = arith.constant dense<0.000000e+00> : vector<16x256xf32>
    %109 = tpu.matmul %106, %108, %cst_41 {dimension_numbers = #tpu.dot_dimension_numbers<[1], [0], [0], [1], [0, 0, 1, 1], [], []>} : vector<16x512xbf16>, vector<512x256xbf16>, vector<16x256xf32> -> vector<16x256xf32>
    %c1_42 = arith.constant 1 : index
    %c0_43 = arith.constant 0 : index
    %c0_44 = arith.constant 0 : index
    %110 = vector.load %arg8[%c1_42, %c0_43, %c0_44] : memref<2x512x256xbf16, #tpu.memory_space<vmem>>, vector<1x512x256xbf16>
    %111 = vector.shape_cast %110 : vector<1x512x256xbf16> to vector<512x256xbf16>
    %cst_45 = arith.constant dense<0.000000e+00> : vector<16x256xf32>
    %112 = tpu.matmul %106, %111, %cst_45 {dimension_numbers = #tpu.dot_dimension_numbers<[1], [0], [0], [1], [0, 0, 1, 1], [], []>} : vector<16x512xbf16>, vector<512x256xbf16>, vector<16x256xf32> -> vector<16x256xf32>
    %113 = arith.maximumf %109, %112 : vector<16x256xf32>
    %114 = arith.truncf %113 : vector<16x256xf32> to vector<16x256xbf16>
    %c3 = arith.constant 3 : index
    %c0_46 = arith.constant 0 : index
    %c0_47 = arith.constant 0 : index
    %115 = vector.load %arg9[%c3, %c0_46, %c0_47] : memref<4x1x512xf32, #tpu.memory_space<vmem>>, vector<1x1x512xf32>
    %116 = vector.shape_cast %115 : vector<1x1x512xf32> to vector<1x512xf32>
    %cst_48 = arith.constant 0.000000e+00 : bf16
    %117 = vector.broadcast %cst_48 : bf16 to vector<8x256xbf16>
    %118 = vector.extract_strided_slice %114 {offsets = [0, 0], sizes = [8, 256], strides = [1, 1]} : vector<16x256xbf16> to vector<8x256xbf16>
    %119 = tpu.concatenate %117, %118 in 0 : vector<8x256xbf16>, vector<8x256xbf16> -> vector<16x256xbf16>
    %120 = vector.extract_strided_slice %114 {offsets = [8, 0], sizes = [8, 256], strides = [1, 1]} : vector<16x256xbf16> to vector<8x256xbf16>
    %121 = tpu.concatenate %120, %117 in 0 : vector<8x256xbf16>, vector<8x256xbf16> -> vector<16x256xbf16>
    %122 = tpu.concatenate %119, %114, %121 in 1 : vector<16x256xbf16>, vector<16x256xbf16>, vector<16x256xbf16> -> vector<16x768xbf16>
    %c0_49 = arith.constant 0 : index
    %c0_50 = arith.constant 0 : index
    %123 = vector.load %arg5[%c0_49, %c0_50] : memref<768x512xbf16, #tpu.memory_space<vmem>>, vector<768x512xbf16>
    %cst_51 = arith.constant dense<0.000000e+00> : vector<16x512xf32>
    %124 = tpu.matmul %122, %123, %cst_51 {dimension_numbers = #tpu.dot_dimension_numbers<[1], [0], [0], [1], [0, 0, 1, 1], [], []>} : vector<16x768xbf16>, vector<768x512xbf16>, vector<16x512xf32> -> vector<16x512xf32>
    %125 = vector.broadcast %116 : vector<1x512xf32> to vector<16x512xf32>
    %126 = arith.addf %124, %125 : vector<16x512xf32>
    %cst_52 = arith.constant 0.000000e+00 : f32
    %127 = vector.broadcast %cst_52 : f32 to vector<16x512xf32>
    %128 = arith.maximumf %126, %127 : vector<16x512xf32>
    %129 = vector.extract_strided_slice %128 {offsets = [0, 0], sizes = [8, 256], strides = [1, 1]} : vector<16x512xf32> to vector<8x256xf32>
    %130 = vector.extract_strided_slice %128 {offsets = [0, 256], sizes = [8, 256], strides = [1, 1]} : vector<16x512xf32> to vector<8x256xf32>
    %131 = arith.addf %129, %130 : vector<8x256xf32>
    %132 = vector.extract_strided_slice %128 {offsets = [8, 0], sizes = [8, 256], strides = [1, 1]} : vector<16x512xf32> to vector<8x256xf32>
    %133 = arith.addf %131, %132 : vector<8x256xf32>
    %134 = vector.extract_strided_slice %128 {offsets = [8, 256], sizes = [8, 256], strides = [1, 1]} : vector<16x512xf32> to vector<8x256xf32>
    %135 = arith.addf %133, %134 : vector<8x256xf32>
    %cst_53 = arith.constant 2.500000e-01 : f32
    %136 = vector.broadcast %cst_53 : f32 to vector<8x256xf32>
    %137 = arith.mulf %136, %135 : vector<8x256xf32>
    %c0_54 = arith.constant 0 : index
    %c0_55 = arith.constant 0 : index
    %138 = vector.load %arg10[%c0_54, %c0_55] : memref<8x256xf32, #tpu.memory_space<vmem>>, vector<8x256xf32>
    tpu.vector_store %arg10[%c0_54, %c0_55], %137 {strides = array<i32>} : memref<8x256xf32, #tpu.memory_space<vmem>>, vector<8x256xf32>,
    return
  }
  func.func @transform_0(%arg0: i32) -> (i32, i32) {
    %c0_i32 = arith.constant 0 : i32
    %c0_i32_0 = arith.constant 0 : i32
    return %arg0, %c0_i32 : i32, i32
  }
  func.func @transform_1(%arg0: i32) -> (i32, i32) {
    %c0_i32 = arith.constant 0 : i32
    %c0_i32_0 = arith.constant 0 : i32
    %c0_i32_1 = arith.constant 0 : i32
    return %c0_i32, %c0_i32_0 : i32, i32
  }
  func.func @transform_2(%arg0: i32) -> (i32, i32) {
    %c0_i32 = arith.constant 0 : i32
    %c0_i32_0 = arith.constant 0 : i32
    %c0_i32_1 = arith.constant 0 : i32
    return %c0_i32, %c0_i32_0 : i32, i32
  }
  func.func @transform_3(%arg0: i32) -> (i32, i32) {
    %c0_i32 = arith.constant 0 : i32
    %c0_i32_0 = arith.constant 0 : i32
    %c0_i32_1 = arith.constant 0 : i32
    return %c0_i32, %c0_i32_0 : i32, i32
  }
  func.func @transform_4(%arg0: i32) -> (i32, i32) {
    %c0_i32 = arith.constant 0 : i32
    %c0_i32_0 = arith.constant 0 : i32
    %c0_i32_1 = arith.constant 0 : i32
    return %c0_i32, %c0_i32_0 : i32, i32
  }
  func.func @transform_5(%arg0: i32) -> (i32, i32, i32) {
    %c0_i32 = arith.constant 0 : i32
    %c0_i32_0 = arith.constant 0 : i32
    %c0_i32_1 = arith.constant 0 : i32
    %c0_i32_2 = arith.constant 0 : i32
    return %c0_i32, %c0_i32_0, %c0_i32_1 : i32, i32, i32
  }
  func.func @transform_6(%arg0: i32) -> (i32, i32, i32) {
    %c0_i32 = arith.constant 0 : i32
    %c0_i32_0 = arith.constant 0 : i32
    %c0_i32_1 = arith.constant 0 : i32
    %c0_i32_2 = arith.constant 0 : i32
    return %c0_i32, %c0_i32_0, %c0_i32_1 : i32, i32, i32
  }
  func.func @transform_7(%arg0: i32) -> (i32, i32, i32) {
    %c0_i32 = arith.constant 0 : i32
    %c0_i32_0 = arith.constant 0 : i32
    %c0_i32_1 = arith.constant 0 : i32
    %c0_i32_2 = arith.constant 0 : i32
    return %c0_i32, %c0_i32_0, %c0_i32_1 : i32, i32, i32
  }
  func.func @transform_8(%arg0: i32) -> (i32, i32, i32) {
    %c0_i32 = arith.constant 0 : i32
    %c0_i32_0 = arith.constant 0 : i32
    %c0_i32_1 = arith.constant 0 : i32
    %c0_i32_2 = arith.constant 0 : i32
    return %c0_i32, %c0_i32_0, %c0_i32_1 : i32, i32, i32
  }
  func.func @transform_9(%arg0: i32) -> (i32, i32) {
    %c0_i32 = arith.constant 0 : i32
    %c0_i32_0 = arith.constant 0 : i32
    return %arg0, %c0_i32 : i32, i32
  }
}

</mosaic_0001>

<bundles_post_ra>
// kernel: custom_cnn_forward.1
= control target key start
LH: loop header
LB: loop body
LE: loop exit
PB: predicated region body
PF: predicated region fallthrough
CT: control target
= control target key end

     0   :  { %14 = vsyncpa [#allocation3], 0  ;;  %s13479_s0 = inlined_call_operand.vmem [shape: bf16[128,128], index: 0, kind: input, shape index: {}]   ;;  %s13480_s1 = inlined_call_operand.hbm [shape: bf16[384,512], index: 1, kind: input, shape index: {}]   ;;  %s13481_s2 = inlined_call_operand.hbm [shape: bf16[768,512], index: 2, kind: input, shape index: {}]   ;;  %s13482_s3 = inlined_call_operand.hbm [shape: bf16[768,512], index: 3, kind: input, shape index: {}]   ;;  %s13483_s4 = inlined_call_operand.hbm [shape: bf16[768,512], index: 4, kind: input, shape index: {}]   ;;  %s13484_s5 = inlined_call_operand.vmem [shape: bf16[2,512,256], index: 5, kind: input, shape index: {}]   ;;  %s13485_s6 = inlined_call_operand.hbm [shape: bf16[2,512,256], index: 6, kind: input, shape index: {}]   ;;  %s13486_s7 = inlined_call_operand.hbm [shape: bf16[2,512,256], index: 7, kind: input, shape index: {}]   ;;  %s13487_s8 = inlined_call_operand.vmem [shape: f32[4,1,512], index: 8, kind: input, shape index: {}]   ;;  %s13488_s9 = inlined_call_operand.vmem [shape: f32[8,256], index: 9, kind: output, shape index: {}]  }
   0x1   :  { %15 = vsyncpa [#allocation5], 0 }
   0x2   :  { %16 = vsyncpa [#allocation8], 0 }
   0x3   :  { %17 = vsyncpa [#allocation11], 0  ;;  %s12404_s30 = smov [#allocation4]   ;;  %s12405_s11 = smov [#allocation7]  }
   0x4   :  { %s37_s10 = sshll.u32 %s12404_s30, 4  ;;  %s61_s12 = sshll.u32 %s12405_s11, 4  ;;  %s38_s10 = int_to_ptr.vmem [resolvable:$true] %s37_s10  ;;  %s12465_s12 = int_to_ptr.vmem [resolvable:$true] %s61_s12 }
   0x5   :  { %s12264_s15 = scalar_lea.hbm %s13481_s2, 24576 }
   0x6   :  { %p12265_p0 = scmp.ne.s32.totalorder %s13481_s2, %s12264_s15  ;;  %p12268_p1 = scmp.lt.u32.totalorder %s12264_s15, %s13481_s2 }
   0x8   :  { %p12270_p2 = pnand %p12268_p1, %p12265_p0 }
   0xa   :  { %12273 = shalt.err (!%p12270_p2)
}
   0xb   :  { %s12274_s20 = scalar_lea.vmem %s38_s10, 24576  ;;  %p12279_p4 = scmp.lt.s32.totalorder %s38_s10, %s38_s10 }
   0xc   :  { %p12275_p3 = scmp.ne.s32.totalorder %s38_s10, %s12274_s20  ;;  %p12280_p5 = scmp.lt.s32.totalorder %s12274_s20, %s12274_s20 }
   0xe   :  { %p12281_p6 = por %p12280_p5, %p12279_p4 }
  0x10   :  { %p12282_p7 = pnand %p12281_p6, %p12275_p3 }
  0x12   :  { %12285 = shalt.err (!%p12282_p7)
}
  0x13   :  { %s12406_s21 = smov 256   ;;  %s12407_s22 = smov 16  }
  0x14   :  { %43 = dma.hbm_to_vmem [thread:$0]  %s13481_s2, 24576, %s38_s10, [#allocation5], %s12406_s21, %s12406_s21, %s12407_s22  }
  0x15   :  { %s12286_s27 = scalar_lea.hbm %s13483_s4, 24576 }
  0x16   :  { %p12287_p8 = scmp.ne.s32.totalorder %s13483_s4, %s12286_s27  ;;  %p12290_p9 = scmp.lt.u32.totalorder %s12286_s27, %s13483_s4 }
  0x18   :  { %p12292_p10 = pnand %p12290_p9, %p12287_p8 }
  0x1a   :  { %12295 = shalt.err (!%p12292_p10)
}
  0x1b   :  { %s12296_s13 = scalar_lea.vmem %s12465_s12, 24576  ;;  %p12301_p12 = scmp.lt.s32.totalorder %s12465_s12, %s12465_s12 }
  0x1c   :  { %p12297_p11 = scmp.ne.s32.totalorder %s12465_s12, %s12296_s13  ;;  %p12302_p13 = scmp.lt.s32.totalorder %s12296_s13, %s12296_s13 }
  0x1e   :  { %p12303_p0 = por %p12302_p13, %p12301_p12 }
  0x20   :  { %p12304_p1 = pnand %p12303_p0, %p12297_p11 }
  0x22   :  { %12307 = shalt.err (!%p12304_p1)
}
  0x23   :  { %67 = dma.hbm_to_vmem [thread:$0]  %s13483_s4, 24576, %s12465_s12, [#allocation8], %s12406_s21, %s12406_s21, %s12407_s22  }
  0x24   :  { %s12408_s14 = smov [#allocation2]   ;;  %s12409_s16 = smov [#allocation6]  }
  0x25   :  { %s25_s15 = sshll.u32 %s12408_s14, 4  ;;  %s49_s17 = sshll.u32 %s12409_s16, 4  ;;  %s26_s15 = int_to_ptr.vmem [resolvable:$true] %s25_s15  ;;  %s12502_s17 = int_to_ptr.vmem [resolvable:$true] %s49_s17 }
  0x26   :  { %s12308_s20 = scalar_lea.hbm %s13480_s1, 12288 }
  0x27   :  { %p12309_p2 = scmp.ne.s32.totalorder %s13480_s1, %s12308_s20  ;;  %p12312_p3 = scmp.lt.u32.totalorder %s12308_s20, %s13480_s1 }
  0x29   :  { %p12314_p4 = pnand %p12312_p3, %p12309_p2 }
  0x2b   :  { %12317 = shalt.err (!%p12314_p4)
}
  0x2c   :  { %s12318_s4 = scalar_lea.vmem %s26_s15, 12288  ;;  %p12323_p6 = scmp.lt.s32.totalorder %s26_s15, %s26_s15 }
  0x2d   :  { %p12319_p5 = scmp.ne.s32.totalorder %s26_s15, %s12318_s4  ;;  %p12324_p7 = scmp.lt.s32.totalorder %s12318_s4, %s12318_s4 }
  0x2f   :  { %p12325_p8 = por %p12324_p7, %p12323_p6 }
  0x31   :  { %p12326_p9 = pnand %p12325_p8, %p12319_p5 }
  0x33   :  { %12329 = shalt.err (!%p12326_p9)
}
  0x34   :  { %31 = dma.hbm_to_vmem [thread:$0]  %s13480_s1, 12288, %s26_s15, [#allocation3], %s12406_s21, %s12406_s21, %s12407_s22  }
  0x35   :  { %s12330_s30 = scalar_lea.hbm %s13482_s3, 24576 }
  0x36   :  { %p12331_p10 = scmp.ne.s32.totalorder %s13482_s3, %s12330_s30  ;;  %p12334_p11 = scmp.lt.u32.totalorder %s12330_s30, %s13482_s3 }
  0x38   :  { %p12336_p12 = pnand %p12334_p11, %p12331_p10 }
  0x3a   :  { %12339 = shalt.err (!%p12336_p12)
}
  0x3b   :  { %s12340_s14 = scalar_lea.vmem %s12502_s17, 24576  ;;  %p12345_p0 = scmp.lt.s32.totalorder %s12502_s17, %s12502_s17 }
  0x3c   :  { %p12341_p13 = scmp.ne.s32.totalorder %s12502_s17, %s12340_s14  ;;  %p12346_p1 = scmp.lt.s32.totalorder %s12340_s14, %s12340_s14 }
  0x3e   :  { %p12347_p2 = por %p12346_p1, %p12345_p0 }
  0x40   :  { %p12348_p3 = pnand %p12347_p2, %p12341_p13 }
  0x42   :  { %12351 = shalt.err (!%p12348_p3)
}
  0x43   :  { %55 = dma.hbm_to_vmem [thread:$0]  %s13482_s3, 24576, %s12502_s17, [#allocation5], %s12406_s21, %s12406_s21, %s12407_s22  }
  0x44   :  { %s12410_s16 = smov [#allocation9]   ;;  %s12352_s23 = scalar_lea.hbm %s13485_s6, 16384 }
  0x45   :  { %s75_s18 = sshll.u32 %s12410_s16, 4  ;;  %p12353_p4 = scmp.ne.s32.totalorder %s13485_s6, %s12352_s23  ;;  %s76_s18 = int_to_ptr.vmem [resolvable:$true] %s75_s18 }
  0x46   :  { %p12356_p5 = scmp.lt.u32.totalorder %s12352_s23, %s13485_s6 }
  0x48   :  { %p12358_p6 = pnand %p12356_p5, %p12353_p4 }
  0x4a   :  { %12361 = shalt.err (!%p12358_p6)
}
  0x4b   :  { %s12362_s12 = scalar_lea.vmem %s76_s18, 16384  ;;  %p12367_p8 = scmp.lt.s32.totalorder %s76_s18, %s76_s18 }
  0x4c   :  { %p12363_p7 = scmp.ne.s32.totalorder %s76_s18, %s12362_s12  ;;  %p12368_p9 = scmp.lt.s32.totalorder %s12362_s12, %s12362_s12 }
  0x4e   :  { %p12369_p10 = por %p12368_p9, %p12367_p8 }
  0x50   :  { %p12370_p11 = pnand %p12369_p10, %p12363_p7 }
  0x52   :  { %12373 = shalt.err (!%p12370_p11)
}
  0x53   :  { %s12411_s3 = smov 128   ;;  %s12412_s21 = smov 8  }
  0x54   :  { %81 = dma.hbm_to_vmem [thread:$0]  %s13485_s6, 16384, %s76_s18, [#allocation8], %s12411_s3, %s12411_s3, %s12412_s21  }
  0x55   :  { %s12413_s27 = smov [#allocation10]   ;;  %s12374_s11 = scalar_lea.hbm %s13486_s7, 16384 }
  0x56   :  { %s87_s28 = sshll.u32 %s12413_s27, 4  ;;  %p12375_p12 = scmp.ne.s32.totalorder %s13486_s7, %s12374_s11  ;;  %s88_s28 = int_to_ptr.vmem [resolvable:$true] %s87_s28 }
  0x57   :  { %p12378_p13 = scmp.lt.u32.totalorder %s12374_s11, %s13486_s7 }
  0x59   :  { %p12380_p0 = pnand %p12378_p13, %p12375_p12 }
  0x5b   :  { %12383 = shalt.err (!%p12380_p0)
}
  0x5c   :  { %s12384_s1 = scalar_lea.vmem %s88_s28, 16384  ;;  %p12389_p2 = scmp.lt.s32.totalorder %s88_s28, %s88_s28 }
  0x5d   :  { %p12385_p1 = scmp.ne.s32.totalorder %s88_s28, %s12384_s1  ;;  %p12390_p3 = scmp.lt.s32.totalorder %s12384_s1, %s12384_s1 }
  0x5f   :  { %p12391_p4 = por %p12390_p3, %p12389_p2 }
  0x61   :  { %p12392_p5 = pnand %p12391_p4, %p12385_p1 }
  0x63   :  { %12395 = shalt.err (!%p12392_p5)
}
  0x64   :  { %93 = dma.hbm_to_vmem [thread:$0]  %s13486_s7, 16384, %s88_s28, [#allocation11], %s12411_s3, %s12411_s3, %s12412_s21  }
  0x65   :  { %12396 = dma.done.wait [#allocation3], 12288  }
  0x66   :  { %12397 = vsyncadd [#allocation3], 4294955008 }
  0x67   :  { %12398 = dma.done.wait [#allocation5], 49152  }
  0x68   :  { %12399 = vsyncadd [#allocation5], 4294918144 }
  0x69   :  { %12400 = dma.done.wait [#allocation8], 40960  }
  0x6a   :  { %12401 = vsyncadd [#allocation8], 4294926336 }
  0x6b   :  { %12402 = dma.done.wait [#allocation11], 16384  }
  0x6c   :  { %12403 = vsyncadd [#allocation11], 4294950912  ;;  %v10663_v0 = vld [vmem:[#allocation2 + $0x4] ss:$16 sps:$4 sm:$0xff]   ;;  %v10665_v1 = vld [vmem:[#allocation2 + $0xc] ss:$16 sps:$4 sm:$0xff]  }
  0x6d   :  { %801 = vmatprep.subr.bf16.mxu0 %v10663_v0  ;;  %v10667_v2 = vld [vmem:[#allocation2] ss:$16 sps:$4 sm:$0xff]   ;;  %v10668_v3 = vld [vmem:[#allocation2 + $0x8] ss:$16 sps:$4 sm:$0xff]   ;;  %1027 = vmatprep.subr.bf16.mxu1 %v10665_v1  ;;  %v10669_v4 = vld [vmem:[#allocation2 + $0x24] ss:$16 sps:$4 sm:$0xff]  }
  0x6e   :  { %802 = vmatpush1.bf16.msra.mxu0 %v10667_v2  ;;  %1028 = vmatpush1.bf16.msra.mxu1 %v10668_v3  ;;  %v10671_v5 = vld [vmem:[#allocation2 + $0x2c] ss:$16 sps:$4 sm:$0xff]   ;;  %v10673_v6 = vld [vmem:[#allocation2 + $0x20] ss:$16 sps:$4 sm:$0xff]   ;;  %v10674_v7 = vld [vmem:[#allocation2 + $0x28] ss:$16 sps:$4 sm:$0xff]  }
  0x6f   :  { %803 = vmatprep.subr.bf16.mxu0 %v10669_v4  ;;  %1029 = vmatprep.subr.bf16.mxu1 %v10671_v5  ;;  %v10675_v8 = vld [vmem:[#allocation2 + $0x44] ss:$16 sps:$4 sm:$0xff]   ;;  %v10677_v9 = vld [vmem:[#allocation2 + $0x4c] ss:$16 sps:$4 sm:$0xff]   ;;  %v10679_v10 = vld [vmem:[#allocation2 + $0x40] ss:$16 sps:$4 sm:$0xff]  }
  0x70   :  { %v10680_v11 = vld [vmem:[#allocation2 + $0x48] ss:$16 sps:$4 sm:$0xff]   ;;  %v10681_v12 = vld [vmem:[#allocation2 + $0x64] ss:$16 sps:$4 sm:$0xff]   ;;  %v10683_v13 = vld [vmem:[#allocation2 + $0x6c] ss:$16 sps:$4 sm:$0xff]  }
  0x71   :  { %v10685_v14 = vld [vmem:[#allocation2 + $0x60] ss:$16 sps:$4 sm:$0xff]   ;;  %v10686_v15 = vld [vmem:[#allocation2 + $0x68] ss:$16 sps:$4 sm:$0xff]   ;;  %v10687_v16 = vld [vmem:[#allocation2 + $0x84] ss:$16 sps:$4 sm:$0xff]  }
  0x72   :  { %804 = vmatpush1.bf16.msra.mxu0 %v10673_v6  ;;  %1030 = vmatpush1.bf16.msra.mxu1 %v10674_v7  ;;  %v10689_v17 = vld [vmem:[#allocation2 + $0x8c] ss:$16 sps:$4 sm:$0xff]   ;;  %v10691_v18 = vld [vmem:[#allocation2 + $0x80] ss:$16 sps:$4 sm:$0xff]   ;;  %v10692_v19 = vld [vmem:[#allocation2 + $0x88] ss:$16 sps:$4 sm:$0xff]  }
  0x73   :  { %805 = vmatprep.subr.bf16.mxu0 %v10675_v8  ;;  %1031 = vmatprep.subr.bf16.mxu1 %v10677_v9  ;;  %v10693_v20 = vld [vmem:[#allocation2 + $0xa4] ss:$16 sps:$4 sm:$0xff]   ;;  %v10695_v21 = vld [vmem:[#allocation2 + $0xac] ss:$16 sps:$4 sm:$0xff]   ;;  %v10697_v22 = vld [vmem:[#allocation2 + $0xa0] ss:$16 sps:$4 sm:$0xff]  }
  0x74   :  { %v10698_v23 = vld [vmem:[#allocation2 + $0xa8] ss:$16 sps:$4 sm:$0xff]   ;;  %v10699_v24 = vld [vmem:[#allocation2 + $0xc4] ss:$16 sps:$4 sm:$0xff]   ;;  %v10701_v25 = vld [vmem:[#allocation2 + $0xcc] ss:$16 sps:$4 sm:$0xff]  }
  0x75   :  { %v10703_v26 = vld [vmem:[#allocation2 + $0xc0] ss:$16 sps:$4 sm:$0xff]   ;;  %v10704_v27 = vld [vmem:[#allocation2 + $0xc8] ss:$16 sps:$4 sm:$0xff]   ;;  %v10705_v28 = vld [vmem:[#allocation2 + $0xe4] ss:$16 sps:$4 sm:$0xff]  }
  0x76   :  { %806 = vmatpush1.bf16.msra.mxu0 %v10679_v10  ;;  %1032 = vmatpush1.bf16.msra.mxu1 %v10680_v11  ;;  %v10707_v29 = vld [vmem:[#allocation2 + $0xec] ss:$16 sps:$4 sm:$0xff]   ;;  %v10709_v30 = vld [vmem:[#allocation2 + $0xe0] ss:$16 sps:$4 sm:$0xff]   ;;  %v10710_v31 = vld [vmem:[#allocation2 + $0xe8] ss:$16 sps:$4 sm:$0xff]  }
  0x77   :  { %807 = vmatprep.subr.bf16.mxu0 %v10681_v12  ;;  %1033 = vmatprep.subr.bf16.mxu1 %v10683_v13  ;;  %v10711_v32 = vld [vmem:[#allocation2 + $0x104] ss:$16 sps:$4 sm:$0xff]   ;;  %v10713_v33 = vld [vmem:[#allocation2 + $0x10c] ss:$16 sps:$4 sm:$0xff]   ;;  %v10715_v34 = vld [vmem:[#allocation2 + $0x100] ss:$16 sps:$4 sm:$0xff]  }
  0x78   :  { %v10716_v35 = vld [vmem:[#allocation2 + $0x108] ss:$16 sps:$4 sm:$0xff]   ;;  %v10717_v36 = vld [vmem:[#allocation2 + $0x124] ss:$16 sps:$4 sm:$0xff]   ;;  %v10719_v37 = vld [vmem:[#allocation2 + $0x12c] ss:$16 sps:$4 sm:$0xff]  }
  0x79   :  { %v10721_v38 = vld [vmem:[#allocation2 + $0x120] ss:$16 sps:$4 sm:$0xff]   ;;  %v10722_v39 = vld [vmem:[#allocation2 + $0x128] ss:$16 sps:$4 sm:$0xff]   ;;  %v10723_v40 = vld [vmem:[#allocation2 + $0x144] ss:$16 sps:$4 sm:$0xff]  }
  0x7a   :  { %808 = vmatpush1.bf16.msra.mxu0 %v10685_v14  ;;  %1034 = vmatpush1.bf16.msra.mxu1 %v10686_v15  ;;  %v10725_v41 = vld [vmem:[#allocation2 + $0x14c] ss:$16 sps:$4 sm:$0xff]   ;;  %v10727_v42 = vld [vmem:[#allocation2 + $0x140] ss:$16 sps:$4 sm:$0xff]   ;;  %v10728_v43 = vld [vmem:[#allocation2 + $0x148] ss:$16 sps:$4 sm:$0xff]  }
  0x7b   :  { %809 = vmatprep.subr.bf16.mxu0 %v10687_v16  ;;  %1035 = vmatprep.subr.bf16.mxu1 %v10689_v17  ;;  %v10729_v44 = vld [vmem:[#allocation2 + $0x164] ss:$16 sps:$4 sm:$0xff]   ;;  %v10731_v45 = vld [vmem:[#allocation2 + $0x16c] ss:$16 sps:$4 sm:$0xff]   ;;  %v115_v46 = vld [vmem:[%s13479_s0] sm:$0xf] }
  0x7c   :  { %v10733_v47 = vld [vmem:[#allocation2 + $0x160] ss:$16 sps:$4 sm:$0xff]   ;;  %v12569_v48 = vld [vmem:[%s13479_s0 + $0x4] sm:$0xf]  ;;  %v10734_v49 = vld [vmem:[#allocation2 + $0x168] ss:$16 sps:$4 sm:$0xff]   ;;  %v9118_v7 = vcombine.low %v115_v46, %v115_v46 }
  0x7d   :  { %v10735_v50 = vld [vmem:[#allocation2 + $0x184] ss:$16 sps:$4 sm:$0xff]   ;;  %v9127_v51 = vcombine.low %v115_v46, %v12569_v48  ;;  %v10737_v52 = vld [vmem:[#allocation2 + $0x18c] ss:$16 sps:$4 sm:$0xff]   ;;  %v10739_v53 = vld [vmem:[#allocation2 + $0x180] ss:$16 sps:$4 sm:$0xff]  }
  0x7e   :  { %810 = vmatpush1.bf16.msra.mxu0 %v10691_v18  ;;  %1036 = vmatpush1.bf16.msra.mxu1 %v10692_v19  ;;  %v10740_v54 = vld [vmem:[#allocation2 + $0x188] ss:$16 sps:$4 sm:$0xff]   ;;  %v10741_v55 = vld [vmem:[#allocation2 + $0x1a4] ss:$16 sps:$4 sm:$0xff]   ;;  %v10743_v56 = vld [vmem:[#allocation2 + $0x1ac] ss:$16 sps:$4 sm:$0xff]  }
  0x7f   :  { %811 = vmatprep.subr.bf16.mxu0 %v10693_v20  ;;  %1037 = vmatprep.subr.bf16.mxu1 %v10695_v21  ;;  %v10745_v57 = vld [vmem:[#allocation2 + $0x1a0] ss:$16 sps:$4 sm:$0xff]   ;;  %v10746_v58 = vld [vmem:[#allocation2 + $0x1a8] ss:$16 sps:$4 sm:$0xff]   ;;  %v10747_v59 = vld [vmem:[#allocation2 + $0x1c4] ss:$16 sps:$4 sm:$0xff]  }
  0x80   :  { %833 = vmatprep.mubr.bf16.mxu0 %v9127_v51  ;;  %1059 = vmatprep.mubr.bf16.mxu1 %v9127_v51  ;;  %v10749_v60 = vld [vmem:[#allocation2 + $0x1cc] ss:$16 sps:$4 sm:$0xff]   ;;  %v10751_v61 = vld [vmem:[#allocation2 + $0x1c0] ss:$16 sps:$4 sm:$0xff]   ;;  %v10752_v62 = vld [vmem:[#allocation2 + $0x1c8] ss:$16 sps:$4 sm:$0xff]  }
  0x81   :  { %v10753_v63 = vld [vmem:[#allocation2 + $0x1e4] ss:$16 sps:$4 sm:$0xff]   ;;  %v10755_v0 = vld [vmem:[#allocation2 + $0x1ec] ss:$16 sps:$4 sm:$0xff]   ;;  %v10757_v1 = vld [vmem:[#allocation2 + $0x1e0] ss:$16 sps:$4 sm:$0xff]  }
  0x82   :  { %812 = vmatpush1.bf16.msra.mxu0 %v10697_v22  ;;  %1038 = vmatpush1.bf16.msra.mxu1 %v10698_v23  ;;  %v10758_v2 = vld [vmem:[#allocation2 + $0x1e8] ss:$16 sps:$4 sm:$0xff]   ;;  %v10764_v4 = vld [vmem:[#allocation2 + $0x204] ss:$16 sps:$4 sm:$0xff]   ;;  %vm177_vm0 = vcmask 1043456  }
  0x83   :  { %813 = vmatprep.subr.bf16.mxu0 %v10699_v24  ;;  %1039 = vmatprep.subr.bf16.mxu1 %v10701_v25  ;;  %v117_v3 = vld [vmem:[%s13479_s0 + $0x8] sm:$0xf]  ;;  %v118_v5 = vld [vmem:[%s13479_s0 + $0xc] sm:$0xf]  ;;  %vm12579_vm1 = vmneg %vm177_vm0 }
  0x84   :  { %v10786_v6 = vld [vmem:[#allocation2 + $0x20c] ss:$16 sps:$4 sm:$0xff]   ;;  %v10762_v9 = vld [vmem:[#allocation2 + $0x200] ss:$16 sps:$4 sm:$0xff]   ;;  %v9128_v10 = vcombine.low %v117_v3, %v118_v5  ;;  %v10768_v11 = vld [vmem:[#allocation2 + $0x224] ss:$16 sps:$4 sm:$0xff]   ;;  %v12594_v19 = vcombine.low %v12569_v48, %v117_v3 }
  0x85   :  { %v10766_v12 = vld [vmem:[#allocation2 + $0x220] ss:$16 sps:$4 sm:$0xff]   ;;  %v10784_v13 = vld [vmem:[#allocation2 + $0x208] ss:$16 sps:$4 sm:$0xff]   ;;  %v10789_v15 = vld [vmem:[#allocation2 + $0x22c] ss:$16 sps:$4 sm:$0xff]  }
  0x86   :  { %814 = vmatpush1.bf16.msra.mxu0 %v10703_v26  ;;  %1040 = vmatpush1.bf16.msra.mxu1 %v10704_v27  ;;  %v119_v14 = vld [vmem:[%s13479_s0 + $0x10] sm:$0xf]  ;;  %v120_v16 = vld [vmem:[%s13479_s0 + $0x14] sm:$0xf]  ;;  %v10787_v18 = vld [vmem:[#allocation2 + $0x228] ss:$16 sps:$4 sm:$0xff]  }
  0x87   :  { %815 = vmatprep.subr.bf16.mxu0 %v10705_v28  ;;  %1041 = vmatprep.subr.bf16.mxu1 %v10707_v29  ;;  %v10773_v17 = vld [vmem:[#allocation2 + $0x244] ss:$16 sps:$4 sm:$0xff]   ;;  %v9129_v20 = vcombine.low %v119_v14, %v120_v16  ;;  %v10771_v21 = vld [vmem:[#allocation2 + $0x240] ss:$16 sps:$4 sm:$0xff]   ;;  %v10797_v22 = vld [vmem:[#allocation2 + $0x24c] ss:$16 sps:$4 sm:$0xff]  }
  0x88   :  { %v10778_v23 = vld [vmem:[#allocation2 + $0x264] ss:$16 sps:$4 sm:$0xff]   ;;  %v10795_v24 = vld [vmem:[#allocation2 + $0x248] ss:$16 sps:$4 sm:$0xff]   ;;  %v10800_v26 = vld [vmem:[#allocation2 + $0x26c] ss:$16 sps:$4 sm:$0xff]  }
  0x89   :  { %v121_v25 = vld [vmem:[%s13479_s0 + $0x18] sm:$0xf]  ;;  %v122_v27 = vld [vmem:[%s13479_s0 + $0x1c] sm:$0xf]  ;;  %v10776_v28 = vld [vmem:[#allocation2 + $0x260] ss:$16 sps:$4 sm:$0xff]  }
  0x8a   :  { %816 = vmatpush1.bf16.msra.mxu0 %v10709_v30  ;;  %1042 = vmatpush1.bf16.msra.mxu1 %v10710_v31  ;;  %v10783_v29 = vld [vmem:[#allocation2 + $0x284] ss:$16 sps:$4 sm:$0xff]   ;;  %v10798_v30 = vld [vmem:[#allocation2 + $0x268] ss:$16 sps:$4 sm:$0xff]   ;;  %v12604_v31 = vcombine.low %v118_v5, %v119_v14  ;;  %v10820_v46 = vld [vmem:[#allocation2 + $0x2cc] ss:$16 sps:$4 sm:$0xff]  }
  0x8b   :  { %817 = vmatprep.subr.bf16.mxu0 %v10711_v32  ;;  %1043 = vmatprep.subr.bf16.mxu1 %v10713_v33  ;;  %v9130_v32 = vcombine.low %v121_v25, %v122_v27  ;;  %v10781_v33 = vld [vmem:[#allocation2 + $0x280] ss:$16 sps:$4 sm:$0xff]   ;;  %v10818_v48 = vld [vmem:[#allocation2 + $0x2c8] ss:$16 sps:$4 sm:$0xff]   ;;  %v126_v51 = vld [vmem:[%s13479_s0 + $0x2c] sm:$0xf] }
  0x8c   :  { %v12414_v3 = vmov 0   ;;  %v10827_v5 = vld [vmem:[%s13484_s5 + $0x200] ss:$8 sps:$4 sm:$0xff]  }
  0x8d   :  { %v10839_v14 = vld [vmem:[%s13484_s5 + $0x220] ss:$8 sps:$4 sm:$0xff]  }
  0x8e   :  { %818 = vmatpush1.bf16.msra.mxu0 %v10715_v34  ;;  %1044 = vmatpush1.bf16.msra.mxu1 %v10716_v35  ;;  %v10808_v34 = vld [vmem:[#allocation2 + $0x28c] ss:$16 sps:$4 sm:$0xff]   ;;  %v10794_v35 = vld [vmem:[#allocation2 + $0x2a4] ss:$16 sps:$4 sm:$0xff]   ;;  %v12090_v8 = vld [vmem:[#allocation7 + $0x260] ss:$16 sps:$4 sm:$0xff]  }
  0x8f   :  { %819 = vmatprep.subr.bf16.mxu0 %v10717_v36  ;;  %1045 = vmatprep.subr.bf16.mxu1 %v10719_v37  ;;  %v10806_v36 = vld [vmem:[#allocation2 + $0x288] ss:$16 sps:$4 sm:$0xff]   ;;  %v123_v37 = vld [vmem:[%s13479_s0 + $0x20] sm:$0xf] }
  0x92   :  { %820 = vmatpush1.bf16.msra.mxu0 %v10721_v38  ;;  %1046 = vmatpush1.bf16.msra.mxu1 %v10722_v39  ;;  %v10811_v38 = vld [vmem:[#allocation2 + $0x2ac] ss:$16 sps:$4 sm:$0xff]   ;;  %v124_v39 = vld [vmem:[%s13479_s0 + $0x24] sm:$0xf] }
  0x93   :  { %821 = vmatprep.subr.bf16.mxu0 %v10723_v40  ;;  %1047 = vmatprep.subr.bf16.mxu1 %v10725_v41  ;;  %v10792_v40 = vld [vmem:[#allocation2 + $0x2a0] ss:$16 sps:$4 sm:$0xff]   ;;  %v10805_v41 = vld [vmem:[#allocation2 + $0x2c4] ss:$16 sps:$4 sm:$0xff]  }
  0x96   :  { %822 = vmatpush1.bf16.msra.mxu0 %v10727_v42  ;;  %1048 = vmatpush1.bf16.msra.mxu1 %v10728_v43  ;;  %v10809_v42 = vld [vmem:[#allocation2 + $0x2a8] ss:$16 sps:$4 sm:$0xff]   ;;  %v12614_v43 = vcombine.low %v120_v16, %v121_v25  ;;  %v10847_v16 = vld [vmem:[%s13484_s5 + $0x234] ss:$8 sps:$4 sm:$0xff]  }
  0x97   :  { %823 = vmatprep.subr.bf16.mxu0 %v10729_v44  ;;  %1049 = vmatprep.subr.bf16.mxu1 %v10731_v45  ;;  %v9131_v44 = vcombine.low %v123_v37, %v124_v39  ;;  %v10803_v45 = vld [vmem:[#allocation2 + $0x2c0] ss:$16 sps:$4 sm:$0xff]  }
  0x98   :  { %v10854_v25 = vld [vmem:[%s13484_s5 + $0x50] ss:$8 sps:$4 sm:$0xff]  }
  0x9a   :  { %824 = vmatpush1.bf16.msra.mxu0 %v10733_v47  ;;  %1050 = vmatpush1.bf16.msra.mxu1 %v10734_v49  ;;  %v10817_v47 = vld [vmem:[#allocation2 + $0x2e4] ss:$16 sps:$4 sm:$0xff]   ;;  %v125_v49 = vld [vmem:[%s13479_s0 + $0x28] sm:$0xf] }
  0x9b   :  { %825 = vmatprep.subr.bf16.mxu0 %v10735_v50  ;;  %1051 = vmatprep.subr.bf16.mxu1 %v10737_v52  ;;  %v10823_v50 = vld [vmem:[#allocation2 + $0x2ec] ss:$16 sps:$4 sm:$0xff]   ;;  %v10815_v52 = vld [vmem:[#allocation2 + $0x2e0] ss:$16 sps:$4 sm:$0xff]  }
  0x9e   :  { %826 = vmatpush1.bf16.msra.mxu0 %v10739_v53  ;;  %1052 = vmatpush1.bf16.msra.mxu1 %v10740_v54  ;;  %v10821_v53 = vld [vmem:[#allocation2 + $0x2e8] ss:$16 sps:$4 sm:$0xff]   ;;  %v10826_v54 = vld [vmem:[%s13484_s5 + $0x4] ss:$8 sps:$4 sm:$0xff]  }
  0x9f   :  { %827 = vmatprep.subr.bf16.mxu0 %v10741_v55  ;;  %1053 = vmatprep.subr.bf16.mxu1 %v10743_v56  ;;  %v12627_v55 = vcombine.low %v122_v27, %v123_v37  ;;  %v9132_v56 = vcombine.low %v125_v49, %v126_v51  ;;  %v10862_v27 = vld [vmem:[%s13484_s5 + $0x64] ss:$8 sps:$4 sm:$0xff]   ;;  %v10872_v37 = vld [vmem:[%s13484_s5 + $0x80] ss:$8 sps:$4 sm:$0xff]  }
  0xa2   :  { %828 = vmatpush1.bf16.msra.mxu0 %v10745_v57  ;;  %1054 = vmatpush1.bf16.msra.mxu1 %v10746_v58  ;;  %v10829_v57 = vld [vmem:[%s13484_s5 + $0x204] ss:$8 sps:$4 sm:$0xff]   ;;  %v127_v58 = vld [vmem:[%s13479_s0 + $0x30] sm:$0xf] }
  0xa3   :  { %829 = vmatprep.subr.bf16.mxu0 %v10747_v59  ;;  %1055 = vmatprep.subr.bf16.mxu1 %v10749_v60  ;;  %v128_v59 = vld [vmem:[%s13479_s0 + $0x34] sm:$0xf]  ;;  %v12640_v60 = vcombine.low %v124_v39, %v125_v49 }
  0xa4   :  { %v10880_v39 = vld [vmem:[%s13484_s5 + $0x94] ss:$8 sps:$4 sm:$0xff]  }
  0xa5   :  { %v10895_v49 = vld [vmem:[%s13484_s5 + $0x2b4] ss:$8 sps:$4 sm:$0xff]  }
  0xa6   :  { %830 = vmatpush1.bf16.msra.mxu0 %v10751_v61  ;;  %1056 = vmatpush1.bf16.msra.mxu1 %v10752_v62  ;;  %v9133_v61 = vcombine.low %v127_v58, %v128_v59  ;;  %v129_v62 = vld [vmem:[%s13479_s0 + $0x38] sm:$0xf] }
  0xa7   :  { %831 = vmatprep.subr.bf16.mxu0 %v10753_v63  ;;  %1057 = vmatprep.subr.bf16.mxu1 %v10755_v0  ;;  %v12650_v63 = vld [vmem:[%s13479_s0 + $0x3c] sm:$0xf]  ;;  %v12652_v0 = vcombine.low %v126_v51, %v127_v58  ;;  %v10893_v51 = vld [vmem:[%s13484_s5 + $0x2b0] ss:$8 sps:$4 sm:$0xff]  }
  0xa8   :  { %v10902_v58 = vld [vmem:[%s13484_s5 + $0xd0] ss:$8 sps:$4 sm:$0xff]  }
  0xaa   :  { %832 = vmatpush1.bf16.msra.mxu0 %v10757_v1  ;;  %1058 = vmatpush1.bf16.msra.mxu1 %v10758_v2  ;;  %v9134_v1 = vcombine.low %v129_v62, %v12650_v63  ;;  %v12657_v2 = vcombine.low %v128_v59, %v129_v62  ;;  %v10905_v59 = vld [vmem:[%s13484_s5 + $0x2d0] ss:$8 sps:$4 sm:$0xff]   ;;  %v10908_v62 = vld [vmem:[%s13484_s5 + $0xe0] ss:$8 sps:$4 sm:$0xff]  }
  0xab   :  { %914 = vmatprep.subr.bf16.mxu0 %v10764_v4  ;;  %1140 = vmatprep.subr.bf16.mxu1 %v10786_v6  ;;  %v10824_v4 = vld [vmem:[%s13484_s5] ss:$8 sps:$4 sm:$0xff]   ;;  %v10832_v6 = vld [vmem:[%s13484_s5 + $0x14] ss:$8 sps:$4 sm:$0xff]  }
  0xad   :  { %9232 = vmatmul.mubr.msk.bf16.vlgmr.msra.gmra.mrb[0].mxu0 %vm12579_vm1, %v9118_v7  ;;  %9235 = vmatmul.mubr.msk.bf16.vlgmr.msra.gmra.mrb[0].mxu1 %vm12579_vm1, %v9118_v7  ;;  %v10835_v7 = vld [vmem:[%s13484_s5 + $0x214] ss:$8 sps:$4 sm:$0xff]  }
  0xae   :  { %915 = vmatpush1.bf16.msra.mxu0 %v10762_v9  ;;  %843 = vmatprep.mubr.bf16.mxu0 %v9128_v10  ;;  %v10830_v9 = vld [vmem:[%s13484_s5 + $0x10] ss:$8 sps:$4 sm:$0xff]  }
  0xaf   :  { %1069 = vmatprep.mubr.bf16.mxu1 %v9128_v10  ;;  %916 = vmatprep.subr.bf16.mxu0 %v10768_v11  ;;  %v10833_v10 = vld [vmem:[%s13484_s5 + $0x210] ss:$8 sps:$4 sm:$0xff]   ;;  %v10838_v11 = vld [vmem:[%s13484_s5 + $0x24] ss:$8 sps:$4 sm:$0xff]  }
  0xb0   :  { %1141 = vmatpush1.bf16.msra.mxu1 %v10784_v13  ;;  %v10836_v13 = vld [vmem:[%s13484_s5 + $0x20] ss:$8 sps:$4 sm:$0xff]  }
  0xb1   :  { %1142 = vmatprep.subr.bf16.mxu1 %v10789_v15  ;;  %v10844_v15 = vld [vmem:[%s13484_s5 + $0x34] ss:$8 sps:$4 sm:$0xff]  }
  0xb2   :  { %917 = vmatpush1.bf16.msra.mxu0 %v10766_v12  ;;  %v10841_v12 = vld [vmem:[%s13484_s5 + $0x224] ss:$8 sps:$4 sm:$0xff]  }
  0xb3   :  { %918 = vmatprep.subr.bf16.mxu0 %v10773_v17  ;;  %v10842_v17 = vld [vmem:[%s13484_s5 + $0x30] ss:$8 sps:$4 sm:$0xff]  }
  0xb4   :  { %1143 = vmatpush1.bf16.msra.mxu1 %v10787_v18  ;;  %v10845_v18 = vld [vmem:[%s13484_s5 + $0x230] ss:$8 sps:$4 sm:$0xff]  }
  0xb5   :  { %844 = vmatmul.mubr.bf16.gmra.mrb[4].mxu0 %v12594_v19  ;;  %1070 = vmatmul.mubr.bf16.gmra.mrb[4].mxu1 %v12594_v19 }
  0xb6   :  { %853 = vmatprep.mubr.bf16.mxu0 %v9129_v20  ;;  %1079 = vmatprep.mubr.bf16.mxu1 %v9129_v20  ;;  %v10853_v20 = vld [vmem:[%s13484_s5 + $0x244] ss:$8 sps:$4 sm:$0xff]  }
  0xb7   :  { %919 = vmatpush1.bf16.msra.mxu0 %v10771_v21  ;;  %1144 = vmatprep.subr.bf16.mxu1 %v10797_v22  ;;  %v10848_v21 = vld [vmem:[%s13484_s5 + $0x40] ss:$8 sps:$4 sm:$0xff]  }
  0xb8   :  { %920 = vmatprep.subr.bf16.mxu0 %v10778_v23  ;;  %1145 = vmatpush1.bf16.msra.mxu1 %v10795_v24  ;;  %v10851_v22 = vld [vmem:[%s13484_s5 + $0x240] ss:$8 sps:$4 sm:$0xff]   ;;  %v10856_v23 = vld [vmem:[%s13484_s5 + $0x54] ss:$8 sps:$4 sm:$0xff]  }
  0xb9   :  { %1146 = vmatprep.subr.bf16.mxu1 %v10800_v26  ;;  %v10859_v24 = vld [vmem:[%s13484_s5 + $0x254] ss:$8 sps:$4 sm:$0xff]   ;;  %v10857_v26 = vld [vmem:[%s13484_s5 + $0x250] ss:$8 sps:$4 sm:$0xff]  }
  0xbb   :  { %921 = vmatpush1.bf16.msra.mxu0 %v10776_v28  ;;  %v10865_v28 = vld [vmem:[%s13484_s5 + $0x264] ss:$8 sps:$4 sm:$0xff]  }
  0xbc   :  { %922 = vmatprep.subr.bf16.mxu0 %v10783_v29  ;;  %1147 = vmatpush1.bf16.msra.mxu1 %v10798_v30  ;;  %v10860_v29 = vld [vmem:[%s13484_s5 + $0x60] ss:$8 sps:$4 sm:$0xff]  }
  0xbd   :  { %854 = vmatmul.mubr.bf16.gmra.mrb[8].mxu0 %v12604_v31  ;;  %1080 = vmatmul.mubr.bf16.gmra.mrb[8].mxu1 %v12604_v31  ;;  %v10863_v30 = vld [vmem:[%s13484_s5 + $0x260] ss:$8 sps:$4 sm:$0xff]  }
  0xbe   :  { %863 = vmatprep.mubr.bf16.mxu0 %v9130_v32  ;;  %1089 = vmatprep.mubr.bf16.mxu1 %v9130_v32  ;;  %v10871_v32 = vld [vmem:[%s13484_s5 + $0x274] ss:$8 sps:$4 sm:$0xff]  }
  0xbf   :  { %923 = vmatpush1.bf16.msra.mxu0 %v10781_v33  ;;  %1148 = vmatprep.subr.bf16.mxu1 %v10808_v34  ;;  %v10866_v33 = vld [vmem:[%s13484_s5 + $0x70] ss:$8 sps:$4 sm:$0xff]  }
  0xc0   :  { %924 = vmatprep.subr.bf16.mxu0 %v10794_v35  ;;  %1149 = vmatpush1.bf16.msra.mxu1 %v10806_v36  ;;  %v10869_v34 = vld [vmem:[%s13484_s5 + $0x270] ss:$8 sps:$4 sm:$0xff]   ;;  %v10874_v35 = vld [vmem:[%s13484_s5 + $0x84] ss:$8 sps:$4 sm:$0xff]  }
  0xc1   :  { %1150 = vmatprep.subr.bf16.mxu1 %v10811_v38  ;;  %v10877_v36 = vld [vmem:[%s13484_s5 + $0x284] ss:$8 sps:$4 sm:$0xff]   ;;  %v10875_v38 = vld [vmem:[%s13484_s5 + $0x280] ss:$8 sps:$4 sm:$0xff]  }
  0xc3   :  { %925 = vmatpush1.bf16.msra.mxu0 %v10792_v40  ;;  %v10883_v40 = vld [vmem:[%s13484_s5 + $0x294] ss:$8 sps:$4 sm:$0xff]  }
  0xc4   :  { %926 = vmatprep.subr.bf16.mxu0 %v10805_v41  ;;  %1151 = vmatpush1.bf16.msra.mxu1 %v10809_v42  ;;  %v10878_v41 = vld [vmem:[%s13484_s5 + $0x90] ss:$8 sps:$4 sm:$0xff]  }
  0xc5   :  { %864 = vmatmul.mubr.bf16.gmra.mrb[12].mxu0 %v12614_v43  ;;  %1090 = vmatmul.mubr.bf16.gmra.mrb[12].mxu1 %v12614_v43  ;;  %v10881_v42 = vld [vmem:[%s13484_s5 + $0x290] ss:$8 sps:$4 sm:$0xff]  }
  0xc6   :  { %873 = vmatprep.mubr.bf16.mxu0 %v9131_v44  ;;  %1099 = vmatprep.mubr.bf16.mxu1 %v9131_v44  ;;  %v10889_v44 = vld [vmem:[%s13484_s5 + $0x2a4] ss:$8 sps:$4 sm:$0xff]  }
  0xc7   :  { %927 = vmatpush1.bf16.msra.mxu0 %v10803_v45  ;;  %1152 = vmatprep.subr.bf16.mxu1 %v10820_v46  ;;  %v10884_v45 = vld [vmem:[%s13484_s5 + $0xa0] ss:$8 sps:$4 sm:$0xff]  }
  0xc8   :  { %928 = vmatprep.subr.bf16.mxu0 %v10817_v47  ;;  %1153 = vmatpush1.bf16.msra.mxu1 %v10818_v48  ;;  %v10887_v46 = vld [vmem:[%s13484_s5 + $0x2a0] ss:$8 sps:$4 sm:$0xff]   ;;  %v9126_v47 = vcombine.low %v12650_v63, %v12650_v63  ;;  %v10892_v48 = vld [vmem:[%s13484_s5 + $0xb4] ss:$8 sps:$4 sm:$0xff]  }
  0xc9   :  { %1154 = vmatprep.subr.bf16.mxu1 %v10823_v50  ;;  %v10890_v50 = vld [vmem:[%s13484_s5 + $0xb0] ss:$8 sps:$4 sm:$0xff]   ;;  %v10911_v63 = vld [vmem:[%s13484_s5 + $0x2e0] ss:$8 sps:$4 sm:$0xff]  }
  0xcb   :  { %929 = vmatpush1.bf16.msra.mxu0 %v10815_v52  ;;  %v10898_v52 = vld [vmem:[%s13484_s5 + $0xc4] ss:$8 sps:$4 sm:$0xff]  }
  0xcc   :  { %1155 = vmatpush1.bf16.msra.mxu1 %v10821_v53  ;;  %1749 = vmatprep.subr.bf16.mxu0 %v10826_v54  ;;  %v10901_v53 = vld [vmem:[%s13484_s5 + $0x2c4] ss:$8 sps:$4 sm:$0xff]   ;;  %v10896_v54 = vld [vmem:[%s13484_s5 + $0xc0] ss:$8 sps:$4 sm:$0xff]  }
  0xcd   :  { %874 = vmatmul.mubr.bf16.gmra.mrb[16].mxu0 %v12627_v55  ;;  %1100 = vmatmul.mubr.bf16.gmra.mrb[16].mxu1 %v12627_v55 }
  0xce   :  { %883 = vmatprep.mubr.bf16.mxu0 %v9132_v56  ;;  %1109 = vmatprep.mubr.bf16.mxu1 %v9132_v56  ;;  %v10904_v56 = vld [vmem:[%s13484_s5 + $0xd4] ss:$8 sps:$4 sm:$0xff]  }
  0xcf   :  { %2280 = vmatprep.subr.bf16.mxu1 %v10829_v57  ;;  %v10907_v57 = vld [vmem:[%s13484_s5 + $0x2d4] ss:$8 sps:$4 sm:$0xff]  }
  0xd5   :  { %884 = vmatmul.mubr.bf16.gmra.mrb[20].mxu0 %v12640_v60  ;;  %1110 = vmatmul.mubr.bf16.gmra.mrb[20].mxu1 %v12640_v60 }
  0xd6   :  { %893 = vmatprep.mubr.bf16.mxu0 %v9133_v61  ;;  %1119 = vmatprep.mubr.bf16.mxu1 %v9133_v61  ;;  %v10913_v61 = vld [vmem:[%s13484_s5 + $0x2e4] ss:$8 sps:$4 sm:$0xff]  }
  0xdd   :  { %894 = vmatmul.mubr.bf16.gmra.mrb[24].mxu0 %v12652_v0  ;;  %1120 = vmatmul.mubr.bf16.gmra.mrb[24].mxu1 %v12652_v0 }
  0xde   :  { %903 = vmatprep.mubr.bf16.mxu0 %v9134_v1  ;;  %1129 = vmatprep.mubr.bf16.mxu1 %v9134_v1  ;;  %v10919_v1 = vld [vmem:[%s13484_s5 + $0x2f4] ss:$8 sps:$4 sm:$0xff]  }
  0xe5   :  { %904 = vmatmul.mubr.bf16.gmra.mrb[28].mxu0 %v12657_v2  ;;  %1130 = vmatmul.mubr.bf16.gmra.mrb[28].mxu1 %v12657_v2 }
  0xe6   :  { %946 = vmatprep.mubr.bf16.mxu0 %v12414_v3  ;;  %1172 = vmatprep.mubr.bf16.mxu1 %v12414_v3 }
  0xed   :  { %947 = vmatmul.mubr.bf16.vlgmr.msra.gmra.mrb[0].mxu0 %v12594_v19  ;;  %1173 = vmatmul.mubr.bf16.vlgmr.msra.gmra.mrb[0].mxu1 %v12594_v19  ;;  %v10850_v19 = vld [vmem:[%s13484_s5 + $0x44] ss:$8 sps:$4 sm:$0xff]  }
  0xee   :  { %956 = vmatprep.mubr.bf16.mxu0 %v12414_v3  ;;  %1182 = vmatprep.mubr.bf16.mxu1 %v12414_v3 }
  0xef   :  { %1750 = vmatpush1.bf16.msra.mxu0 %v10824_v4  ;;  %2281 = vmatpush1.bf16.msra.mxu1 %v10827_v5  ;;  %v10922_v4 = vld [vmem:[%s13484_s5 + $0x104] ss:$8 sps:$4 sm:$0xff]  }
  0xf0   :  { %1751 = vmatprep.subr.bf16.mxu0 %v10832_v6  ;;  %2282 = vmatprep.subr.bf16.mxu1 %v10835_v7  ;;  %v10925_v5 = vld [vmem:[%s13484_s5 + $0x304] ss:$8 sps:$4 sm:$0xff]   ;;  %v301_v6 = vlaneseq }
  0xf2   :  { %v302_v7 = vshrl.u32 %v301_v6, 7 }
  0xf3   :  { %1752 = vmatpush1.bf16.msra.mxu0 %v10830_v9  ;;  %2283 = vmatpush1.bf16.msra.mxu1 %v10833_v10 }
  0xf4   :  { %1753 = vmatprep.subr.bf16.mxu0 %v10838_v11  ;;  %2284 = vmatprep.subr.bf16.mxu1 %v10841_v12  ;;  %v12887_v9 = vsub.s32 0, %v302_v7  ;;  %v12889_v10 = vsub.s32 2, %v302_v7  ;;  %v131_v11 = vld [vmem:[%s13487_s8] sm:$0xf]  ;;  %v12894_v12 = vsub.s32 1, %v302_v7 }
  0xf5   :  { %957 = vmatmul.mubr.bf16.gmra.mrb[4].mxu0 %v12604_v31  ;;  %1183 = vmatmul.mubr.bf16.gmra.mrb[4].mxu1 %v12604_v31  ;;  %v10868_v31 = vld [vmem:[%s13484_s5 + $0x74] ss:$8 sps:$4 sm:$0xff]  }
  0xf6   :  { %966 = vmatprep.mubr.bf16.mxu0 %v12414_v3  ;;  %1192 = vmatprep.mubr.bf16.mxu1 %v12414_v3 }
  0xf7   :  { %1754 = vmatpush1.bf16.msra.mxu0 %v10836_v13  ;;  %2285 = vmatpush1.bf16.msra.mxu1 %v10839_v14  ;;  %v12896_v13 = vsub.s32 3, %v302_v7  ;;  %v12899_v14 = vrot.slane %v131_v11, %v12887_v9 }
  0xf8   :  { %1755 = vmatprep.subr.bf16.mxu0 %v10844_v15  ;;  %2286 = vmatprep.subr.bf16.mxu1 %v10847_v16  ;;  %v12902_v15 = vrot.slane %v131_v11, %v12889_v10  ;;  %v12905_v16 = vrot.slane %v131_v11, %v12894_v12 }
  0xfb   :  { %1756 = vmatpush1.bf16.msra.mxu0 %v10842_v17  ;;  %2287 = vmatpush1.bf16.msra.mxu1 %v10845_v18  ;;  %v12908_v17 = vrot.slane %v131_v11, %v12896_v13 }
  0xfc   :  { %1757 = vmatprep.subr.bf16.mxu0 %v10850_v19  ;;  %2288 = vmatprep.subr.bf16.mxu1 %v10853_v20 }
  0xfd   :  { %967 = vmatmul.mubr.bf16.gmra.mrb[8].mxu0 %v12614_v43  ;;  %1193 = vmatmul.mubr.bf16.gmra.mrb[8].mxu1 %v12614_v43  ;;  %v10886_v43 = vld [vmem:[%s13484_s5 + $0xa4] ss:$8 sps:$4 sm:$0xff]  }
  0xfe   :  { %976 = vmatprep.mubr.bf16.mxu0 %v12414_v3  ;;  %1202 = vmatprep.mubr.bf16.mxu1 %v12414_v3 }
  0xff   :  { %1758 = vmatpush1.bf16.msra.mxu0 %v10848_v21  ;;  %2289 = vmatpush1.bf16.msra.mxu1 %v10851_v22 }
 0x100   :  { %1759 = vmatprep.subr.bf16.mxu0 %v10856_v23  ;;  %2290 = vmatprep.subr.bf16.mxu1 %v10859_v24 }
 0x103   :  { %1760 = vmatpush1.bf16.msra.mxu0 %v10854_v25  ;;  %2291 = vmatpush1.bf16.msra.mxu1 %v10857_v26 }
 0x104   :  { %1761 = vmatprep.subr.bf16.mxu0 %v10862_v27  ;;  %2292 = vmatprep.subr.bf16.mxu1 %v10865_v28 }
 0x105   :  { %977 = vmatmul.mubr.bf16.gmra.mrb[12].mxu0 %v12627_v55  ;;  %1203 = vmatmul.mubr.bf16.gmra.mrb[12].mxu1 %v12627_v55  ;;  %v10899_v55 = vld [vmem:[%s13484_s5 + $0x2c0] ss:$8 sps:$4 sm:$0xff]  }
 0x106   :  { %986 = vmatprep.mubr.bf16.mxu0 %v12414_v3  ;;  %1212 = vmatprep.mubr.bf16.mxu1 %v12414_v3 }
 0x107   :  { %1762 = vmatpush1.bf16.msra.mxu0 %v10860_v29  ;;  %2293 = vmatpush1.bf16.msra.mxu1 %v10863_v30 }
 0x108   :  { %1763 = vmatprep.subr.bf16.mxu0 %v10868_v31  ;;  %2294 = vmatprep.subr.bf16.mxu1 %v10871_v32 }
 0x10b   :  { %1764 = vmatpush1.bf16.msra.mxu0 %v10866_v33  ;;  %2295 = vmatpush1.bf16.msra.mxu1 %v10869_v34 }
 0x10c   :  { %1765 = vmatprep.subr.bf16.mxu0 %v10874_v35  ;;  %2296 = vmatprep.subr.bf16.mxu1 %v10877_v36 }
 0x10d   :  { %987 = vmatmul.mubr.bf16.gmra.mrb[16].mxu0 %v12640_v60  ;;  %1213 = vmatmul.mubr.bf16.gmra.mrb[16].mxu1 %v12640_v60  ;;  %v10910_v60 = vld [vmem:[%s13484_s5 + $0xe4] ss:$8 sps:$4 sm:$0xff]  }
 0x10e   :  { %996 = vmatprep.mubr.bf16.mxu0 %v12414_v3  ;;  %1222 = vmatprep.mubr.bf16.mxu1 %v12414_v3 }
 0x10f   :  { %1766 = vmatpush1.bf16.msra.mxu0 %v10872_v37  ;;  %2297 = vmatpush1.bf16.msra.mxu1 %v10875_v38 }
 0x110   :  { %1767 = vmatprep.subr.bf16.mxu0 %v10880_v39  ;;  %2298 = vmatprep.subr.bf16.mxu1 %v10883_v40 }
 0x113   :  { %1768 = vmatpush1.bf16.msra.mxu0 %v10878_v41  ;;  %2299 = vmatpush1.bf16.msra.mxu1 %v10881_v42 }
 0x114   :  { %1769 = vmatprep.subr.bf16.mxu0 %v10886_v43  ;;  %2300 = vmatprep.subr.bf16.mxu1 %v10889_v44 }
 0x115   :  { %997 = vmatmul.mubr.bf16.gmra.mrb[20].mxu0 %v12652_v0  ;;  %1223 = vmatmul.mubr.bf16.gmra.mrb[20].mxu1 %v12652_v0  ;;  %v10916_v0 = vld [vmem:[%s13484_s5 + $0xf4] ss:$8 sps:$4 sm:$0xff]  }
 0x116   :  { %1006 = vmatprep.mubr.bf16.mxu0 %v12414_v3  ;;  %1232 = vmatprep.mubr.bf16.mxu1 %v12414_v3 }
 0x117   :  { %1770 = vmatpush1.bf16.msra.mxu0 %v10884_v45  ;;  %2301 = vmatpush1.bf16.msra.mxu1 %v10887_v46 }
 0x118   :  { %1771 = vmatprep.subr.bf16.mxu0 %v10892_v48  ;;  %2302 = vmatprep.subr.bf16.mxu1 %v10895_v49 }
 0x11b   :  { %1772 = vmatpush1.bf16.msra.mxu0 %v10890_v50  ;;  %2303 = vmatpush1.bf16.msra.mxu1 %v10893_v51 }
 0x11c   :  { %1773 = vmatprep.subr.bf16.mxu0 %v10898_v52  ;;  %2304 = vmatprep.subr.bf16.mxu1 %v10901_v53 }
 0x11d   :  { %1007 = vmatmul.mubr.bf16.gmra.mrb[24].mxu0 %v12657_v2  ;;  %1233 = vmatmul.mubr.bf16.gmra.mrb[24].mxu1 %v12657_v2  ;;  %v10914_v2 = vld [vmem:[%s13484_s5 + $0xf0] ss:$8 sps:$4 sm:$0xff]  }
 0x11e   :  { %1016 = vmatprep.mubr.bf16.mxu0 %v12414_v3  ;;  %1242 = vmatprep.mubr.bf16.mxu1 %v12414_v3  ;;  %v10917_v3 = vld [vmem:[%s13484_s5 + $0x2f0] ss:$8 sps:$4 sm:$0xff]  }
 0x11f   :  { %1774 = vmatpush1.bf16.msra.mxu0 %v10896_v54  ;;  %2305 = vmatpush1.bf16.msra.mxu1 %v10899_v55 }
 0x120   :  { %1775 = vmatprep.subr.bf16.mxu0 %v10904_v56  ;;  %2306 = vmatprep.subr.bf16.mxu1 %v10907_v57 }
 0x123   :  { %1776 = vmatpush1.bf16.msra.mxu0 %v10902_v58  ;;  %2307 = vmatpush1.bf16.msra.mxu1 %v10905_v59 }
 0x124   :  { %1777 = vmatprep.subr.bf16.mxu0 %v10910_v60  ;;  %2308 = vmatprep.subr.bf16.mxu1 %v10913_v61 }
 0x125   :  { %9233 = vmatmul.mubr.msk.bf16.gmra.mrb[28].mxu0 %vm177_vm0, %v9126_v47  ;;  %9236 = vmatmul.mubr.msk.bf16.gmra.mrb[28].mxu1 %vm177_vm0, %v9126_v47 }
 0x127   :  { %1778 = vmatpush1.bf16.msra.mxu0 %v10908_v62  ;;  %2309 = vmatpush1.bf16.msra.mxu1 %v10911_v63 }
 0x128   :  { %1779 = vmatprep.subr.bf16.mxu0 %v10916_v0  ;;  %2310 = vmatprep.subr.bf16.mxu1 %v10919_v1 }
 0x12b   :  { %1780 = vmatpush1.bf16.msra.mxu0 %v10914_v2  ;;  %2311 = vmatpush1.bf16.msra.mxu1 %v10917_v3 }
 0x12c   :  { %1822 = vmatprep.subr.bf16.mxu0 %v10922_v4  ;;  %2353 = vmatprep.subr.bf16.mxu1 %v10925_v5 }
 0x1c0   :  { %v948_v18 = vpop.f32.mrb[0].mxu0  ;;  %v1174_v19 = vpop.f32.mrb[0].mxu1 }
 0x1c1   :  { %v10300_v20 = vadd.f32 %v948_v18, %v12899_v14  ;;  %v10332_v21 = vadd.f32 %v1174_v19, %v12902_v15  ;;  %v950_v22 = vpop.f32.mrb[1].mxu0  ;;  %v1176_v23 = vpop.f32.mrb[1].mxu1 }
 0x1c2   :  { %v10301_v24 = vadd.f32 %v950_v22, %v12905_v16  ;;  %v10333_v25 = vadd.f32 %v1176_v23, %v12908_v17  ;;  %v952_v26 = vpop.f32.mrb[2].mxu0  ;;  %v1178_v27 = vpop.f32.mrb[2].mxu1  ;;  %v10923_v22 = vld [vmem:[%s13484_s5 + $0x300] ss:$8 sps:$4 sm:$0xff]  }
 0x1c3   :  { %v10302_v28 = vadd.f32 %v952_v26, %v12899_v14  ;;  %v10334_v29 = vadd.f32 %v1178_v27, %v12902_v15  ;;  %v954_v30 = vpop.f32.mrb[3].mxu0  ;;  %v1180_v31 = vpop.f32.mrb[3].mxu1  ;;  %v1253_v32 = vmax.f32 %v10300_v20, 0.0  ;;  %v1255_v35 = vmax.f32 %v10332_v21, 0.0  ;;  %v10920_v21 = vld [vmem:[%s13484_s5 + $0x100] ss:$8 sps:$4 sm:$0xff]  }
 0x1c4   :  { %v10303_v33 = vadd.f32 %v954_v30, %v12905_v16  ;;  %v10335_v34 = vadd.f32 %v1180_v31, %v12908_v17  ;;  %v1254_v36 = vmax.f32 %v10301_v24, 0.0  ;;  %v1256_v39 = vmax.f32 %v10333_v25, 0.0 }
 0x1c5   :  { %v1257_v37 = vmax.f32 %v10302_v28, 0.0  ;;  %v1259_v38 = vmax.f32 %v10334_v29, 0.0  ;;  %v10928_v29 = vld [vmem:[%s13484_s5 + $0x114] ss:$8 sps:$4 sm:$0xff]  }
 0x1c6   :  { %v1258_v40 = vmax.f32 %v10303_v33, 0.0  ;;  %v1260_v41 = vmax.f32 %v10335_v34, 0.0 }
 0x1c7   :  { %v1317_v42 = vmax.f32 %v1253_v32, %v1257_v37  ;;  %v1319_v43 = vmax.f32 %v1255_v35, %v1259_v38 }
 0x1c8   :  { %v1318_v44 = vmax.f32 %v1254_v36, %v1258_v40  ;;  %v1320_v45 = vmax.f32 %v1256_v39, %v1260_v41  ;;  %v958_v46 = vpop.f32.mrb[4].mxu0  ;;  %v1184_v47 = vpop.f32.mrb[4].mxu1  ;;  %v10931_v40 = vld [vmem:[%s13484_s5 + $0x314] ss:$8 sps:$4 sm:$0xff]  }
 0x1c9   :  { %v10304_v48 = vadd.f32 %v958_v46, %v12899_v14  ;;  %v10336_v49 = vadd.f32 %v1184_v47, %v12902_v15  ;;  %v960_v50 = vpop.f32.mrb[5].mxu0  ;;  %v1186_v51 = vpop.f32.mrb[5].mxu1 }
 0x1ca   :  { %v10305_v52 = vadd.f32 %v960_v50, %v12905_v16  ;;  %v10337_v53 = vadd.f32 %v1186_v51, %v12908_v17  ;;  %v962_v54 = vpop.f32.mrb[6].mxu0  ;;  %v1188_v55 = vpop.f32.mrb[6].mxu1  ;;  %v10934_v50 = vld [vmem:[%s13484_s5 + $0x124] ss:$8 sps:$4 sm:$0xff]  }
 0x1cb   :  { %v10306_v56 = vadd.f32 %v962_v54, %v12899_v14  ;;  %v10338_v57 = vadd.f32 %v1188_v55, %v12902_v15  ;;  %v964_v58 = vpop.f32.mrb[7].mxu0  ;;  %v1190_v59 = vpop.f32.mrb[7].mxu1  ;;  %v1261_v60 = vmax.f32 %v10304_v48, 0.0  ;;  %v1263_v61 = vmax.f32 %v10336_v49, 0.0  ;;  %v10937_v51 = vld [vmem:[%s13484_s5 + $0x324] ss:$8 sps:$4 sm:$0xff]  }
 0x1cc   :  { %v10307_v62 = vadd.f32 %v964_v58, %v12905_v16  ;;  %v10339_v63 = vadd.f32 %v1190_v59, %v12908_v17  ;;  %v1262_v0 = vmax.f32 %v10305_v52, 0.0  ;;  %v1264_v3 = vmax.f32 %v10337_v53, 0.0 }
 0x1cd   :  { %v1265_v1 = vmax.f32 %v10306_v56, 0.0  ;;  %v1267_v2 = vmax.f32 %v10338_v57, 0.0 }
 0x1ce   :  { %v1266_v4 = vmax.f32 %v10307_v62, 0.0  ;;  %v1268_v5 = vmax.f32 %v10339_v63, 0.0  ;;  %v10935_v62 = vld [vmem:[%s13484_s5 + $0x320] ss:$8 sps:$4 sm:$0xff]  }
 0x1cf   :  { %v1321_v6 = vmax.f32 %v1261_v60, %v1265_v1  ;;  %v1323_v7 = vmax.f32 %v1263_v61, %v1267_v2  ;;  %v10932_v61 = vld [vmem:[%s13484_s5 + $0x120] ss:$8 sps:$4 sm:$0xff]  }
 0x1d0   :  { %v1322_v11 = vmax.f32 %v1262_v0, %v1266_v4  ;;  %v1324_v18 = vmax.f32 %v1264_v3, %v1268_v5  ;;  %v968_v19 = vpop.f32.mrb[8].mxu0  ;;  %v1194_v20 = vpop.f32.mrb[8].mxu1  ;;  %v10940_v3 = vld [vmem:[%s13484_s5 + $0x134] ss:$8 sps:$4 sm:$0xff]  }
 0x1d1   :  { %v1349_v23 = vpack.c.bf16 %v1321_v6, %v1317_v42  ;;  %v12932_v24 = vpack.c.bf16 %v1323_v7, %v1319_v43  ;;  %v10308_v25 = vadd.f32 %v968_v19, %v12899_v14  ;;  %v10340_v26 = vadd.f32 %v1194_v20, %v12902_v15  ;;  %v970_v27 = vpop.f32.mrb[9].mxu0  ;;  %v1196_v28 = vpop.f32.mrb[9].mxu1 }
 0x1d2   :  { %v10309_v30 = vadd.f32 %v970_v27, %v12905_v16  ;;  %v10341_v31 = vadd.f32 %v1196_v28, %v12908_v17  ;;  %v972_v32 = vpop.f32.mrb[10].mxu0  ;;  %v1198_v33 = vpop.f32.mrb[10].mxu1  ;;  %v1350_v34 = vpack.c.bf16 %v1322_v11, %v1318_v44  ;;  %v12941_v35 = vpack.c.bf16 %v1324_v18, %v1320_v45  ;;  %v10926_v44 = vld [vmem:[%s13484_s5 + $0x110] ss:$8 sps:$4 sm:$0xff]  }
 0x1d3   :  { %v10310_v36 = vadd.f32 %v972_v32, %v12899_v14  ;;  %v10342_v37 = vadd.f32 %v1198_v33, %v12902_v15  ;;  %v974_v38 = vpop.f32.mrb[11].mxu0  ;;  %v1200_v39 = vpop.f32.mrb[11].mxu1  ;;  %v1269_v41 = vmax.f32 %v10308_v25, 0.0  ;;  %v1271_v42 = vmax.f32 %v10340_v26, 0.0  ;;  %v10929_v45 = vld [vmem:[%s13484_s5 + $0x310] ss:$8 sps:$4 sm:$0xff]  }
 0x1d4   :  { %v10311_v43 = vadd.f32 %v974_v38, %v12905_v16  ;;  %v10343_v46 = vadd.f32 %v1200_v39, %v12908_v17  ;;  %1781 = vmatprep.mubr.bf16.mxu0 %v1350_v34  ;;  %2312 = vmatprep.mubr.bf16.mxu1 %v1350_v34  ;;  %v1270_v47 = vmax.f32 %v10309_v30, 0.0  ;;  %v1272_v52 = vmax.f32 %v10341_v31, 0.0  ;;  %v10938_v27 = vld [vmem:[%s13484_s5 + $0x130] ss:$8 sps:$4 sm:$0xff]   ;;  %v10946_v32 = vld [vmem:[%s13484_s5 + $0x144] ss:$8 sps:$4 sm:$0xff]  }
 0x1d5   :  { %v1273_v48 = vmax.f32 %v10310_v36, 0.0  ;;  %v1275_v49 = vmax.f32 %v10342_v37, 0.0  ;;  %1782 = vmatmul.mubr.bf16.vlgmr.msra.gmra.mrb[32].mxu0 %v1349_v23  ;;  %2313 = vmatmul.mubr.bf16.vlgmr.msra.gmra.mrb[32].mxu1 %v1349_v23  ;;  %v10941_v28 = vld [vmem:[%s13484_s5 + $0x330] ss:$8 sps:$4 sm:$0xff]   ;;  %v10949_v33 = vld [vmem:[%s13484_s5 + $0x344] ss:$8 sps:$4 sm:$0xff]  }
 0x1d6   :  { %v1274_v53 = vmax.f32 %v10311_v43, 0.0  ;;  %v1276_v54 = vmax.f32 %v10343_v46, 0.0  ;;  %1823 = vmatpush1.bf16.msra.mxu0 %v10920_v21  ;;  %2354 = vmatpush1.bf16.msra.mxu1 %v10923_v22  ;;  %v10943_v21 = vld [vmem:[%s13484_s5 + $0x334] ss:$8 sps:$4 sm:$0xff]   ;;  %v10944_v46 = vld [vmem:[%s13484_s5 + $0x140] ss:$8 sps:$4 sm:$0xff]  }
 0x1d7   :  { %v1325_v55 = vmax.f32 %v1269_v41, %v1273_v48  ;;  %v1327_v56 = vmax.f32 %v1271_v42, %v1275_v49  ;;  %1824 = vmatprep.subr.bf16.mxu0 %v10928_v29  ;;  %2355 = vmatprep.subr.bf16.mxu1 %v10931_v40 }
 0x1d8   :  { %v12962_v57 = vmax.f32 %v1270_v47, %v1274_v53  ;;  %v12964_v58 = vmax.f32 %v1272_v52, %v1276_v54  ;;  %v978_v59 = vpop.f32.mrb[12].mxu0  ;;  %v1204_v60 = vpop.f32.mrb[12].mxu1 }
 0x1d9   :  { %v10312_v63 = vadd.f32 %v978_v59, %v12899_v14  ;;  %v10344_v0 = vadd.f32 %v1204_v60, %v12902_v15  ;;  %v980_v1 = vpop.f32.mrb[13].mxu0  ;;  %v1206_v2 = vpop.f32.mrb[13].mxu1 }
 0x1da   :  { %v10313_v4 = vadd.f32 %v980_v1, %v12905_v16  ;;  %v10345_v5 = vadd.f32 %v1206_v2, %v12908_v17  ;;  %1825 = vmatpush1.bf16.msra.mxu0 %v10926_v44  ;;  %2356 = vmatpush1.bf16.msra.mxu1 %v10929_v45  ;;  %v982_v6 = vpop.f32.mrb[14].mxu0  ;;  %v1208_v7 = vpop.f32.mrb[14].mxu1  ;;  %v10947_v44 = vld [vmem:[%s13484_s5 + $0x340] ss:$8 sps:$4 sm:$0xff]  }
 0x1db   :  { %v10314_v11 = vadd.f32 %v982_v6, %v12899_v14  ;;  %v10346_v18 = vadd.f32 %v1208_v7, %v12902_v15  ;;  %v984_v19 = vpop.f32.mrb[15].mxu0  ;;  %v1210_v20 = vpop.f32.mrb[15].mxu1  ;;  %1826 = vmatprep.subr.bf16.mxu0 %v10934_v50  ;;  %2357 = vmatprep.subr.bf16.mxu1 %v10937_v51  ;;  %v1277_v22 = vmax.f32 %v10312_v63, 0.0  ;;  %v1279_v23 = vmax.f32 %v10344_v0, 0.0  ;;  %v10952_v51 = vld [vmem:[%s13484_s5 + $0x154] ss:$8 sps:$4 sm:$0xff]  }
 0x1dc   :  { %v10315_v25 = vadd.f32 %v984_v19, %v12905_v16  ;;  %v10347_v26 = vadd.f32 %v1210_v20, %v12908_v17  ;;  %v1278_v29 = vmax.f32 %v10313_v4, 0.0  ;;  %v1280_v34 = vmax.f32 %v10345_v5, 0.0  ;;  %v10953_v5 = vld [vmem:[%s13484_s5 + $0x350] ss:$8 sps:$4 sm:$0xff]   ;;  %v10961_v19 = vld [vmem:[%s13484_s5 + $0x364] ss:$8 sps:$4 sm:$0xff]  }
 0x1dd   :  { %v1281_v30 = vmax.f32 %v10314_v11, 0.0  ;;  %v1283_v31 = vmax.f32 %v10346_v18, 0.0  ;;  %v10958_v18 = vld [vmem:[%s13484_s5 + $0x164] ss:$8 sps:$4 sm:$0xff]  }
 0x1de   :  { %v1282_v36 = vmax.f32 %v10315_v25, 0.0  ;;  %v1284_v37 = vmax.f32 %v10347_v26, 0.0  ;;  %1827 = vmatpush1.bf16.msra.mxu0 %v10932_v61  ;;  %2358 = vmatpush1.bf16.msra.mxu1 %v10935_v62 }
 0x1df   :  { %v1329_v38 = vmax.f32 %v1277_v22, %v1281_v30  ;;  %v1331_v39 = vmax.f32 %v1279_v23, %v1283_v31  ;;  %1828 = vmatprep.subr.bf16.mxu0 %v10940_v3  ;;  %2359 = vmatprep.subr.bf16.mxu1 %v10943_v21  ;;  %v10959_v31 = vld [vmem:[%s13484_s5 + $0x360] ss:$8 sps:$4 sm:$0xff]  }
 0x1e0   :  { %v1330_v40 = vmax.f32 %v1278_v29, %v1282_v36  ;;  %v1332_v41 = vmax.f32 %v1280_v34, %v1284_v37  ;;  %v988_v42 = vpop.f32.mrb[16].mxu0  ;;  %v1214_v43 = vpop.f32.mrb[16].mxu1  ;;  %v10964_v37 = vld [vmem:[%s13484_s5 + $0x174] ss:$8 sps:$4 sm:$0xff]  }
 0x1e1   :  { %v10316_v45 = vadd.f32 %v988_v42, %v12899_v14  ;;  %v10348_v47 = vadd.f32 %v1214_v43, %v12902_v15  ;;  %v990_v48 = vpop.f32.mrb[17].mxu0  ;;  %v1216_v49 = vpop.f32.mrb[17].mxu1  ;;  %v1353_v50 = vpack.c.bf16 %v1329_v38, %v1325_v55  ;;  %v13009_v52 = vpack.c.bf16 %v1331_v39, %v1327_v56  ;;  %v10955_v56 = vld [vmem:[%s13484_s5 + $0x354] ss:$8 sps:$4 sm:$0xff]  }
 0x1e2   :  { %v10317_v53 = vadd.f32 %v990_v48, %v12905_v16  ;;  %v10349_v54 = vadd.f32 %v1216_v49, %v12908_v17  ;;  %1829 = vmatpush1.bf16.msra.mxu0 %v10938_v27  ;;  %2360 = vmatpush1.bf16.msra.mxu1 %v10941_v28  ;;  %v992_v59 = vpop.f32.mrb[18].mxu0  ;;  %v1218_v60 = vpop.f32.mrb[18].mxu1  ;;  %v1354_v61 = vpack.c.bf16 %v1330_v40, %v12962_v57  ;;  %v10950_v57 = vld [vmem:[%s13484_s5 + $0x150] ss:$8 sps:$4 sm:$0xff]  }
 0x1e3   :  { %v10318_v62 = vadd.f32 %v992_v59, %v12899_v14  ;;  %v10350_v55 = vadd.f32 %v1218_v60, %v12902_v15  ;;  %v994_v63 = vpop.f32.mrb[19].mxu0  ;;  %v1220_v0 = vpop.f32.mrb[19].mxu1  ;;  %1830 = vmatprep.subr.bf16.mxu0 %v10946_v32  ;;  %2361 = vmatprep.subr.bf16.mxu1 %v10949_v33  ;;  %v1285_v1 = vmax.f32 %v10316_v45, 0.0  ;;  %v1287_v2 = vmax.f32 %v10348_v47, 0.0  ;;  %v10967_v45 = vld [vmem:[%s13484_s5 + $0x374] ss:$8 sps:$4 sm:$0xff]  }
 0x1e4   :  { %v10319_v3 = vadd.f32 %v994_v63, %v12905_v16  ;;  %v10351_v4 = vadd.f32 %v1220_v0, %v12908_v17  ;;  %1791 = vmatprep.mubr.bf16.mxu0 %v1354_v61  ;;  %2322 = vmatprep.mubr.bf16.mxu1 %v1354_v61  ;;  %v1286_v6 = vmax.f32 %v10317_v53, 0.0  ;;  %v13034_v20 = vpack.c.bf16 %v1332_v41, %v12964_v58  ;;  %v10956_v58 = vld [vmem:[%s13484_s5 + $0x160] ss:$8 sps:$4 sm:$0xff]   ;;  %v10965_v53 = vld [vmem:[%s13484_s5 + $0x370] ss:$8 sps:$4 sm:$0xff]  }
 0x1e5   :  { %v1289_v7 = vmax.f32 %v10318_v62, 0.0  ;;  %v1291_v11 = vmax.f32 %v10350_v55, 0.0  ;;  %1792 = vmatmul.mubr.bf16.gmra.mrb[36].mxu0 %v1353_v50  ;;  %2323 = vmatmul.mubr.bf16.gmra.mrb[36].mxu1 %v1353_v50  ;;  %v1288_v21 = vmax.f32 %v10349_v54, 0.0  ;;  %v10970_v61 = vld [vmem:[%s13484_s5 + $0x184] ss:$8 sps:$4 sm:$0xff]  }
 0x1e6   :  { %v1290_v22 = vmax.f32 %v10319_v3, 0.0  ;;  %v1292_v23 = vmax.f32 %v10351_v4, 0.0  ;;  %1831 = vmatpush1.bf16.msra.mxu0 %v10944_v46  ;;  %2362 = vmatpush1.bf16.msra.mxu1 %v10947_v44  ;;  %v10973_v62 = vld [vmem:[%s13484_s5 + $0x384] ss:$8 sps:$4 sm:$0xff]  }
 0x1e7   :  { %v1333_v25 = vmax.f32 %v1285_v1, %v1289_v7  ;;  %v1335_v26 = vmax.f32 %v1287_v2, %v1291_v11  ;;  %1832 = vmatprep.subr.bf16.mxu0 %v10952_v51  ;;  %2363 = vmatprep.subr.bf16.mxu1 %v10955_v56  ;;  %v10962_v51 = vld [vmem:[%s13484_s5 + $0x170] ss:$8 sps:$4 sm:$0xff]  }
 0x1e8   :  { %v13036_v27 = vmax.f32 %v1286_v6, %v1290_v22  ;;  %v13038_v28 = vmax.f32 %v1288_v21, %v1292_v23  ;;  %v998_v29 = vpop.f32.mrb[20].mxu0  ;;  %v1224_v30 = vpop.f32.mrb[20].mxu1  ;;  %v10971_v6 = vld [vmem:[%s13484_s5 + $0x380] ss:$8 sps:$4 sm:$0xff]   ;;  %v10976_v22 = vld [vmem:[%s13484_s5 + $0x194] ss:$8 sps:$4 sm:$0xff]  }
 0x1e9   :  { %v10320_v32 = vadd.f32 %v998_v29, %v12899_v14  ;;  %v10352_v33 = vadd.f32 %v1224_v30, %v12902_v15  ;;  %v1000_v34 = vpop.f32.mrb[21].mxu0  ;;  %v1226_v36 = vpop.f32.mrb[21].mxu1 }
 0x1ea   :  { %v10321_v38 = vadd.f32 %v1000_v34, %v12905_v16  ;;  %v10353_v39 = vadd.f32 %v1226_v36, %v12908_v17  ;;  %1833 = vmatpush1.bf16.msra.mxu0 %v10950_v57  ;;  %2364 = vmatpush1.bf16.msra.mxu1 %v10953_v5  ;;  %v1002_v40 = vpop.f32.mrb[22].mxu0  ;;  %v1228_v41 = vpop.f32.mrb[22].mxu1  ;;  %v10968_v5 = vld [vmem:[%s13484_s5 + $0x180] ss:$8 sps:$4 sm:$0xff]  }
 0x1eb   :  { %v10322_v42 = vadd.f32 %v1002_v40, %v12899_v14  ;;  %v10354_v43 = vadd.f32 %v1228_v41, %v12902_v15  ;;  %v1004_v46 = vpop.f32.mrb[23].mxu0  ;;  %v1230_v44 = vpop.f32.mrb[23].mxu1  ;;  %1834 = vmatprep.subr.bf16.mxu0 %v10958_v18  ;;  %2365 = vmatprep.subr.bf16.mxu1 %v10961_v19  ;;  %v1293_v47 = vmax.f32 %v10320_v32, 0.0  ;;  %v1295_v48 = vmax.f32 %v10352_v33, 0.0  ;;  %v10977_v41 = vld [vmem:[%s13484_s5 + $0x390] ss:$8 sps:$4 sm:$0xff]  }
 0x1ec   :  { %v10323_v49 = vadd.f32 %v1004_v46, %v12905_v16  ;;  %v10355_v50 = vadd.f32 %v1230_v44, %v12908_v17  ;;  %v1294_v54 = vmax.f32 %v10321_v38, 0.0  ;;  %v1296_v55 = vmax.f32 %v10353_v39, 0.0  ;;  %v10982_v44 = vld [vmem:[%s13484_s5 + $0x1a4] ss:$8 sps:$4 sm:$0xff]  }
 0x1ed   :  { %v1297_v59 = vmax.f32 %v10322_v42, 0.0  ;;  %v1299_v60 = vmax.f32 %v10354_v43, 0.0 }
 0x1ee   :  { %v1298_v63 = vmax.f32 %v10323_v49, 0.0  ;;  %v1300_v0 = vmax.f32 %v10355_v50, 0.0  ;;  %1835 = vmatpush1.bf16.msra.mxu0 %v10956_v58  ;;  %2366 = vmatpush1.bf16.msra.mxu1 %v10959_v31 }
 0x1ef   :  { %v1337_v56 = vmax.f32 %v1293_v47, %v1297_v59  ;;  %v1339_v1 = vmax.f32 %v1295_v48, %v1299_v60  ;;  %1836 = vmatprep.subr.bf16.mxu0 %v10964_v37  ;;  %2367 = vmatprep.subr.bf16.mxu1 %v10967_v45  ;;  %v10985_v45 = vld [vmem:[%s13484_s5 + $0x3a4] ss:$8 sps:$4 sm:$0xff]  }
 0x1f0   :  { %v1338_v2 = vmax.f32 %v1294_v54, %v1298_v63  ;;  %v1340_v3 = vmax.f32 %v1296_v55, %v1300_v0  ;;  %v1008_v4 = vpop.f32.mrb[24].mxu0  ;;  %v1234_v57 = vpop.f32.mrb[24].mxu1 }
 0x1f1   :  { %v10324_v7 = vadd.f32 %v1008_v4, %v12899_v14  ;;  %v10356_v11 = vadd.f32 %v1234_v57, %v12902_v15  ;;  %v1010_v18 = vpop.f32.mrb[25].mxu0  ;;  %v1236_v19 = vpop.f32.mrb[25].mxu1  ;;  %v1357_v21 = vpack.c.bf16 %v1337_v56, %v1333_v25  ;;  %v13083_v23 = vpack.c.bf16 %v1339_v1, %v1335_v26  ;;  %v10979_v26 = vld [vmem:[%s13484_s5 + $0x394] ss:$8 sps:$4 sm:$0xff]  }
 0x1f2   :  { %v10325_v29 = vadd.f32 %v1010_v18, %v12905_v16  ;;  %v10357_v30 = vadd.f32 %v1236_v19, %v12908_v17  ;;  %1837 = vmatpush1.bf16.msra.mxu0 %v10962_v51  ;;  %2368 = vmatpush1.bf16.msra.mxu1 %v10965_v53  ;;  %v1012_v58 = vpop.f32.mrb[26].mxu0  ;;  %v1238_v31 = vpop.f32.mrb[26].mxu1  ;;  %v1358_v32 = vpack.c.bf16 %v1338_v2, %v13036_v27  ;;  %v10974_v27 = vld [vmem:[%s13484_s5 + $0x190] ss:$8 sps:$4 sm:$0xff]   ;;  %v10988_v1 = vld [vmem:[%s13484_s5 + $0x1b4] ss:$8 sps:$4 sm:$0xff]  }
 0x1f3   :  { %v10326_v33 = vadd.f32 %v1012_v58, %v12899_v14  ;;  %v10358_v25 = vadd.f32 %v1238_v31, %v12902_v15  ;;  %v1014_v34 = vpop.f32.mrb[27].mxu0  ;;  %v1240_v36 = vpop.f32.mrb[27].mxu1  ;;  %1838 = vmatprep.subr.bf16.mxu0 %v10970_v61  ;;  %2369 = vmatprep.subr.bf16.mxu1 %v10973_v62  ;;  %v1301_v37 = vmax.f32 %v10324_v7, 0.0  ;;  %v1303_v38 = vmax.f32 %v10356_v11, 0.0  ;;  %v10980_v62 = vld [vmem:[%s13484_s5 + $0x1a0] ss:$8 sps:$4 sm:$0xff]  }
 0x1f4   :  { %v10327_v39 = vadd.f32 %v1014_v34, %v12905_v16  ;;  %v10359_v40 = vadd.f32 %v1240_v36, %v12908_v17  ;;  %1801 = vmatprep.mubr.bf16.mxu0 %v1358_v32  ;;  %2332 = vmatprep.mubr.bf16.mxu1 %v1358_v32  ;;  %v1302_v42 = vmax.f32 %v10325_v29, 0.0  ;;  %v13108_v47 = vpack.c.bf16 %v1340_v3, %v13038_v28  ;;  %v10983_v28 = vld [vmem:[%s13484_s5 + $0x3a0] ss:$8 sps:$4 sm:$0xff]   ;;  %v10991_v18 = vld [vmem:[%s13484_s5 + $0x3b4] ss:$8 sps:$4 sm:$0xff]  }
 0x1f5   :  { %v1305_v43 = vmax.f32 %v10326_v33, 0.0  ;;  %v1307_v46 = vmax.f32 %v10358_v25, 0.0  ;;  %1802 = vmatmul.mubr.bf16.gmra.mrb[40].mxu0 %v1357_v21  ;;  %2333 = vmatmul.mubr.bf16.gmra.mrb[40].mxu1 %v1357_v21  ;;  %v1304_v48 = vmax.f32 %v10357_v30, 0.0  ;;  %v10994_v32 = vld [vmem:[%s13484_s5 + $0x1c4] ss:$8 sps:$4 sm:$0xff]  }
 0x1f6   :  { %v1306_v49 = vmax.f32 %v10327_v39, 0.0  ;;  %v1308_v50 = vmax.f32 %v10359_v40, 0.0  ;;  %1839 = vmatpush1.bf16.msra.mxu0 %v10968_v5  ;;  %2370 = vmatpush1.bf16.msra.mxu1 %v10971_v6  ;;  %v10995_v39 = vld [vmem:[%s13484_s5 + $0x3c0] ss:$8 sps:$4 sm:$0xff]  }
 0x1f7   :  { %v1341_v51 = vmax.f32 %v1301_v37, %v1305_v43  ;;  %v1343_v53 = vmax.f32 %v1303_v38, %v1307_v46  ;;  %1840 = vmatprep.subr.bf16.mxu0 %v10976_v22  ;;  %2371 = vmatprep.subr.bf16.mxu1 %v10979_v26  ;;  %v10992_v38 = vld [vmem:[%s13484_s5 + $0x1c0] ss:$8 sps:$4 sm:$0xff]   ;;  %v11003_v43 = vld [vmem:[%s13484_s5 + $0x3d4] ss:$8 sps:$4 sm:$0xff]  }
 0x1f8   :  { %v1342_v54 = vmax.f32 %v1302_v42, %v1306_v49  ;;  %v1344_v59 = vmax.f32 %v1304_v48, %v1308_v50  ;;  %v1018_v60 = vpop.f32.mrb[28].mxu0  ;;  %v1244_v61 = vpop.f32.mrb[28].mxu1  ;;  %v11000_v42 = vld [vmem:[%s13484_s5 + $0x1d4] ss:$8 sps:$4 sm:$0xff]   ;;  %v11006_v48 = vld [vmem:[%s13484_s5 + $0x1e4] ss:$8 sps:$4 sm:$0xff]  }
 0x1f9   :  { %v10328_v55 = vadd.f32 %v1018_v60, %v12899_v14  ;;  %v10360_v63 = vadd.f32 %v1244_v61, %v12902_v15  ;;  %v1020_v0 = vpop.f32.mrb[29].mxu0  ;;  %v1246_v56 = vpop.f32.mrb[29].mxu1  ;;  %v11009_v49 = vld [vmem:[%s13484_s5 + $0x3e4] ss:$8 sps:$4 sm:$0xff]   ;;  %v11004_v50 = vld [vmem:[%s13484_s5 + $0x1e0] ss:$8 sps:$4 sm:$0xff]  }
 0x1fa   :  { %v10329_v2 = vadd.f32 %v1020_v0, %v12905_v16  ;;  %v10361_v3 = vadd.f32 %v1246_v56, %v12908_v17  ;;  %1841 = vmatpush1.bf16.msra.mxu0 %v10974_v27  ;;  %2372 = vmatpush1.bf16.msra.mxu1 %v10977_v41  ;;  %v1022_v4 = vpop.f32.mrb[30].mxu0  ;;  %v1248_v57 = vpop.f32.mrb[30].mxu1  ;;  %v11018_v60 = vld [vmem:[#allocation4 + $0x4] ss:$16 sps:$4 sm:$0xff]   ;;  %v11021_v61 = vld [vmem:[#allocation4 + $0xc] ss:$16 sps:$4 sm:$0xff]  }
 0x1fb   :  { %v10330_v5 = vadd.f32 %v1022_v4, %v12899_v14  ;;  %v10362_v6 = vadd.f32 %v1248_v57, %v12902_v15  ;;  %v1024_v7 = vpop.f32.mrb[31].mxu0  ;;  %v1250_v11 = vpop.f32.mrb[31].mxu1  ;;  %1842 = vmatprep.subr.bf16.mxu0 %v10982_v44  ;;  %2373 = vmatprep.subr.bf16.mxu1 %v10985_v45  ;;  %v1309_v19 = vmax.f32 %v10328_v55, 0.0  ;;  %v1311_v21 = vmax.f32 %v10360_v63, 0.0  ;;  %v10986_v14 = vld [vmem:[%s13484_s5 + $0x1b0] ss:$8 sps:$4 sm:$0xff]  }
 0x1fc   :  { %v10331_v22 = vadd.f32 %v1024_v7, %v12905_v16  ;;  %v10363_v29 = vadd.f32 %v1250_v11, %v12908_v17  ;;  %v10989_v15 = vld [vmem:[%s13484_s5 + $0x3b0] ss:$8 sps:$4 sm:$0xff]   ;;  %v1310_v30 = vmax.f32 %v10329_v2, 0.0  ;;  %v10997_v16 = vld [vmem:[%s13484_s5 + $0x3c4] ss:$8 sps:$4 sm:$0xff]   ;;  %v1312_v17 = vmax.f32 %v10361_v3, 0.0 }
 0x1fd   :  { %v1313_v58 = vmax.f32 %v10330_v5, 0.0  ;;  %v1315_v31 = vmax.f32 %v10362_v6, 0.0  ;;  %v10998_v44 = vld [vmem:[%s13484_s5 + $0x1d0] ss:$8 sps:$4 sm:$0xff]   ;;  %v11024_v55 = vld [vmem:[#allocation4 + $0x24] ss:$16 sps:$4 sm:$0xff]  }
 0x1fe   :  { %v1314_v33 = vmax.f32 %v10331_v22, 0.0  ;;  %v1316_v25 = vmax.f32 %v10363_v29, 0.0  ;;  %1843 = vmatpush1.bf16.msra.mxu0 %v10980_v62  ;;  %2374 = vmatpush1.bf16.msra.mxu1 %v10983_v28  ;;  %v11001_v45 = vld [vmem:[%s13484_s5 + $0x3d0] ss:$8 sps:$4 sm:$0xff]   ;;  %v11027_v63 = vld [vmem:[#allocation4 + $0x2c] ss:$16 sps:$4 sm:$0xff]  }
 0x1ff   :  { %v1345_v34 = vmax.f32 %v1309_v19, %v1313_v58  ;;  %v1347_v36 = vmax.f32 %v1311_v21, %v1315_v31  ;;  %1844 = vmatprep.subr.bf16.mxu0 %v10988_v1  ;;  %2375 = vmatprep.subr.bf16.mxu1 %v10991_v18  ;;  %v11016_v62 = vld [vmem:[#allocation4] ss:$16 sps:$4 sm:$0xff]   ;;  %v11019_v28 = vld [vmem:[#allocation4 + $0x8] ss:$16 sps:$4 sm:$0xff]   ;;  %v11030_v1 = vld [vmem:[#allocation4 + $0x44] ss:$16 sps:$4 sm:$0xff]  }
 0x200   :  { %v1346_v26 = vmax.f32 %v1310_v30, %v1314_v33  ;;  %v1348_v37 = vmax.f32 %v1312_v17, %v1316_v25  ;;  %v11022_v0 = vld [vmem:[#allocation4 + $0x20] ss:$16 sps:$4 sm:$0xff]   ;;  %v11025_v56 = vld [vmem:[#allocation4 + $0x28] ss:$16 sps:$4 sm:$0xff]   ;;  %v11033_v2 = vld [vmem:[#allocation4 + $0x4c] ss:$16 sps:$4 sm:$0xff]  }
 0x201   :  { %v1361_v40 = vpack.c.bf16 %v1345_v34, %v1341_v51  ;;  %v13148_v27 = vpack.c.bf16 %v1347_v36, %v1343_v53  ;;  %v11007_v51 = vld [vmem:[%s13484_s5 + $0x3e0] ss:$8 sps:$4 sm:$0xff]   ;;  %v11012_v53 = vld [vmem:[%s13484_s5 + $0x1f4] ss:$8 sps:$4 sm:$0xff]  }
 0x202   :  { %1845 = vmatpush1.bf16.msra.mxu0 %v10986_v14  ;;  %2376 = vmatpush1.bf16.msra.mxu1 %v10989_v15  ;;  %v1362_v41 = vpack.c.bf16 %v1346_v26, %v1342_v54  ;;  %v13156_v46 = vpack.c.bf16 %v1348_v37, %v1344_v59  ;;  %v11015_v54 = vld [vmem:[%s13484_s5 + $0x3f4] ss:$8 sps:$4 sm:$0xff]   ;;  %v11013_v59 = vld [vmem:[%s13484_s5 + $0x3f0] ss:$8 sps:$4 sm:$0xff]  }
 0x203   :  { %1846 = vmatprep.subr.bf16.mxu0 %v10994_v32  ;;  %2377 = vmatprep.subr.bf16.mxu1 %v10997_v16  ;;  %v11028_v3 = vld [vmem:[#allocation4 + $0x40] ss:$16 sps:$4 sm:$0xff]   ;;  %v11031_v4 = vld [vmem:[#allocation4 + $0x48] ss:$16 sps:$4 sm:$0xff]   ;;  %v11036_v57 = vld [vmem:[#allocation4 + $0x64] ss:$16 sps:$4 sm:$0xff]  }
 0x204   :  { %1811 = vmatprep.mubr.bf16.mxu0 %v1362_v41  ;;  %2342 = vmatprep.mubr.bf16.mxu1 %v1362_v41  ;;  %v11039_v5 = vld [vmem:[#allocation4 + $0x6c] ss:$16 sps:$4 sm:$0xff]   ;;  %v11042_v6 = vld [vmem:[#allocation4 + $0x84] ss:$16 sps:$4 sm:$0xff]   ;;  %v11040_v11 = vld [vmem:[#allocation4 + $0x80] ss:$16 sps:$4 sm:$0xff]  }
 0x205   :  { %1812 = vmatmul.mubr.bf16.gmra.mrb[44].mxu0 %v1361_v40  ;;  %2343 = vmatmul.mubr.bf16.gmra.mrb[44].mxu1 %v1361_v40  ;;  %v11045_v7 = vld [vmem:[#allocation4 + $0x8c] ss:$16 sps:$4 sm:$0xff]   ;;  %v11043_v18 = vld [vmem:[#allocation4 + $0x88] ss:$16 sps:$4 sm:$0xff]   ;;  %v11048_v19 = vld [vmem:[#allocation4 + $0xa4] ss:$16 sps:$4 sm:$0xff]  }
 0x206   :  { %1847 = vmatpush1.bf16.msra.mxu0 %v10992_v38  ;;  %2378 = vmatpush1.bf16.msra.mxu1 %v10995_v39  ;;  %v11051_v21 = vld [vmem:[#allocation4 + $0xac] ss:$16 sps:$4 sm:$0xff]   ;;  %v11054_v22 = vld [vmem:[#allocation4 + $0xc4] ss:$16 sps:$4 sm:$0xff]   ;;  %v11052_v14 = vld [vmem:[#allocation4 + $0xc0] ss:$16 sps:$4 sm:$0xff]  }
 0x207   :  { %1854 = vmatprep.mubr.bf16.mxu0 %v12941_v35  ;;  %2385 = vmatprep.mubr.bf16.mxu1 %v12941_v35  ;;  %v11010_v35 = vld [vmem:[%s13484_s5 + $0x1f0] ss:$8 sps:$4 sm:$0xff]   ;;  %v11057_v29 = vld [vmem:[#allocation4 + $0xcc] ss:$16 sps:$4 sm:$0xff]   ;;  %v11060_v30 = vld [vmem:[#allocation4 + $0xe4] ss:$16 sps:$4 sm:$0xff]  }
 0x208   :  { %1848 = vmatprep.subr.bf16.mxu0 %v11000_v42  ;;  %2379 = vmatprep.subr.bf16.mxu1 %v11003_v43  ;;  %v11055_v15 = vld [vmem:[#allocation4 + $0xc8] ss:$16 sps:$4 sm:$0xff]   ;;  %v11063_v58 = vld [vmem:[#allocation4 + $0xec] ss:$16 sps:$4 sm:$0xff]   ;;  %v11066_v32 = vld [vmem:[#allocation4 + $0x104] ss:$16 sps:$4 sm:$0xff]  }
 0x209   :  { %v11061_v31 = vld [vmem:[#allocation4 + $0xe8] ss:$16 sps:$4 sm:$0xff]   ;;  %v11069_v16 = vld [vmem:[#allocation4 + $0x10c] ss:$16 sps:$4 sm:$0xff]   ;;  %v11064_v17 = vld [vmem:[#allocation4 + $0x100] ss:$16 sps:$4 sm:$0xff]  }
 0x20a   :  { %1849 = vmatpush1.bf16.msra.mxu0 %v10998_v44  ;;  %2380 = vmatpush1.bf16.msra.mxu1 %v11001_v45  ;;  %v11067_v33 = vld [vmem:[#allocation4 + $0x108] ss:$16 sps:$4 sm:$0xff]   ;;  %v11072_v25 = vld [vmem:[#allocation4 + $0x124] ss:$16 sps:$4 sm:$0xff]   ;;  %v11075_v34 = vld [vmem:[#allocation4 + $0x12c] ss:$16 sps:$4 sm:$0xff]  }
 0x20b   :  { %1850 = vmatprep.subr.bf16.mxu0 %v11006_v48  ;;  %2381 = vmatprep.subr.bf16.mxu1 %v11009_v49  ;;  %v11070_v36 = vld [vmem:[#allocation4 + $0x120] ss:$16 sps:$4 sm:$0xff]   ;;  %v11073_v26 = vld [vmem:[#allocation4 + $0x128] ss:$16 sps:$4 sm:$0xff]   ;;  %v11078_v37 = vld [vmem:[#allocation4 + $0x144] ss:$16 sps:$4 sm:$0xff]  }
 0x20c   :  { %v11081_v38 = vld [vmem:[#allocation4 + $0x14c] ss:$16 sps:$4 sm:$0xff]   ;;  %v11076_v39 = vld [vmem:[#allocation4 + $0x140] ss:$16 sps:$4 sm:$0xff]   ;;  %v11079_v40 = vld [vmem:[#allocation4 + $0x148] ss:$16 sps:$4 sm:$0xff]  }
 0x20d   :  { %v11087_v41 = vld [vmem:[#allocation4 + $0x16c] ss:$16 sps:$4 sm:$0xff]   ;;  %v11082_v42 = vld [vmem:[#allocation4 + $0x160] ss:$16 sps:$4 sm:$0xff]   ;;  %v11085_v43 = vld [vmem:[#allocation4 + $0x168] ss:$16 sps:$4 sm:$0xff]  }
 0x20e   :  { %1851 = vmatpush1.bf16.msra.mxu0 %v11004_v50  ;;  %2382 = vmatpush1.bf16.msra.mxu1 %v11007_v51  ;;  %v11093_v44 = vld [vmem:[#allocation4 + $0x18c] ss:$16 sps:$4 sm:$0xff]   ;;  %v11088_v45 = vld [vmem:[#allocation4 + $0x180] ss:$16 sps:$4 sm:$0xff]   ;;  %v11091_v48 = vld [vmem:[#allocation4 + $0x188] ss:$16 sps:$4 sm:$0xff]  }
 0x20f   :  { %1852 = vmatprep.subr.bf16.mxu0 %v11012_v53  ;;  %2383 = vmatprep.subr.bf16.mxu1 %v11015_v54  ;;  %v11096_v49 = vld [vmem:[#allocation4 + $0x1a4] ss:$16 sps:$4 sm:$0xff]   ;;  %v11099_v50 = vld [vmem:[#allocation4 + $0x1ac] ss:$16 sps:$4 sm:$0xff]   ;;  %v11094_v51 = vld [vmem:[#allocation4 + $0x1a0] ss:$16 sps:$4 sm:$0xff]  }
 0x210   :  { %v11097_v53 = vld [vmem:[#allocation4 + $0x1a8] ss:$16 sps:$4 sm:$0xff]   ;;  %v11102_v54 = vld [vmem:[#allocation4 + $0x1c4] ss:$16 sps:$4 sm:$0xff]  }
 0x212   :  { %1853 = vmatpush1.bf16.msra.mxu0 %v11010_v35  ;;  %2384 = vmatpush1.bf16.msra.mxu1 %v11013_v59  ;;  %v11105_v35 = vld [vmem:[#allocation4 + $0x1cc] ss:$16 sps:$4 sm:$0xff]   ;;  %v11100_v59 = vld [vmem:[#allocation4 + $0x1c0] ss:$16 sps:$4 sm:$0xff]  }
 0x213   :  { %3666 = vmatprep.subr.bf16.mxu0 %v11018_v60  ;;  %3885 = vmatprep.subr.bf16.mxu1 %v11021_v61  ;;  %v11103_v60 = vld [vmem:[#allocation4 + $0x1c8] ss:$16 sps:$4 sm:$0xff]   ;;  %v11108_v61 = vld [vmem:[#allocation4 + $0x1e4] ss:$16 sps:$4 sm:$0xff]  }
 0x215   :  { %1855 = vmatmul.mubr.bf16.vlgmr.msra.gmra.mrb[32].mxu0 %v12932_v24  ;;  %2386 = vmatmul.mubr.bf16.vlgmr.msra.gmra.mrb[32].mxu1 %v12932_v24  ;;  %v11034_v24 = vld [vmem:[#allocation4 + $0x60] ss:$16 sps:$4 sm:$0xff]  }
 0x216   :  { %1864 = vmatprep.mubr.bf16.mxu0 %v13034_v20  ;;  %2395 = vmatprep.mubr.bf16.mxu1 %v13034_v20  ;;  %v11037_v20 = vld [vmem:[#allocation4 + $0x68] ss:$16 sps:$4 sm:$0xff]  }
 0x217   :  { %3667 = vmatpush1.bf16.msra.mxu0 %v11016_v62  ;;  %3886 = vmatpush1.bf16.msra.mxu1 %v11019_v28  ;;  %v11111_v62 = vld [vmem:[#allocation4 + $0x1ec] ss:$16 sps:$4 sm:$0xff]   ;;  %v11106_v28 = vld [vmem:[#allocation4 + $0x1e0] ss:$16 sps:$4 sm:$0xff]  }
 0x218   :  { %3668 = vmatprep.subr.bf16.mxu0 %v11024_v55  ;;  %3887 = vmatprep.subr.bf16.mxu1 %v11027_v63  ;;  %v11109_v55 = vld [vmem:[#allocation4 + $0x1e8] ss:$16 sps:$4 sm:$0xff]   ;;  %v11114_v63 = vld [vmem:[#allocation4 + $0x204] ss:$16 sps:$4 sm:$0xff]  }
 0x21b   :  { %3669 = vmatpush1.bf16.msra.mxu0 %v11022_v0  ;;  %3888 = vmatpush1.bf16.msra.mxu1 %v11025_v56  ;;  %v11117_v0 = vld [vmem:[#allocation4 + $0x20c] ss:$16 sps:$4 sm:$0xff]  }
 0x21c   :  { %3670 = vmatprep.subr.bf16.mxu0 %v11030_v1  ;;  %3889 = vmatprep.subr.bf16.mxu1 %v11033_v2 }
 0x21d   :  { %1865 = vmatmul.mubr.bf16.gmra.mrb[36].mxu0 %v13009_v52  ;;  %2396 = vmatmul.mubr.bf16.gmra.mrb[36].mxu1 %v13009_v52  ;;  %v11046_v52 = vld [vmem:[#allocation4 + $0xa0] ss:$16 sps:$4 sm:$0xff]  }
 0x21e   :  { %1874 = vmatprep.mubr.bf16.mxu0 %v13108_v47  ;;  %2405 = vmatprep.mubr.bf16.mxu1 %v13108_v47  ;;  %v11049_v47 = vld [vmem:[#allocation4 + $0xa8] ss:$16 sps:$4 sm:$0xff]  }
 0x21f   :  { %3671 = vmatpush1.bf16.msra.mxu0 %v11028_v3  ;;  %3890 = vmatpush1.bf16.msra.mxu1 %v11031_v4 }
 0x220   :  { %3672 = vmatprep.subr.bf16.mxu0 %v11036_v57  ;;  %3891 = vmatprep.subr.bf16.mxu1 %v11039_v5 }
 0x223   :  { %3673 = vmatpush1.bf16.msra.mxu0 %v11034_v24  ;;  %3892 = vmatpush1.bf16.msra.mxu1 %v11037_v20 }
 0x224   :  { %3674 = vmatprep.subr.bf16.mxu0 %v11042_v6  ;;  %3893 = vmatprep.subr.bf16.mxu1 %v11045_v7 }
 0x225   :  { %1875 = vmatmul.mubr.bf16.gmra.mrb[40].mxu0 %v13083_v23  ;;  %2406 = vmatmul.mubr.bf16.gmra.mrb[40].mxu1 %v13083_v23  ;;  %v11058_v23 = vld [vmem:[#allocation4 + $0xe0] ss:$16 sps:$4 sm:$0xff]  }
 0x226   :  { %1884 = vmatprep.mubr.bf16.mxu0 %v13156_v46  ;;  %2415 = vmatprep.mubr.bf16.mxu1 %v13156_v46  ;;  %v11090_v46 = vld [vmem:[#allocation4 + $0x184] ss:$16 sps:$4 sm:$0xff]  }
 0x227   :  { %3675 = vmatpush1.bf16.msra.mxu0 %v11040_v11  ;;  %3894 = vmatpush1.bf16.msra.mxu1 %v11043_v18 }
 0x228   :  { %3676 = vmatprep.subr.bf16.mxu0 %v11048_v19  ;;  %3895 = vmatprep.subr.bf16.mxu1 %v11051_v21  ;;  %v11112_v21 = vld [vmem:[#allocation4 + $0x200] ss:$16 sps:$4 sm:$0xff]  }
 0x22b   :  { %3677 = vmatpush1.bf16.msra.mxu0 %v11046_v52  ;;  %3896 = vmatpush1.bf16.msra.mxu1 %v11049_v47  ;;  %v11115_v52 = vld [vmem:[#allocation4 + $0x208] ss:$16 sps:$4 sm:$0xff]  }
 0x22c   :  { %3678 = vmatprep.subr.bf16.mxu0 %v11054_v22  ;;  %3897 = vmatprep.subr.bf16.mxu1 %v11057_v29 }
 0x22d   :  { %1885 = vmatmul.mubr.bf16.gmra.mrb[44].mxu0 %v13148_v27  ;;  %2416 = vmatmul.mubr.bf16.gmra.mrb[44].mxu1 %v13148_v27  ;;  %v11084_v27 = vld [vmem:[#allocation4 + $0x164] ss:$16 sps:$4 sm:$0xff]  }
 0x22f   :  { %3679 = vmatpush1.bf16.msra.mxu0 %v11052_v14  ;;  %3898 = vmatpush1.bf16.msra.mxu1 %v11055_v15  ;;  %v11120_v14 = vld [vmem:[#allocation4 + $0x224] ss:$16 sps:$4 sm:$0xff]  }
 0x230   :  { %3680 = vmatprep.subr.bf16.mxu0 %v11060_v30  ;;  %3899 = vmatprep.subr.bf16.mxu1 %v11063_v58 }
 0x233   :  { %3681 = vmatpush1.bf16.msra.mxu0 %v11058_v23  ;;  %3900 = vmatpush1.bf16.msra.mxu1 %v11061_v31  ;;  %v11123_v31 = vld [vmem:[#allocation4 + $0x22c] ss:$16 sps:$4 sm:$0xff]  }
 0x234   :  { %3682 = vmatprep.subr.bf16.mxu0 %v11066_v32  ;;  %3901 = vmatprep.subr.bf16.mxu1 %v11069_v16 }
 0x237   :  { %3683 = vmatpush1.bf16.msra.mxu0 %v11064_v17  ;;  %3902 = vmatpush1.bf16.msra.mxu1 %v11067_v33 }
 0x238   :  { %3684 = vmatprep.subr.bf16.mxu0 %v11072_v25  ;;  %3903 = vmatprep.subr.bf16.mxu1 %v11075_v34 }
 0x23b   :  { %3685 = vmatpush1.bf16.msra.mxu0 %v11070_v36  ;;  %3904 = vmatpush1.bf16.msra.mxu1 %v11073_v26  ;;  %v11118_v26 = vld [vmem:[#allocation4 + $0x220] ss:$16 sps:$4 sm:$0xff]  }
 0x23c   :  { %3686 = vmatprep.subr.bf16.mxu0 %v11078_v37  ;;  %3905 = vmatprep.subr.bf16.mxu1 %v11081_v38  ;;  %v11121_v37 = vld [vmem:[#allocation4 + $0x228] ss:$16 sps:$4 sm:$0xff]  }
 0x23f   :  { %3687 = vmatpush1.bf16.msra.mxu0 %v11076_v39  ;;  %3906 = vmatpush1.bf16.msra.mxu1 %v11079_v40  ;;  %v11126_v39 = vld [vmem:[#allocation4 + $0x244] ss:$16 sps:$4 sm:$0xff]   ;;  %v11129_v40 = vld [vmem:[#allocation4 + $0x24c] ss:$16 sps:$4 sm:$0xff]  }
 0x240   :  { %3688 = vmatprep.subr.bf16.mxu0 %v11084_v27  ;;  %3907 = vmatprep.subr.bf16.mxu1 %v11087_v41  ;;  %v11124_v41 = vld [vmem:[#allocation4 + $0x240] ss:$16 sps:$4 sm:$0xff]  }
 0x243   :  { %3689 = vmatpush1.bf16.msra.mxu0 %v11082_v42  ;;  %3908 = vmatpush1.bf16.msra.mxu1 %v11085_v43 }
 0x244   :  { %3690 = vmatprep.subr.bf16.mxu0 %v11090_v46  ;;  %3909 = vmatprep.subr.bf16.mxu1 %v11093_v44 }
 0x247   :  { %3691 = vmatpush1.bf16.msra.mxu0 %v11088_v45  ;;  %3910 = vmatpush1.bf16.msra.mxu1 %v11091_v48  ;;  %v11127_v45 = vld [vmem:[#allocation4 + $0x248] ss:$16 sps:$4 sm:$0xff]  }
 0x248   :  { %3692 = vmatprep.subr.bf16.mxu0 %v11096_v49  ;;  %3911 = vmatprep.subr.bf16.mxu1 %v11099_v50 }
 0x24b   :  { %3693 = vmatpush1.bf16.msra.mxu0 %v11094_v51  ;;  %3912 = vmatpush1.bf16.msra.mxu1 %v11097_v53 }
 0x24c   :  { %3694 = vmatprep.subr.bf16.mxu0 %v11102_v54  ;;  %3913 = vmatprep.subr.bf16.mxu1 %v11105_v35 }
 0x24f   :  { %3695 = vmatpush1.bf16.msra.mxu0 %v11100_v59  ;;  %3914 = vmatpush1.bf16.msra.mxu1 %v11103_v60  ;;  %v11132_v59 = vld [vmem:[#allocation4 + $0x264] ss:$16 sps:$4 sm:$0xff]   ;;  %v11135_v60 = vld [vmem:[#allocation4 + $0x26c] ss:$16 sps:$4 sm:$0xff]  }
 0x250   :  { %3696 = vmatprep.subr.bf16.mxu0 %v11108_v61  ;;  %3915 = vmatprep.subr.bf16.mxu1 %v11111_v62 }
 0x253   :  { %3697 = vmatpush1.bf16.msra.mxu0 %v11106_v28  ;;  %3916 = vmatpush1.bf16.msra.mxu1 %v11109_v55 }
 0x254   :  { %3739 = vmatprep.subr.bf16.mxu0 %v11114_v63  ;;  %3958 = vmatprep.subr.bf16.mxu1 %v11117_v0  ;;  %v11130_v0 = vld [vmem:[#allocation4 + $0x260] ss:$16 sps:$4 sm:$0xff]  }
 0x2e8   :  { %v1856_v56 = vpop.f32.mrb[32].mxu0  ;;  %v2387_v1 = vpop.f32.mrb[32].mxu1 }
 0x2e9   :  { %v2426_v2 = vmax.f32 %v1856_v56, %v2387_v1  ;;  %v1858_v3 = vpop.f32.mrb[33].mxu0  ;;  %v2389_v4 = vpop.f32.mrb[33].mxu1  ;;  %v11133_v56 = vld [vmem:[#allocation4 + $0x268] ss:$16 sps:$4 sm:$0xff]  }
 0x2ea   :  { %v2427_v57 = vmax.f32 %v1858_v3, %v2389_v4  ;;  %v1860_v5 = vpop.f32.mrb[34].mxu0  ;;  %v2391_v24 = vpop.f32.mrb[34].mxu1  ;;  %v11141_v3 = vld [vmem:[#allocation4 + $0x28c] ss:$16 sps:$4 sm:$0xff]  }
 0x2eb   :  { %v2428_v20 = vmax.f32 %v1860_v5, %v2391_v24  ;;  %v1862_v6 = vpop.f32.mrb[35].mxu0  ;;  %v2393_v7 = vpop.f32.mrb[35].mxu1 }
 0x2ec   :  { %v2429_v11 = vmax.f32 %v1862_v6, %v2393_v7  ;;  %v11139_v7 = vld [vmem:[#allocation4 + $0x288] ss:$16 sps:$4 sm:$0xff]  }
 0x2ed   :  { %v13204_v18 = vpack.c.bf16 %v2428_v20, %v2426_v2  ;;  %v11138_v2 = vld [vmem:[#allocation4 + $0x284] ss:$16 sps:$4 sm:$0xff]  }
 0x2ee   :  { %v13206_v19 = vpack.c.bf16 %v2429_v11, %v2427_v57  ;;  %v11136_v57 = vld [vmem:[#allocation4 + $0x280] ss:$16 sps:$4 sm:$0xff]  }
 0x2ef   :  { %v2461_v15 = vrot.slane %v13204_v18, 4 }
 0x2f0   :  { %v2462_v47 = vrot.slane %v13206_v19, 4  ;;  %v1866_v22 = vpop.f32.mrb[36].mxu0  ;;  %v2397_v29 = vpop.f32.mrb[36].mxu1 }
 0x2f1   :  { %v2430_v30 = vmax.f32 %v1866_v22, %v2397_v29  ;;  %v1868_v58 = vpop.f32.mrb[37].mxu0  ;;  %v2399_v23 = vpop.f32.mrb[37].mxu1 }
 0x2f2   :  { %v2431_v32 = vmax.f32 %v1868_v58, %v2399_v23  ;;  %v1870_v16 = vpop.f32.mrb[38].mxu0  ;;  %v2401_v17 = vpop.f32.mrb[38].mxu1  ;;  %9623 = vmatprep.mubr.msk.bf16.mxu0 %vm12579_vm1, %v2462_v47  ;;  %9629 = vmatprep.mubr.msk.bf16.mxu1 %vm12579_vm1, %v2462_v47 }
 0x2f3   :  { %v2432_v33 = vmax.f32 %v1870_v16, %v2401_v17  ;;  %v1872_v25 = vpop.f32.mrb[39].mxu0  ;;  %v2403_v34 = vpop.f32.mrb[39].mxu1  ;;  %9625 = vmatmul.mubr.msk.bf16.vlgmr.msra.gmra.mrb[48].mxu0 %vm12579_vm1, %v2461_v15  ;;  %9631 = vmatmul.mubr.msk.bf16.vlgmr.msra.gmra.mrb[48].mxu1 %vm12579_vm1, %v2461_v15  ;;  %v11142_v17 = vld [vmem:[#allocation4 + $0x2a0] ss:$16 sps:$4 sm:$0xff]  }
 0x2f4   :  { %v2433_v36 = vmax.f32 %v1872_v25, %v2403_v34  ;;  %3740 = vmatpush1.bf16.msra.mxu0 %v11112_v21  ;;  %3959 = vmatpush1.bf16.msra.mxu1 %v11115_v52  ;;  %v11150_v34 = vld [vmem:[#allocation4 + $0x2c4] ss:$16 sps:$4 sm:$0xff]  }
 0x2f5   :  { %v13218_v38 = vpack.c.bf16 %v2432_v33, %v2430_v30  ;;  %3741 = vmatprep.subr.bf16.mxu0 %v11120_v14  ;;  %3960 = vmatprep.subr.bf16.mxu1 %v11123_v31  ;;  %v11147_v30 = vld [vmem:[#allocation4 + $0x2ac] ss:$16 sps:$4 sm:$0xff]   ;;  %v11145_v33 = vld [vmem:[#allocation4 + $0x2a8] ss:$16 sps:$4 sm:$0xff]  }
 0x2f6   :  { %v13220_v27 = vpack.c.bf16 %v2433_v36, %v2431_v32  ;;  %v11153_v36 = vld [vmem:[#allocation4 + $0x2cc] ss:$16 sps:$4 sm:$0xff]  }
 0x2f7   :  { %v2463_v42 = vrot.slane %v13218_v38, 4 }
 0x2f8   :  { %v2465_v43 = vrot.slane %v13220_v27, 4  ;;  %3742 = vmatpush1.bf16.msra.mxu0 %v11118_v26  ;;  %3961 = vmatpush1.bf16.msra.mxu1 %v11121_v37  ;;  %v1876_v46 = vpop.f32.mrb[40].mxu0  ;;  %v2407_v44 = vpop.f32.mrb[40].mxu1 }
 0x2f9   :  { %v2434_v48 = vmax.f32 %v1876_v46, %v2407_v44  ;;  %v1878_v49 = vpop.f32.mrb[41].mxu0  ;;  %v2409_v50 = vpop.f32.mrb[41].mxu1  ;;  %3743 = vmatprep.subr.bf16.mxu0 %v11126_v39  ;;  %3962 = vmatprep.subr.bf16.mxu1 %v11129_v40  ;;  %v13232_v63 = vsel %vm177_vm0, %v2461_v15, %v2463_v42  ;;  %v11144_v15 = vld [vmem:[#allocation4 + $0x2a4] ss:$16 sps:$4 sm:$0xff]   ;;  %v11148_v40 = vld [vmem:[#allocation4 + $0x2c0] ss:$16 sps:$4 sm:$0xff]  }
 0x2fa   :  { %v2435_v51 = vmax.f32 %v1878_v49, %v2409_v50  ;;  %v1880_v53 = vpop.f32.mrb[42].mxu0  ;;  %v2411_v54 = vpop.f32.mrb[42].mxu1  ;;  %v13225_v35 = vsel %vm177_vm0, %v2462_v47, %v2465_v43  ;;  %v11159_v46 = vld [vmem:[#allocation4 + $0x2ec] ss:$16 sps:$4 sm:$0xff]   ;;  %v11162_v49 = vld [vmem:[#allocation4 + $0x304] ss:$16 sps:$4 sm:$0xff]  }
 0x2fb   :  { %v2436_v61 = vmax.f32 %v1880_v53, %v2411_v54  ;;  %v1882_v62 = vpop.f32.mrb[43].mxu0  ;;  %v2413_v28 = vpop.f32.mrb[43].mxu1  ;;  %3708 = vmatprep.mubr.bf16.mxu0 %v13225_v35  ;;  %3927 = vmatprep.mubr.bf16.mxu1 %v13225_v35  ;;  %v11165_v50 = vld [vmem:[#allocation4 + $0x30c] ss:$16 sps:$4 sm:$0xff]   ;;  %v11163_v53 = vld [vmem:[#allocation4 + $0x308] ss:$16 sps:$4 sm:$0xff]  }
 0x2fc   :  { %v2437_v55 = vmax.f32 %v1882_v62, %v2413_v28  ;;  %3744 = vmatpush1.bf16.msra.mxu0 %v11124_v41  ;;  %3963 = vmatpush1.bf16.msra.mxu1 %v11127_v45  ;;  %v11151_v41 = vld [vmem:[#allocation4 + $0x2c8] ss:$16 sps:$4 sm:$0xff]   ;;  %v11154_v45 = vld [vmem:[#allocation4 + $0x2e0] ss:$16 sps:$4 sm:$0xff]   ;;  %v11168_v54 = vld [vmem:[#allocation4 + $0x324] ss:$16 sps:$4 sm:$0xff]  }
 0x2fd   :  { %v13234_v1 = vpack.c.bf16 %v2436_v61, %v2434_v48  ;;  %3709 = vmatmul.mubr.bf16.gmra.mrb[52].mxu0 %v13232_v63  ;;  %3928 = vmatmul.mubr.bf16.gmra.mrb[52].mxu1 %v13232_v63  ;;  %v11157_v48 = vld [vmem:[#allocation4 + $0x2e8] ss:$16 sps:$4 sm:$0xff]   ;;  %v11174_v62 = vld [vmem:[#allocation4 + $0x344] ss:$16 sps:$4 sm:$0xff]   ;;  %v11177_v28 = vld [vmem:[#allocation4 + $0x34c] ss:$16 sps:$4 sm:$0xff]  }
 0x2fe   :  { %v13238_v4 = vpack.c.bf16 %v2437_v55, %v2435_v51  ;;  %3745 = vmatprep.subr.bf16.mxu0 %v11132_v59  ;;  %3964 = vmatprep.subr.bf16.mxu1 %v11135_v60  ;;  %v11160_v51 = vld [vmem:[#allocation4 + $0x300] ss:$16 sps:$4 sm:$0xff]   ;;  %v11171_v59 = vld [vmem:[#allocation4 + $0x32c] ss:$16 sps:$4 sm:$0xff]   ;;  %v11169_v61 = vld [vmem:[#allocation4 + $0x328] ss:$16 sps:$4 sm:$0xff]  }
 0x2ff   :  { %v2467_v5 = vrot.slane %v13234_v1, 4  ;;  %v11166_v60 = vld [vmem:[#allocation4 + $0x320] ss:$16 sps:$4 sm:$0xff]   ;;  %v11175_v55 = vld [vmem:[#allocation4 + $0x348] ss:$16 sps:$4 sm:$0xff]  }
 0x300   :  { %v2469_v24 = vrot.slane %v13238_v4, 4  ;;  %3746 = vmatpush1.bf16.msra.mxu0 %v11130_v0  ;;  %3965 = vmatpush1.bf16.msra.mxu1 %v11133_v56  ;;  %v1886_v20 = vpop.f32.mrb[44].mxu0  ;;  %v2417_v6 = vpop.f32.mrb[44].mxu1  ;;  %v11180_v0 = vld [vmem:[#allocation4 + $0x364] ss:$16 sps:$4 sm:$0xff]  }
 0x301   :  { %v2438_v11 = vmax.f32 %v1886_v20, %v2417_v6  ;;  %v1888_v21 = vpop.f32.mrb[45].mxu0  ;;  %v2419_v52 = vpop.f32.mrb[45].mxu1  ;;  %3747 = vmatprep.subr.bf16.mxu0 %v11138_v2  ;;  %3966 = vmatprep.subr.bf16.mxu1 %v11141_v3  ;;  %v13250_v16 = vsel %vm177_vm0, %v2463_v42, %v2467_v5  ;;  %v11183_v56 = vld [vmem:[#allocation4 + $0x36c] ss:$16 sps:$4 sm:$0xff]   ;;  %v11178_v2 = vld [vmem:[#allocation4 + $0x360] ss:$16 sps:$4 sm:$0xff]  }
 0x302   :  { %v2439_v47 = vmax.f32 %v1888_v21, %v2419_v52  ;;  %v1890_v22 = vpop.f32.mrb[46].mxu0  ;;  %v2421_v29 = vpop.f32.mrb[46].mxu1  ;;  %v13243_v14 = vsel %vm177_vm0, %v2465_v43, %v2469_v24  ;;  %v11156_v43 = vld [vmem:[#allocation4 + $0x2e4] ss:$16 sps:$4 sm:$0xff]   ;;  %v11181_v3 = vld [vmem:[#allocation4 + $0x368] ss:$16 sps:$4 sm:$0xff]  }
 0x303   :  { %v2440_v58 = vmax.f32 %v1890_v22, %v2421_v29  ;;  %v1892_v23 = vpop.f32.mrb[47].mxu0  ;;  %v2423_v31 = vpop.f32.mrb[47].mxu1  ;;  %3718 = vmatprep.mubr.bf16.mxu0 %v13243_v14  ;;  %3937 = vmatprep.mubr.bf16.mxu1 %v13243_v14  ;;  %v11187_v20 = vld [vmem:[#allocation4 + $0x388] ss:$16 sps:$4 sm:$0xff]   ;;  %v11192_v6 = vld [vmem:[#allocation4 + $0x3a4] ss:$16 sps:$4 sm:$0xff]  }
 0x304   :  { %v2441_v32 = vmax.f32 %v1892_v23, %v2423_v31  ;;  %3748 = vmatpush1.bf16.msra.mxu0 %v11136_v57  ;;  %3967 = vmatpush1.bf16.msra.mxu1 %v11139_v7  ;;  %v11186_v57 = vld [vmem:[#allocation4 + $0x384] ss:$16 sps:$4 sm:$0xff]   ;;  %v11195_v7 = vld [vmem:[#allocation4 + $0x3ac] ss:$16 sps:$4 sm:$0xff]   ;;  %v11193_v21 = vld [vmem:[#allocation4 + $0x3a8] ss:$16 sps:$4 sm:$0xff]  }
 0x305   :  { %v13252_v25 = vpack.c.bf16 %v2440_v58, %v2438_v11  ;;  %3719 = vmatmul.mubr.bf16.gmra.mrb[56].mxu0 %v13250_v16  ;;  %3938 = vmatmul.mubr.bf16.gmra.mrb[56].mxu1 %v13250_v16  ;;  %v11190_v11 = vld [vmem:[#allocation4 + $0x3a0] ss:$16 sps:$4 sm:$0xff]   ;;  %v11198_v52 = vld [vmem:[#allocation4 + $0x3c4] ss:$16 sps:$4 sm:$0xff]   ;;  %v11199_v29 = vld [vmem:[#allocation4 + $0x3c8] ss:$16 sps:$4 sm:$0xff]  }
 0x306   :  { %v13256_v26 = vpack.c.bf16 %v2441_v32, %v2439_v47  ;;  %3749 = vmatprep.subr.bf16.mxu0 %v11144_v15  ;;  %3968 = vmatprep.subr.bf16.mxu1 %v11147_v30  ;;  %v11201_v47 = vld [vmem:[#allocation4 + $0x3cc] ss:$16 sps:$4 sm:$0xff]   ;;  %v11196_v22 = vld [vmem:[#allocation4 + $0x3c0] ss:$16 sps:$4 sm:$0xff]   ;;  %v11204_v15 = vld [vmem:[#allocation4 + $0x3e4] ss:$16 sps:$4 sm:$0xff]  }
 0x307   :  { %v13259_v37 = vrot.slane %v13252_v25, 4  ;;  %v11207_v30 = vld [vmem:[#allocation4 + $0x3ec] ss:$16 sps:$4 sm:$0xff]   ;;  %v11202_v58 = vld [vmem:[#allocation4 + $0x3e0] ss:$16 sps:$4 sm:$0xff]  }
 0x308   :  { %v13262_v39 = vrot.slane %v13256_v26, 4  ;;  %3750 = vmatpush1.bf16.msra.mxu0 %v11142_v17  ;;  %3969 = vmatpush1.bf16.msra.mxu1 %v11145_v33  ;;  %v11205_v23 = vld [vmem:[#allocation4 + $0x3e8] ss:$16 sps:$4 sm:$0xff]   ;;  %v11210_v31 = vld [vmem:[#allocation4 + $0x404] ss:$16 sps:$4 sm:$0xff]  }
 0x309   :  { %3751 = vmatprep.subr.bf16.mxu0 %v11150_v34  ;;  %3970 = vmatprep.subr.bf16.mxu1 %v11153_v36  ;;  %v13272_v44 = vsel %vm177_vm0, %v2467_v5, %v13259_v37  ;;  %v11189_v5 = vld [vmem:[#allocation4 + $0x38c] ss:$16 sps:$4 sm:$0xff]   ;;  %v11208_v17 = vld [vmem:[#allocation4 + $0x400] ss:$16 sps:$4 sm:$0xff]   ;;  %v11211_v33 = vld [vmem:[#allocation4 + $0x408] ss:$16 sps:$4 sm:$0xff]  }
 0x30a   :  { %v13266_v42 = vsel %vm177_vm0, %v2469_v24, %v13262_v39  ;;  %v11184_v24 = vld [vmem:[#allocation4 + $0x380] ss:$16 sps:$4 sm:$0xff]   ;;  %v11213_v32 = vld [vmem:[#allocation4 + $0x40c] ss:$16 sps:$4 sm:$0xff]   ;;  %v11216_v34 = vld [vmem:[#allocation4 + $0x424] ss:$16 sps:$4 sm:$0xff]  }
 0x30b   :  { %3728 = vmatprep.mubr.bf16.mxu0 %v13266_v42  ;;  %3947 = vmatprep.mubr.bf16.mxu1 %v13266_v42  ;;  %v11219_v36 = vld [vmem:[#allocation4 + $0x42c] ss:$16 sps:$4 sm:$0xff]  }
 0x30c   :  { %3752 = vmatpush1.bf16.msra.mxu0 %v11148_v40  ;;  %3971 = vmatpush1.bf16.msra.mxu1 %v11151_v41  ;;  %v11214_v40 = vld [vmem:[#allocation4 + $0x420] ss:$16 sps:$4 sm:$0xff]   ;;  %v11217_v41 = vld [vmem:[#allocation4 + $0x428] ss:$16 sps:$4 sm:$0xff]  }
 0x30d   :  { %3729 = vmatmul.mubr.bf16.gmra.mrb[60].mxu0 %v13272_v44  ;;  %3948 = vmatmul.mubr.bf16.gmra.mrb[60].mxu1 %v13272_v44 }
 0x30e   :  { %3771 = vmatprep.mubr.bf16.mxu0 %v13206_v19  ;;  %3990 = vmatprep.mubr.bf16.mxu1 %v13206_v19  ;;  %v11172_v19 = vld [vmem:[#allocation4 + $0x340] ss:$16 sps:$4 sm:$0xff]  }
 0x30f   :  { %3753 = vmatprep.subr.bf16.mxu0 %v11156_v43  ;;  %3972 = vmatprep.subr.bf16.mxu1 %v11159_v46  ;;  %v11222_v43 = vld [vmem:[#allocation4 + $0x444] ss:$16 sps:$4 sm:$0xff]   ;;  %v11225_v46 = vld [vmem:[#allocation4 + $0x44c] ss:$16 sps:$4 sm:$0xff]  }
 0x310   :  { %3754 = vmatpush1.bf16.msra.mxu0 %v11154_v45  ;;  %3973 = vmatpush1.bf16.msra.mxu1 %v11157_v48  ;;  %v11220_v45 = vld [vmem:[#allocation4 + $0x440] ss:$16 sps:$4 sm:$0xff]   ;;  %v11223_v48 = vld [vmem:[#allocation4 + $0x448] ss:$16 sps:$4 sm:$0xff]  }
 0x311   :  { %3755 = vmatprep.subr.bf16.mxu0 %v11162_v49  ;;  %3974 = vmatprep.subr.bf16.mxu1 %v11165_v50  ;;  %v11228_v49 = vld [vmem:[#allocation4 + $0x464] ss:$16 sps:$4 sm:$0xff]   ;;  %v11229_v50 = vld [vmem:[#allocation4 + $0x468] ss:$16 sps:$4 sm:$0xff]  }
 0x314   :  { %3756 = vmatpush1.bf16.msra.mxu0 %v11160_v51  ;;  %3975 = vmatpush1.bf16.msra.mxu1 %v11163_v53  ;;  %v11234_v51 = vld [vmem:[#allocation4 + $0x484] ss:$16 sps:$4 sm:$0xff]   ;;  %v11237_v53 = vld [vmem:[#allocation4 + $0x48c] ss:$16 sps:$4 sm:$0xff]  }
 0x315   :  { %3757 = vmatprep.subr.bf16.mxu0 %v11168_v54  ;;  %3976 = vmatprep.subr.bf16.mxu1 %v11171_v59  ;;  %v11232_v54 = vld [vmem:[#allocation4 + $0x480] ss:$16 sps:$4 sm:$0xff]   ;;  %v11235_v59 = vld [vmem:[#allocation4 + $0x488] ss:$16 sps:$4 sm:$0xff]  }
 0x318   :  { %3758 = vmatpush1.bf16.msra.mxu0 %v11166_v60  ;;  %3977 = vmatpush1.bf16.msra.mxu1 %v11169_v61  ;;  %v11240_v60 = vld [vmem:[#allocation4 + $0x4a4] ss:$16 sps:$4 sm:$0xff]   ;;  %v11241_v61 = vld [vmem:[#allocation4 + $0x4a8] ss:$16 sps:$4 sm:$0xff]  }
 0x319   :  { %3759 = vmatprep.subr.bf16.mxu0 %v11174_v62  ;;  %3978 = vmatprep.subr.bf16.mxu1 %v11177_v28  ;;  %v11246_v62 = vld [vmem:[#allocation4 + $0x4c4] ss:$16 sps:$4 sm:$0xff]   ;;  %v11249_v28 = vld [vmem:[#allocation4 + $0x4cc] ss:$16 sps:$4 sm:$0xff]  }
 0x31c   :  { %3760 = vmatpush1.bf16.msra.mxu0 %v11172_v19  ;;  %3979 = vmatpush1.bf16.msra.mxu1 %v11175_v55  ;;  %v11244_v19 = vld [vmem:[#allocation4 + $0x4c0] ss:$16 sps:$4 sm:$0xff]   ;;  %v11247_v55 = vld [vmem:[#allocation4 + $0x4c8] ss:$16 sps:$4 sm:$0xff]  }
 0x31d   :  { %3761 = vmatprep.subr.bf16.mxu0 %v11180_v0  ;;  %3980 = vmatprep.subr.bf16.mxu1 %v11183_v56  ;;  %v11252_v0 = vld [vmem:[#allocation4 + $0x4e4] ss:$16 sps:$4 sm:$0xff]   ;;  %v11253_v56 = vld [vmem:[#allocation4 + $0x4e8] ss:$16 sps:$4 sm:$0xff]  }
 0x320   :  { %3762 = vmatpush1.bf16.msra.mxu0 %v11178_v2  ;;  %3981 = vmatpush1.bf16.msra.mxu1 %v11181_v3  ;;  %v11258_v2 = vld [vmem:[#allocation4 + $0x504] ss:$16 sps:$4 sm:$0xff]   ;;  %v11261_v3 = vld [vmem:[#allocation4 + $0x50c] ss:$16 sps:$4 sm:$0xff]  }
 0x321   :  { %3763 = vmatprep.subr.bf16.mxu0 %v11186_v57  ;;  %3982 = vmatprep.subr.bf16.mxu1 %v11189_v5  ;;  %v11256_v57 = vld [vmem:[#allocation4 + $0x500] ss:$16 sps:$4 sm:$0xff]   ;;  %v11259_v5 = vld [vmem:[#allocation4 + $0x508] ss:$16 sps:$4 sm:$0xff]  }
 0x324   :  { %3764 = vmatpush1.bf16.msra.mxu0 %v11184_v24  ;;  %3983 = vmatpush1.bf16.msra.mxu1 %v11187_v20  ;;  %v11264_v24 = vld [vmem:[#allocation4 + $0x524] ss:$16 sps:$4 sm:$0xff]   ;;  %v11262_v20 = vld [vmem:[#allocation4 + $0x520] ss:$16 sps:$4 sm:$0xff]  }
 0x325   :  { %3765 = vmatprep.subr.bf16.mxu0 %v11192_v6  ;;  %3984 = vmatprep.subr.bf16.mxu1 %v11195_v7  ;;  %v11265_v6 = vld [vmem:[#allocation4 + $0x528] ss:$16 sps:$4 sm:$0xff]   ;;  %v11270_v7 = vld [vmem:[#allocation4 + $0x544] ss:$16 sps:$4 sm:$0xff]  }
 0x328   :  { %3766 = vmatpush1.bf16.msra.mxu0 %v11190_v11  ;;  %3985 = vmatpush1.bf16.msra.mxu1 %v11193_v21  ;;  %v11268_v11 = vld [vmem:[#allocation4 + $0x540] ss:$16 sps:$4 sm:$0xff]   ;;  %v11271_v21 = vld [vmem:[#allocation4 + $0x548] ss:$16 sps:$4 sm:$0xff]  }
 0x329   :  { %3767 = vmatprep.subr.bf16.mxu0 %v11198_v52  ;;  %3986 = vmatprep.subr.bf16.mxu1 %v11201_v47  ;;  %v11276_v52 = vld [vmem:[#allocation4 + $0x564] ss:$16 sps:$4 sm:$0xff]   ;;  %v11279_v47 = vld [vmem:[#allocation4 + $0x56c] ss:$16 sps:$4 sm:$0xff]  }
 0x32c   :  { %3768 = vmatpush1.bf16.msra.mxu0 %v11196_v22  ;;  %3987 = vmatpush1.bf16.msra.mxu1 %v11199_v29  ;;  %v11274_v22 = vld [vmem:[#allocation4 + $0x560] ss:$16 sps:$4 sm:$0xff]   ;;  %v11277_v29 = vld [vmem:[#allocation4 + $0x568] ss:$16 sps:$4 sm:$0xff]  }
 0x32d   :  { %3769 = vmatprep.subr.bf16.mxu0 %v11204_v15  ;;  %3988 = vmatprep.subr.bf16.mxu1 %v11207_v30  ;;  %v11282_v15 = vld [vmem:[#allocation4 + $0x584] ss:$16 sps:$4 sm:$0xff]   ;;  %v11285_v30 = vld [vmem:[#allocation4 + $0x58c] ss:$16 sps:$4 sm:$0xff]  }
 0x330   :  { %3770 = vmatpush1.bf16.msra.mxu0 %v11202_v58  ;;  %3989 = vmatpush1.bf16.msra.mxu1 %v11205_v23  ;;  %v11280_v58 = vld [vmem:[#allocation4 + $0x580] ss:$16 sps:$4 sm:$0xff]   ;;  %v11283_v23 = vld [vmem:[#allocation4 + $0x588] ss:$16 sps:$4 sm:$0xff]  }
 0x331   :  { %3812 = vmatprep.subr.bf16.mxu0 %v11210_v31  ;;  %4031 = vmatprep.subr.bf16.mxu1 %v11213_v32  ;;  %v11288_v31 = vld [vmem:[#allocation4 + $0x5a4] ss:$16 sps:$4 sm:$0xff]   ;;  %v11291_v32 = vld [vmem:[#allocation4 + $0x5ac] ss:$16 sps:$4 sm:$0xff]  }
 0x333   :  { %3772 = vmatmul.mubr.bf16.vlgmr.msra.gmra.mrb[48].mxu0 %v13204_v18  ;;  %3991 = vmatmul.mubr.bf16.vlgmr.msra.gmra.mrb[48].mxu1 %v13204_v18  ;;  %v11231_v18 = vld [vmem:[#allocation4 + $0x46c] ss:$16 sps:$4 sm:$0xff]  }
 0x334   :  { %3781 = vmatprep.mubr.bf16.mxu0 %v13220_v27  ;;  %3813 = vmatpush1.bf16.msra.mxu0 %v11208_v17  ;;  %v11286_v17 = vld [vmem:[#allocation4 + $0x5a0] ss:$16 sps:$4 sm:$0xff]  }
 0x335   :  { %4000 = vmatprep.mubr.bf16.mxu1 %v13220_v27  ;;  %4032 = vmatpush1.bf16.msra.mxu1 %v11211_v33  ;;  %v11226_v27 = vld [vmem:[#allocation4 + $0x460] ss:$16 sps:$4 sm:$0xff]   ;;  %v11289_v33 = vld [vmem:[#allocation4 + $0x5a8] ss:$16 sps:$4 sm:$0xff]  }
 0x336   :  { %3814 = vmatprep.subr.bf16.mxu0 %v11216_v34  ;;  %4033 = vmatprep.subr.bf16.mxu1 %v11219_v36  ;;  %v11294_v34 = vld [vmem:[#allocation4 + $0x5c4] ss:$16 sps:$4 sm:$0xff]   ;;  %v11297_v36 = vld [vmem:[#allocation4 + $0x5cc] ss:$16 sps:$4 sm:$0xff]  }
 0x338   :  { %3815 = vmatpush1.bf16.msra.mxu0 %v11214_v40  ;;  %v11292_v40 = vld [vmem:[#allocation4 + $0x5c0] ss:$16 sps:$4 sm:$0xff]  }
 0x339   :  { %4034 = vmatpush1.bf16.msra.mxu1 %v11217_v41  ;;  %3816 = vmatprep.subr.bf16.mxu0 %v11222_v43  ;;  %v11295_v41 = vld [vmem:[#allocation4 + $0x5c8] ss:$16 sps:$4 sm:$0xff]   ;;  %v11300_v43 = vld [vmem:[#allocation4 + $0x5e4] ss:$16 sps:$4 sm:$0xff]  }
 0x33a   :  { %4035 = vmatprep.subr.bf16.mxu1 %v11225_v46  ;;  %v11303_v46 = vld [vmem:[#allocation4 + $0x5ec] ss:$16 sps:$4 sm:$0xff]  }
 0x33b   :  { %3782 = vmatmul.mubr.bf16.gmra.mrb[52].mxu0 %v13218_v38  ;;  %4001 = vmatmul.mubr.bf16.gmra.mrb[52].mxu1 %v13218_v38  ;;  %v11243_v38 = vld [vmem:[#allocation4 + $0x4ac] ss:$16 sps:$4 sm:$0xff]  }
 0x33c   :  { %3791 = vmatprep.mubr.bf16.mxu0 %v13238_v4  ;;  %3817 = vmatpush1.bf16.msra.mxu0 %v11220_v45  ;;  %v11298_v45 = vld [vmem:[#allocation4 + $0x5e0] ss:$16 sps:$4 sm:$0xff]  }
 0x33d   :  { %4010 = vmatprep.mubr.bf16.mxu1 %v13238_v4  ;;  %4036 = vmatpush1.bf16.msra.mxu1 %v11223_v48  ;;  %v11238_v4 = vld [vmem:[#allocation4 + $0x4a0] ss:$16 sps:$4 sm:$0xff]   ;;  %v11301_v48 = vld [vmem:[#allocation4 + $0x5e8] ss:$16 sps:$4 sm:$0xff]  }
 0x33e   :  { %3818 = vmatprep.subr.bf16.mxu0 %v11228_v49  ;;  %4037 = vmatprep.subr.bf16.mxu1 %v11231_v18  ;;  %v11306_v49 = vld [vmem:[#allocation9 + $0x4] ss:$8 sps:$4 sm:$0xff]  }
 0x33f   :  { %v11309_v18 = vld [vmem:[#allocation9 + $0x204] ss:$8 sps:$4 sm:$0xff]  }
 0x340   :  { %3819 = vmatpush1.bf16.msra.mxu0 %v11226_v27  ;;  %v11304_v27 = vld [vmem:[#allocation9] ss:$8 sps:$4 sm:$0xff]  }
 0x341   :  { %4038 = vmatpush1.bf16.msra.mxu1 %v11229_v50  ;;  %3820 = vmatprep.subr.bf16.mxu0 %v11234_v51  ;;  %v11307_v50 = vld [vmem:[#allocation9 + $0x200] ss:$8 sps:$4 sm:$0xff]   ;;  %v11312_v51 = vld [vmem:[#allocation9 + $0x14] ss:$8 sps:$4 sm:$0xff]  }
 0x342   :  { %4039 = vmatprep.subr.bf16.mxu1 %v11237_v53  ;;  %v11315_v53 = vld [vmem:[#allocation9 + $0x214] ss:$8 sps:$4 sm:$0xff]  }
 0x343   :  { %3792 = vmatmul.mubr.bf16.gmra.mrb[56].mxu0 %v13234_v1  ;;  %4011 = vmatmul.mubr.bf16.gmra.mrb[56].mxu1 %v13234_v1  ;;  %v11255_v1 = vld [vmem:[#allocation4 + $0x4ec] ss:$16 sps:$4 sm:$0xff]  }
 0x344   :  { %3801 = vmatprep.mubr.bf16.mxu0 %v13256_v26  ;;  %3821 = vmatpush1.bf16.msra.mxu0 %v11232_v54  ;;  %v11310_v54 = vld [vmem:[#allocation9 + $0x10] ss:$8 sps:$4 sm:$0xff]  }
 0x345   :  { %4020 = vmatprep.mubr.bf16.mxu1 %v13256_v26  ;;  %4040 = vmatpush1.bf16.msra.mxu1 %v11235_v59  ;;  %v11250_v26 = vld [vmem:[#allocation4 + $0x4e0] ss:$16 sps:$4 sm:$0xff]  }
 0x346   :  { %3822 = vmatprep.subr.bf16.mxu0 %v11240_v60  ;;  %4041 = vmatprep.subr.bf16.mxu1 %v11243_v38  ;;  %v11313_v59 = vld [vmem:[#allocation9 + $0x210] ss:$8 sps:$4 sm:$0xff]   ;;  %v11318_v60 = vld [vmem:[#allocation9 + $0x24] ss:$8 sps:$4 sm:$0xff]  }
 0x347   :  { %v11321_v38 = vld [vmem:[#allocation9 + $0x224] ss:$8 sps:$4 sm:$0xff]  }
 0x348   :  { %3823 = vmatpush1.bf16.msra.mxu0 %v11238_v4  ;;  %v11316_v4 = vld [vmem:[#allocation9 + $0x20] ss:$8 sps:$4 sm:$0xff]  }
 0x349   :  { %4042 = vmatpush1.bf16.msra.mxu1 %v11241_v61  ;;  %3824 = vmatprep.subr.bf16.mxu0 %v11246_v62  ;;  %v11319_v61 = vld [vmem:[#allocation9 + $0x220] ss:$8 sps:$4 sm:$0xff]   ;;  %v11324_v62 = vld [vmem:[#allocation9 + $0x34] ss:$8 sps:$4 sm:$0xff]  }
 0x34a   :  { %4043 = vmatprep.subr.bf16.mxu1 %v11249_v28  ;;  %v11325_v28 = vld [vmem:[#allocation9 + $0x230] ss:$8 sps:$4 sm:$0xff]  }
 0x34b   :  { %3802 = vmatmul.mubr.bf16.gmra.mrb[60].mxu0 %v13252_v25  ;;  %4021 = vmatmul.mubr.bf16.gmra.mrb[60].mxu1 %v13252_v25  ;;  %v11267_v25 = vld [vmem:[#allocation4 + $0x52c] ss:$16 sps:$4 sm:$0xff]  }
 0x34c   :  { %3825 = vmatpush1.bf16.msra.mxu0 %v11244_v19  ;;  %3844 = vmatprep.mubr.bf16.mxu0 %v13225_v35  ;;  %v11330_v19 = vld [vmem:[#allocation9 + $0x44] ss:$8 sps:$4 sm:$0xff]  }
 0x34d   :  { %4044 = vmatpush1.bf16.msra.mxu1 %v11247_v55  ;;  %4063 = vmatprep.mubr.bf16.mxu1 %v13225_v35  ;;  %v11273_v35 = vld [vmem:[#allocation4 + $0x54c] ss:$16 sps:$4 sm:$0xff]  }
 0x34e   :  { %3826 = vmatprep.subr.bf16.mxu0 %v11252_v0  ;;  %4045 = vmatprep.subr.bf16.mxu1 %v11255_v1  ;;  %v11333_v55 = vld [vmem:[#allocation9 + $0x244] ss:$8 sps:$4 sm:$0xff]   ;;  %v11328_v0 = vld [vmem:[#allocation9 + $0x40] ss:$8 sps:$4 sm:$0xff]  }
 0x34f   :  { %v11331_v1 = vld [vmem:[#allocation9 + $0x240] ss:$8 sps:$4 sm:$0xff]  }
 0x350   :  { %3827 = vmatpush1.bf16.msra.mxu0 %v11250_v26  ;;  %v11336_v26 = vld [vmem:[#allocation9 + $0x54] ss:$8 sps:$4 sm:$0xff]  }
 0x351   :  { %4046 = vmatpush1.bf16.msra.mxu1 %v11253_v56  ;;  %3828 = vmatprep.subr.bf16.mxu0 %v11258_v2  ;;  %v11337_v56 = vld [vmem:[#allocation9 + $0x250] ss:$8 sps:$4 sm:$0xff]   ;;  %v11342_v2 = vld [vmem:[#allocation9 + $0x64] ss:$8 sps:$4 sm:$0xff]  }
 0x352   :  { %4047 = vmatprep.subr.bf16.mxu1 %v11261_v3  ;;  %v11345_v3 = vld [vmem:[#allocation9 + $0x264] ss:$8 sps:$4 sm:$0xff]  }
 0x354   :  { %3829 = vmatpush1.bf16.msra.mxu0 %v11256_v57  ;;  %v11340_v57 = vld [vmem:[#allocation9 + $0x60] ss:$8 sps:$4 sm:$0xff]  }
 0x355   :  { %4048 = vmatpush1.bf16.msra.mxu1 %v11259_v5  ;;  %3830 = vmatprep.subr.bf16.mxu0 %v11264_v24  ;;  %v11343_v5 = vld [vmem:[#allocation9 + $0x260] ss:$8 sps:$4 sm:$0xff]   ;;  %v11351_v24 = vld [vmem:[#allocation9 + $0x274] ss:$8 sps:$4 sm:$0xff]  }
 0x356   :  { %4049 = vmatprep.subr.bf16.mxu1 %v11267_v25  ;;  %v11349_v25 = vld [vmem:[#allocation9 + $0x270] ss:$8 sps:$4 sm:$0xff]  }
 0x358   :  { %3831 = vmatpush1.bf16.msra.mxu0 %v11262_v20  ;;  %v11354_v20 = vld [vmem:[#allocation9 + $0x84] ss:$8 sps:$4 sm:$0xff]  }
 0x359   :  { %4050 = vmatpush1.bf16.msra.mxu1 %v11265_v6  ;;  %3832 = vmatprep.subr.bf16.mxu0 %v11270_v7  ;;  %v11357_v6 = vld [vmem:[#allocation9 + $0x284] ss:$8 sps:$4 sm:$0xff]   ;;  %v11352_v7 = vld [vmem:[#allocation9 + $0x80] ss:$8 sps:$4 sm:$0xff]  }
 0x35a   :  { %4051 = vmatprep.subr.bf16.mxu1 %v11273_v35  ;;  %v11355_v35 = vld [vmem:[#allocation9 + $0x280] ss:$8 sps:$4 sm:$0xff]  }
 0x35c   :  { %3833 = vmatpush1.bf16.msra.mxu0 %v11268_v11  ;;  %v11360_v11 = vld [vmem:[#allocation9 + $0x94] ss:$8 sps:$4 sm:$0xff]  }
 0x35d   :  { %4052 = vmatpush1.bf16.msra.mxu1 %v11271_v21  ;;  %3834 = vmatprep.subr.bf16.mxu0 %v11276_v52  ;;  %v11363_v21 = vld [vmem:[#allocation9 + $0x294] ss:$8 sps:$4 sm:$0xff]   ;;  %v11358_v52 = vld [vmem:[#allocation9 + $0x90] ss:$8 sps:$4 sm:$0xff]  }
 0x35e   :  { %4053 = vmatprep.subr.bf16.mxu1 %v11279_v47  ;;  %v11366_v47 = vld [vmem:[#allocation9 + $0xa4] ss:$8 sps:$4 sm:$0xff]  }
 0x360   :  { %3835 = vmatpush1.bf16.msra.mxu0 %v11274_v22  ;;  %v11369_v22 = vld [vmem:[#allocation9 + $0x2a4] ss:$8 sps:$4 sm:$0xff]  }
 0x361   :  { %4054 = vmatpush1.bf16.msra.mxu1 %v11277_v29  ;;  %3836 = vmatprep.subr.bf16.mxu0 %v11282_v15  ;;  %v11364_v29 = vld [vmem:[#allocation9 + $0xa0] ss:$8 sps:$4 sm:$0xff]  }
 0x362   :  { %4055 = vmatprep.subr.bf16.mxu1 %v11285_v30  ;;  %v11367_v15 = vld [vmem:[#allocation9 + $0x2a0] ss:$8 sps:$4 sm:$0xff]   ;;  %v11372_v30 = vld [vmem:[#allocation9 + $0xb4] ss:$8 sps:$4 sm:$0xff]  }
 0x364   :  { %3837 = vmatpush1.bf16.msra.mxu0 %v11280_v58  ;;  %v11375_v58 = vld [vmem:[#allocation9 + $0x2b4] ss:$8 sps:$4 sm:$0xff]  }
 0x365   :  { %4056 = vmatpush1.bf16.msra.mxu1 %v11283_v23  ;;  %3838 = vmatprep.subr.bf16.mxu0 %v11288_v31  ;;  %v11370_v23 = vld [vmem:[#allocation9 + $0xb0] ss:$8 sps:$4 sm:$0xff]  }
 0x366   :  { %4057 = vmatprep.subr.bf16.mxu1 %v11291_v32  ;;  %v11373_v31 = vld [vmem:[#allocation9 + $0x2b0] ss:$8 sps:$4 sm:$0xff]   ;;  %v11378_v32 = vld [vmem:[#allocation9 + $0xc4] ss:$8 sps:$4 sm:$0xff]  }
 0x368   :  { %3839 = vmatpush1.bf16.msra.mxu0 %v11286_v17  ;;  %v11381_v17 = vld [vmem:[#allocation9 + $0x2c4] ss:$8 sps:$4 sm:$0xff]  }
 0x369   :  { %4058 = vmatpush1.bf16.msra.mxu1 %v11289_v33  ;;  %3840 = vmatprep.subr.bf16.mxu0 %v11294_v34  ;;  %v11376_v33 = vld [vmem:[#allocation9 + $0xc0] ss:$8 sps:$4 sm:$0xff]  }
 0x36a   :  { %4059 = vmatprep.subr.bf16.mxu1 %v11297_v36  ;;  %v11379_v34 = vld [vmem:[#allocation9 + $0x2c0] ss:$8 sps:$4 sm:$0xff]   ;;  %v11384_v36 = vld [vmem:[#allocation9 + $0xd4] ss:$8 sps:$4 sm:$0xff]  }
 0x36c   :  { %3841 = vmatpush1.bf16.msra.mxu0 %v11292_v40  ;;  %v11387_v40 = vld [vmem:[#allocation9 + $0x2d4] ss:$8 sps:$4 sm:$0xff]  }
 0x36d   :  { %4060 = vmatpush1.bf16.msra.mxu1 %v11295_v41  ;;  %3842 = vmatprep.subr.bf16.mxu0 %v11300_v43  ;;  %v11382_v41 = vld [vmem:[#allocation9 + $0xd0] ss:$8 sps:$4 sm:$0xff]  }
 0x36e   :  { %4061 = vmatprep.subr.bf16.mxu1 %v11303_v46  ;;  %v11385_v43 = vld [vmem:[#allocation9 + $0x2d0] ss:$8 sps:$4 sm:$0xff]   ;;  %v11390_v46 = vld [vmem:[#allocation9 + $0xe4] ss:$8 sps:$4 sm:$0xff]  }
 0x370   :  { %3843 = vmatpush1.bf16.msra.mxu0 %v11298_v45  ;;  %v11393_v45 = vld [vmem:[#allocation9 + $0x2e4] ss:$8 sps:$4 sm:$0xff]  }
 0x371   :  { %4062 = vmatpush1.bf16.msra.mxu1 %v11301_v48  ;;  %4544 = vmatprep.subr.bf16.mxu0 %v11306_v49  ;;  %v11388_v48 = vld [vmem:[#allocation9 + $0xe0] ss:$8 sps:$4 sm:$0xff]  }
 0x372   :  { %5035 = vmatprep.subr.bf16.mxu1 %v11309_v18  ;;  %v11391_v49 = vld [vmem:[#allocation9 + $0x2e0] ss:$8 sps:$4 sm:$0xff]   ;;  %v11396_v18 = vld [vmem:[#allocation9 + $0xf4] ss:$8 sps:$4 sm:$0xff]  }
 0x373   :  { %3845 = vmatmul.mubr.bf16.vlgmr.msra.gmra.mrb[48].mxu0 %v13232_v63 }
 0x374   :  { %4064 = vmatmul.mubr.bf16.vlgmr.msra.gmra.mrb[48].mxu1 %v13232_v63  ;;  %3854 = vmatprep.mubr.bf16.mxu0 %v13243_v14  ;;  %v11327_v63 = vld [vmem:[#allocation9 + $0x234] ss:$8 sps:$4 sm:$0xff]  }
 0x375   :  { %4073 = vmatprep.mubr.bf16.mxu1 %v13243_v14  ;;  %4545 = vmatpush1.bf16.msra.mxu0 %v11304_v27  ;;  %v11322_v14 = vld [vmem:[#allocation9 + $0x30] ss:$8 sps:$4 sm:$0xff]   ;;  %v11399_v27 = vld [vmem:[#allocation9 + $0x2f4] ss:$8 sps:$4 sm:$0xff]  }
 0x376   :  { %5036 = vmatpush1.bf16.msra.mxu1 %v11307_v50  ;;  %4546 = vmatprep.subr.bf16.mxu0 %v11312_v51  ;;  %v11394_v50 = vld [vmem:[#allocation9 + $0xf0] ss:$8 sps:$4 sm:$0xff]  }
 0x377   :  { %5037 = vmatprep.subr.bf16.mxu1 %v11315_v53  ;;  %v11397_v51 = vld [vmem:[#allocation9 + $0x2f0] ss:$8 sps:$4 sm:$0xff]   ;;  %v11402_v53 = vld [vmem:[#allocation9 + $0x104] ss:$8 sps:$4 sm:$0xff]  }
 0x379   :  { %4547 = vmatpush1.bf16.msra.mxu0 %v11310_v54  ;;  %v11405_v54 = vld [vmem:[#allocation9 + $0x304] ss:$8 sps:$4 sm:$0xff]  }
 0x37a   :  { %5038 = vmatpush1.bf16.msra.mxu1 %v11313_v59  ;;  %4548 = vmatprep.subr.bf16.mxu0 %v11318_v60  ;;  %v9429_v59 = vld [vmem:[%s13487_s8 + $0x4] sm:$0xf] }
 0x37b   :  { %3855 = vmatmul.mubr.bf16.gmra.mrb[52].mxu0 %v13250_v16  ;;  %5039 = vmatprep.subr.bf16.mxu1 %v11321_v38  ;;  %v13316_v60 = vrot.slane %v9429_v59, %v12887_v9  ;;  %v13319_v38 = vrot.slane %v9429_v59, %v12889_v10 }
 0x37c   :  { %4074 = vmatmul.mubr.bf16.gmra.mrb[52].mxu1 %v13250_v16  ;;  %3864 = vmatprep.mubr.bf16.mxu0 %v13266_v42  ;;  %v11339_v16 = vld [vmem:[#allocation9 + $0x254] ss:$8 sps:$4 sm:$0xff]  }
 0x37d   :  { %4083 = vmatprep.mubr.bf16.mxu1 %v13266_v42  ;;  %4549 = vmatpush1.bf16.msra.mxu0 %v11316_v4  ;;  %v11334_v42 = vld [vmem:[#allocation9 + $0x50] ss:$8 sps:$4 sm:$0xff]   ;;  %v13322_v4 = vrot.slane %v9429_v59, %v12894_v12 }
 0x37e   :  { %5040 = vmatpush1.bf16.msra.mxu1 %v11319_v61  ;;  %4550 = vmatprep.subr.bf16.mxu0 %v11324_v62  ;;  %v13325_v61 = vrot.slane %v9429_v59, %v12896_v13 }
 0x37f   :  { %5041 = vmatprep.subr.bf16.mxu1 %v11327_v63 }
 0x381   :  { %4551 = vmatpush1.bf16.msra.mxu0 %v11322_v14 }
 0x382   :  { %5042 = vmatpush1.bf16.msra.mxu1 %v11325_v28  ;;  %4552 = vmatprep.subr.bf16.mxu0 %v11330_v19 }
 0x383   :  { %3865 = vmatmul.mubr.bf16.gmra.mrb[56].mxu0 %v13272_v44  ;;  %5043 = vmatprep.subr.bf16.mxu1 %v11333_v55 }
 0x384   :  { %4084 = vmatmul.mubr.bf16.gmra.mrb[56].mxu1 %v13272_v44  ;;  %9626 = vmatprep.mubr.msk.bf16.mxu0 %vm177_vm0, %v13262_v39  ;;  %v11348_v44 = vld [vmem:[#allocation9 + $0x74] ss:$8 sps:$4 sm:$0xff]  }
 0x385   :  { %9632 = vmatprep.mubr.msk.bf16.mxu1 %vm177_vm0, %v13262_v39  ;;  %4553 = vmatpush1.bf16.msra.mxu0 %v11328_v0  ;;  %v11346_v39 = vld [vmem:[#allocation9 + $0x70] ss:$8 sps:$4 sm:$0xff]  }
 0x386   :  { %5044 = vmatpush1.bf16.msra.mxu1 %v11331_v1  ;;  %4554 = vmatprep.subr.bf16.mxu0 %v11336_v26 }
 0x387   :  { %5045 = vmatprep.subr.bf16.mxu1 %v11339_v16 }
 0x389   :  { %4555 = vmatpush1.bf16.msra.mxu0 %v11334_v42 }
 0x38a   :  { %5046 = vmatpush1.bf16.msra.mxu1 %v11337_v56  ;;  %4556 = vmatprep.subr.bf16.mxu0 %v11342_v2 }
 0x38b   :  { %9627 = vmatmul.mubr.msk.bf16.gmra.mrb[60].mxu0 %vm177_vm0, %v13259_v37  ;;  %5047 = vmatprep.subr.bf16.mxu1 %v11345_v3 }
 0x38c   :  { %9633 = vmatmul.mubr.msk.bf16.gmra.mrb[60].mxu1 %vm177_vm0, %v13259_v37  ;;  %v11361_v37 = vld [vmem:[#allocation9 + $0x290] ss:$8 sps:$4 sm:$0xff]  }
 0x38d   :  { %4557 = vmatpush1.bf16.msra.mxu0 %v11340_v57 }
 0x38e   :  { %5048 = vmatpush1.bf16.msra.mxu1 %v11343_v5  ;;  %4558 = vmatprep.subr.bf16.mxu0 %v11348_v44 }
 0x38f   :  { %5049 = vmatprep.subr.bf16.mxu1 %v11351_v24 }
 0x391   :  { %4559 = vmatpush1.bf16.msra.mxu0 %v11346_v39 }
 0x392   :  { %5050 = vmatpush1.bf16.msra.mxu1 %v11349_v25  ;;  %4560 = vmatprep.subr.bf16.mxu0 %v11354_v20 }
 0x393   :  { %5051 = vmatprep.subr.bf16.mxu1 %v11357_v6 }
 0x395   :  { %4561 = vmatpush1.bf16.msra.mxu0 %v11352_v7 }
 0x396   :  { %5052 = vmatpush1.bf16.msra.mxu1 %v11355_v35  ;;  %4562 = vmatprep.subr.bf16.mxu0 %v11360_v11 }
 0x397   :  { %5053 = vmatprep.subr.bf16.mxu1 %v11363_v21 }
 0x399   :  { %4563 = vmatpush1.bf16.msra.mxu0 %v11358_v52 }
 0x39a   :  { %5054 = vmatpush1.bf16.msra.mxu1 %v11361_v37  ;;  %4564 = vmatprep.subr.bf16.mxu0 %v11366_v47 }
 0x39b   :  { %5055 = vmatprep.subr.bf16.mxu1 %v11369_v22 }
 0x39d   :  { %4565 = vmatpush1.bf16.msra.mxu0 %v11364_v29 }
 0x39e   :  { %5056 = vmatpush1.bf16.msra.mxu1 %v11367_v15  ;;  %4566 = vmatprep.subr.bf16.mxu0 %v11372_v30 }
 0x39f   :  { %5057 = vmatprep.subr.bf16.mxu1 %v11375_v58 }
 0x3a1   :  { %4567 = vmatpush1.bf16.msra.mxu0 %v11370_v23 }
 0x3a2   :  { %5058 = vmatpush1.bf16.msra.mxu1 %v11373_v31  ;;  %4568 = vmatprep.subr.bf16.mxu0 %v11378_v32 }
 0x3a3   :  { %5059 = vmatprep.subr.bf16.mxu1 %v11381_v17 }
 0x3a5   :  { %4569 = vmatpush1.bf16.msra.mxu0 %v11376_v33 }
 0x3a6   :  { %5060 = vmatpush1.bf16.msra.mxu1 %v11379_v34  ;;  %4570 = vmatprep.subr.bf16.mxu0 %v11384_v36 }
 0x3a7   :  { %5061 = vmatprep.subr.bf16.mxu1 %v11387_v40 }
 0x3a9   :  { %4571 = vmatpush1.bf16.msra.mxu0 %v11382_v41 }
 0x3aa   :  { %5062 = vmatpush1.bf16.msra.mxu1 %v11385_v43  ;;  %4572 = vmatprep.subr.bf16.mxu0 %v11390_v46 }
 0x3ab   :  { %5063 = vmatprep.subr.bf16.mxu1 %v11393_v45 }
 0x3ad   :  { %4573 = vmatpush1.bf16.msra.mxu0 %v11388_v48 }
 0x3ae   :  { %5064 = vmatpush1.bf16.msra.mxu1 %v11391_v49  ;;  %4574 = vmatprep.subr.bf16.mxu0 %v11396_v18 }
 0x3af   :  { %5065 = vmatprep.subr.bf16.mxu1 %v11399_v27 }
 0x3b1   :  { %4575 = vmatpush1.bf16.msra.mxu0 %v11394_v50 }
 0x3b2   :  { %5066 = vmatpush1.bf16.msra.mxu1 %v11397_v51  ;;  %4597 = vmatprep.subr.bf16.mxu0 %v11402_v53 }
 0x3b3   :  { %5088 = vmatprep.subr.bf16.mxu1 %v11405_v54 }
 0x446   :  { %v3846_v62 = vpop.f32.mrb[48].mxu0 }
 0x447   :  { %v10364_v63 = vadd.f32 %v3846_v62, %v13316_v60  ;;  %v4065_v14 = vpop.f32.mrb[48].mxu1  ;;  %v3848_v28 = vpop.f32.mrb[49].mxu0 }
 0x448   :  { %v10380_v19 = vadd.f32 %v4065_v14, %v13319_v38  ;;  %v10365_v55 = vadd.f32 %v3848_v28, %v13322_v4  ;;  %v4067_v0 = vpop.f32.mrb[49].mxu1  ;;  %v3850_v1 = vpop.f32.mrb[50].mxu0 }
 0x449   :  { %v10381_v26 = vadd.f32 %v4067_v0, %v13325_v61  ;;  %v10366_v16 = vadd.f32 %v3850_v1, %v13316_v60  ;;  %v4069_v42 = vpop.f32.mrb[50].mxu1  ;;  %v3852_v56 = vpop.f32.mrb[51].mxu0  ;;  %v4104_v5 = vmax.f32 %v10364_v63, 0.0 }
 0x44a   :  { %v10382_v2 = vadd.f32 %v4069_v42, %v13319_v38  ;;  %v10367_v3 = vadd.f32 %v3852_v56, %v13322_v4  ;;  %v4071_v57 = vpop.f32.mrb[51].mxu1  ;;  %v4106_v39 = vmax.f32 %v10380_v19, 0.0  ;;  %v4105_v25 = vmax.f32 %v10365_v55, 0.0 }
 0x44b   :  { %v4108_v44 = vmax.f32 %v10366_v16, 0.0  ;;  %v10383_v24 = vadd.f32 %v4071_v57, %v13325_v61  ;;  %v4107_v7 = vmax.f32 %v10381_v26, 0.0 }
 0x44c   :  { %v4110_v20 = vmax.f32 %v10382_v2, 0.0  ;;  %v4109_v6 = vmax.f32 %v10367_v3, 0.0  ;;  %v11400_v2 = vld [vmem:[#allocation9 + $0x100] ss:$8 sps:$4 sm:$0xff]  }
 0x44d   :  { %v4136_v35 = vmax.f32 %v4104_v5, %v4108_v44  ;;  %v4111_v11 = vmax.f32 %v10383_v24, 0.0  ;;  %v11403_v3 = vld [vmem:[#allocation9 + $0x300] ss:$8 sps:$4 sm:$0xff]  }
 0x44e   :  { %v4138_v21 = vmax.f32 %v4106_v39, %v4110_v20  ;;  %v4137_v52 = vmax.f32 %v4105_v25, %v4109_v6  ;;  %v3856_v37 = vpop.f32.mrb[52].mxu0  ;;  %v11408_v39 = vld [vmem:[#allocation9 + $0x114] ss:$8 sps:$4 sm:$0xff]  }
 0x44f   :  { %v4139_v47 = vmax.f32 %v4107_v7, %v4111_v11  ;;  %v10368_v22 = vadd.f32 %v3856_v37, %v13316_v60  ;;  %v4075_v29 = vpop.f32.mrb[52].mxu1  ;;  %v3858_v15 = vpop.f32.mrb[53].mxu0  ;;  %v11411_v25 = vld [vmem:[#allocation9 + $0x314] ss:$8 sps:$4 sm:$0xff]   ;;  %v11406_v37 = vld [vmem:[#allocation9 + $0x110] ss:$8 sps:$4 sm:$0xff]  }
 0x450   :  { %v10384_v30 = vadd.f32 %v4075_v29, %v13319_v38  ;;  %v10369_v58 = vadd.f32 %v3858_v15, %v13322_v4  ;;  %v4077_v23 = vpop.f32.mrb[53].mxu1  ;;  %v3860_v31 = vpop.f32.mrb[54].mxu0 }
 0x451   :  { %v10385_v32 = vadd.f32 %v4077_v23, %v13325_v61  ;;  %v10370_v17 = vadd.f32 %v3860_v31, %v13316_v60  ;;  %v4079_v33 = vpop.f32.mrb[54].mxu1  ;;  %v3862_v34 = vpop.f32.mrb[55].mxu0  ;;  %v4112_v43 = vmax.f32 %v10368_v22, 0.0 }
 0x452   :  { %v10386_v36 = vadd.f32 %v4079_v33, %v13319_v38  ;;  %v10371_v40 = vadd.f32 %v3862_v34, %v13322_v4  ;;  %v4081_v41 = vpop.f32.mrb[55].mxu1  ;;  %v4114_v48 = vmax.f32 %v10384_v30, 0.0  ;;  %v4113_v49 = vmax.f32 %v10369_v58, 0.0 }
 0x453   :  { %v4116_v46 = vmax.f32 %v10370_v17, 0.0  ;;  %v10387_v45 = vadd.f32 %v4081_v41, %v13325_v61  ;;  %v4115_v50 = vmax.f32 %v10385_v32, 0.0  ;;  %v11414_v32 = vld [vmem:[#allocation9 + $0x124] ss:$8 sps:$4 sm:$0xff]  }
 0x454   :  { %v4118_v18 = vmax.f32 %v10386_v36, 0.0  ;;  %v4117_v27 = vmax.f32 %v10371_v40, 0.0  ;;  %v11417_v17 = vld [vmem:[#allocation9 + $0x324] ss:$8 sps:$4 sm:$0xff]  }
 0x455   :  { %v4140_v51 = vmax.f32 %v4112_v43, %v4116_v46  ;;  %v4119_v53 = vmax.f32 %v10387_v45, 0.0 }
 0x456   :  { %v4142_v54 = vmax.f32 %v4114_v48, %v4118_v18  ;;  %v4141_v59 = vmax.f32 %v4113_v49, %v4117_v27  ;;  %v3866_v62 = vpop.f32.mrb[56].mxu0  ;;  %v11412_v27 = vld [vmem:[#allocation9 + $0x120] ss:$8 sps:$4 sm:$0xff]  }
 0x457   :  { %v4152_v63 = vpack.c.bf16 %v4140_v51, %v4136_v35  ;;  %v4143_v14 = vmax.f32 %v4115_v50, %v4119_v53  ;;  %v10372_v28 = vadd.f32 %v3866_v62, %v13316_v60  ;;  %v4085_v19 = vpop.f32.mrb[56].mxu1  ;;  %v3868_v55 = vpop.f32.mrb[57].mxu0  ;;  %v11415_v50 = vld [vmem:[#allocation9 + $0x320] ss:$8 sps:$4 sm:$0xff]   ;;  %v11420_v62 = vld [vmem:[#allocation9 + $0x134] ss:$8 sps:$4 sm:$0xff]  }
 0x458   :  { %v13344_v0 = vpack.c.bf16 %v4142_v54, %v4138_v21  ;;  %v10388_v1 = vadd.f32 %v4085_v19, %v13319_v38  ;;  %v10373_v26 = vadd.f32 %v3868_v55, %v13322_v4  ;;  %v4087_v16 = vpop.f32.mrb[57].mxu1  ;;  %v3870_v42 = vpop.f32.mrb[58].mxu0  ;;  %v4153_v56 = vpack.c.bf16 %v4141_v59, %v4137_v52 }
 0x459   :  { %v10389_v57 = vadd.f32 %v4087_v16, %v13325_v61  ;;  %v10374_v5 = vadd.f32 %v3870_v42, %v13316_v60  ;;  %v4089_v44 = vpop.f32.mrb[58].mxu1  ;;  %v3872_v24 = vpop.f32.mrb[59].mxu0  ;;  %v13350_v20 = vpack.c.bf16 %v4143_v14, %v4139_v47  ;;  %v4120_v11 = vmax.f32 %v10372_v28, 0.0  ;;  %v11409_v47 = vld [vmem:[#allocation9 + $0x310] ss:$8 sps:$4 sm:$0xff]  }
 0x45a   :  { %v10390_v6 = vadd.f32 %v4089_v44, %v13319_v38  ;;  %v10375_v7 = vadd.f32 %v3872_v24, %v13322_v4  ;;  %v4091_v35 = vpop.f32.mrb[59].mxu1  ;;  %4576 = vmatprep.mubr.bf16.mxu0 %v4153_v56  ;;  %5067 = vmatprep.mubr.bf16.mxu1 %v4153_v56  ;;  %v4122_v22 = vmax.f32 %v10388_v1, 0.0  ;;  %v4121_v29 = vmax.f32 %v10373_v26, 0.0  ;;  %v11418_v16 = vld [vmem:[#allocation9 + $0x130] ss:$8 sps:$4 sm:$0xff]  }
 0x45b   :  { %v4124_v21 = vmax.f32 %v10374_v5, 0.0  ;;  %v10391_v52 = vadd.f32 %v4091_v35, %v13325_v61  ;;  %4577 = vmatmul.mubr.bf16.vlgmr.msra.gmra.mrb[64].mxu0 %v4152_v63  ;;  %5068 = vmatmul.mubr.bf16.vlgmr.msra.gmra.mrb[64].mxu1 %v4152_v63  ;;  %v4123_v58 = vmax.f32 %v10389_v57, 0.0  ;;  %v11423_v63 = vld [vmem:[#allocation9 + $0x334] ss:$8 sps:$4 sm:$0xff]   ;;  %v11427_v35 = vld [vmem:[#allocation9 + $0x340] ss:$8 sps:$4 sm:$0xff]  }
 0x45c   :  { %v4126_v15 = vmax.f32 %v10390_v6, 0.0  ;;  %v4125_v30 = vmax.f32 %v10375_v7, 0.0  ;;  %4598 = vmatpush1.bf16.msra.mxu0 %v11400_v2  ;;  %5089 = vmatpush1.bf16.msra.mxu1 %v11403_v3  ;;  %v11421_v3 = vld [vmem:[#allocation9 + $0x330] ss:$8 sps:$4 sm:$0xff]   ;;  %v11424_v7 = vld [vmem:[#allocation9 + $0x140] ss:$8 sps:$4 sm:$0xff]  }
 0x45d   :  { %v4144_v23 = vmax.f32 %v4120_v11, %v4124_v21  ;;  %v4127_v31 = vmax.f32 %v10391_v52, 0.0  ;;  %4599 = vmatprep.subr.bf16.mxu0 %v11408_v39  ;;  %5090 = vmatprep.subr.bf16.mxu1 %v11411_v25  ;;  %v11432_v52 = vld [vmem:[#allocation9 + $0x154] ss:$8 sps:$4 sm:$0xff]  }
 0x45e   :  { %v4146_v33 = vmax.f32 %v4122_v22, %v4126_v15  ;;  %v4145_v34 = vmax.f32 %v4121_v29, %v4125_v30  ;;  %v3876_v36 = vpop.f32.mrb[60].mxu0  ;;  %v11430_v22 = vld [vmem:[#allocation9 + $0x150] ss:$8 sps:$4 sm:$0xff]   ;;  %v11438_v15 = vld [vmem:[#allocation9 + $0x164] ss:$8 sps:$4 sm:$0xff]  }
 0x45f   :  { %v4147_v40 = vmax.f32 %v4123_v58, %v4127_v31  ;;  %v10376_v41 = vadd.f32 %v3876_v36, %v13316_v60  ;;  %v4095_v43 = vpop.f32.mrb[60].mxu1  ;;  %v3878_v46 = vpop.f32.mrb[61].mxu0  ;;  %v11433_v29 = vld [vmem:[#allocation9 + $0x350] ss:$8 sps:$4 sm:$0xff]   ;;  %v11441_v30 = vld [vmem:[#allocation9 + $0x364] ss:$8 sps:$4 sm:$0xff]  }
 0x460   :  { %v10392_v45 = vadd.f32 %v4095_v43, %v13319_v38  ;;  %v10377_v48 = vadd.f32 %v3878_v46, %v13322_v4  ;;  %v4097_v49 = vpop.f32.mrb[61].mxu1  ;;  %4600 = vmatpush1.bf16.msra.mxu0 %v11406_v37  ;;  %5091 = vmatpush1.bf16.msra.mxu1 %v11409_v47  ;;  %v3880_v18 = vpop.f32.mrb[62].mxu0  ;;  %v11435_v37 = vld [vmem:[#allocation9 + $0x354] ss:$8 sps:$4 sm:$0xff]   ;;  %v11436_v47 = vld [vmem:[#allocation9 + $0x160] ss:$8 sps:$4 sm:$0xff]  }
 0x461   :  { %v10393_v51 = vadd.f32 %v4097_v49, %v13325_v61  ;;  %v10378_v53 = vadd.f32 %v3880_v18, %v13316_v60  ;;  %v4099_v54 = vpop.f32.mrb[62].mxu1  ;;  %v3882_v59 = vpop.f32.mrb[63].mxu0  ;;  %4601 = vmatprep.subr.bf16.mxu0 %v11414_v32  ;;  %5092 = vmatprep.subr.bf16.mxu1 %v11417_v17  ;;  %v4128_v55 = vmax.f32 %v10376_v41, 0.0  ;;  %v11439_v58 = vld [vmem:[#allocation9 + $0x360] ss:$8 sps:$4 sm:$0xff]  }
 0x462   :  { %v10394_v14 = vadd.f32 %v4099_v54, %v13319_v38  ;;  %v10379_v28 = vadd.f32 %v3882_v59, %v13322_v4  ;;  %v4101_v19 = vpop.f32.mrb[63].mxu1  ;;  %v4130_v42 = vmax.f32 %v10392_v45, 0.0  ;;  %v4129_v56 = vmax.f32 %v10377_v48, 0.0  ;;  %v11426_v38 = vld [vmem:[#allocation9 + $0x144] ss:$8 sps:$4 sm:$0xff]  }
 0x463   :  { %v4132_v1 = vmax.f32 %v10378_v53, 0.0  ;;  %v10395_v26 = vadd.f32 %v4101_v19, %v13325_v61  ;;  %v4131_v57 = vmax.f32 %v10393_v51, 0.0  ;;  %v11429_v4 = vld [vmem:[#allocation9 + $0x344] ss:$8 sps:$4 sm:$0xff]   ;;  %v11447_v31 = vld [vmem:[#allocation9 + $0x374] ss:$8 sps:$4 sm:$0xff]  }
 0x464   :  { %v4134_v2 = vmax.f32 %v10394_v14, 0.0  ;;  %v4133_v60 = vmax.f32 %v10379_v28, 0.0  ;;  %4602 = vmatpush1.bf16.msra.mxu0 %v11412_v27  ;;  %5093 = vmatpush1.bf16.msra.mxu1 %v11415_v50  ;;  %v11442_v32 = vld [vmem:[#allocation9 + $0x170] ss:$8 sps:$4 sm:$0xff]   ;;  %v11451_v36 = vld [vmem:[#allocation9 + $0x380] ss:$8 sps:$4 sm:$0xff]  }
 0x465   :  { %v4148_v5 = vmax.f32 %v4128_v55, %v4132_v1  ;;  %v4135_v44 = vmax.f32 %v10395_v26, 0.0  ;;  %4603 = vmatprep.subr.bf16.mxu0 %v11420_v62  ;;  %5094 = vmatprep.subr.bf16.mxu1 %v11423_v63  ;;  %v11445_v17 = vld [vmem:[#allocation9 + $0x370] ss:$8 sps:$4 sm:$0xff]   ;;  %v11459_v41 = vld [vmem:[#allocation9 + $0x394] ss:$8 sps:$4 sm:$0xff]  }
 0x466   :  { %v4150_v24 = vmax.f32 %v4130_v42, %v4134_v2  ;;  %v4149_v39 = vmax.f32 %v4129_v56, %v4133_v60  ;;  %v11454_v43 = vld [vmem:[#allocation9 + $0x190] ss:$8 sps:$4 sm:$0xff]   ;;  %v11462_v45 = vld [vmem:[#allocation9 + $0x1a4] ss:$8 sps:$4 sm:$0xff]   ;;  %v11460_v49 = vld [vmem:[#allocation9 + $0x1a0] ss:$8 sps:$4 sm:$0xff]  }
 0x467   :  { %v4151_v25 = vmax.f32 %v4131_v57, %v4135_v44  ;;  %v4156_v6 = vpack.c.bf16 %v4148_v5, %v4144_v23  ;;  %v11444_v23 = vld [vmem:[#allocation9 + $0x174] ss:$8 sps:$4 sm:$0xff]   ;;  %v11457_v46 = vld [vmem:[#allocation9 + $0x390] ss:$8 sps:$4 sm:$0xff]   ;;  %v11465_v48 = vld [vmem:[#allocation9 + $0x3a4] ss:$8 sps:$4 sm:$0xff]  }
 0x468   :  { %4604 = vmatpush1.bf16.msra.mxu0 %v11418_v16  ;;  %5095 = vmatpush1.bf16.msra.mxu1 %v11421_v3  ;;  %v4157_v61 = vpack.c.bf16 %v4149_v39, %v4145_v34  ;;  %v13363_v11 = vpack.c.bf16 %v4150_v24, %v4146_v33  ;;  %v11450_v33 = vld [vmem:[#allocation9 + $0x184] ss:$8 sps:$4 sm:$0xff]   ;;  %v11448_v34 = vld [vmem:[#allocation9 + $0x180] ss:$8 sps:$4 sm:$0xff]   ;;  %v11468_v27 = vld [vmem:[#allocation9 + $0x1b4] ss:$8 sps:$4 sm:$0xff]  }
 0x469   :  { %4605 = vmatprep.subr.bf16.mxu0 %v11426_v38  ;;  %5096 = vmatprep.subr.bf16.mxu1 %v11429_v4  ;;  %v13365_v21 = vpack.c.bf16 %v4151_v25, %v4147_v40  ;;  %v11456_v40 = vld [vmem:[#allocation9 + $0x194] ss:$8 sps:$4 sm:$0xff]   ;;  %v11463_v18 = vld [vmem:[#allocation9 + $0x3a0] ss:$8 sps:$4 sm:$0xff]   ;;  %v11466_v51 = vld [vmem:[#allocation9 + $0x1b0] ss:$8 sps:$4 sm:$0xff]  }
 0x46a   :  { %4586 = vmatprep.mubr.bf16.mxu0 %v4157_v61  ;;  %5077 = vmatprep.mubr.bf16.mxu1 %v4157_v61  ;;  %v11471_v50 = vld [vmem:[#allocation9 + $0x3b4] ss:$8 sps:$4 sm:$0xff]   ;;  %v11469_v53 = vld [vmem:[#allocation9 + $0x3b0] ss:$8 sps:$4 sm:$0xff]   ;;  %v11474_v54 = vld [vmem:[#allocation9 + $0x1c4] ss:$8 sps:$4 sm:$0xff]  }
 0x46b   :  { %4587 = vmatmul.mubr.bf16.gmra.mrb[68].mxu0 %v4156_v6  ;;  %5078 = vmatmul.mubr.bf16.gmra.mrb[68].mxu1 %v4156_v6  ;;  %v11477_v59 = vld [vmem:[#allocation9 + $0x3c4] ss:$8 sps:$4 sm:$0xff]   ;;  %v11472_v62 = vld [vmem:[#allocation9 + $0x1c0] ss:$8 sps:$4 sm:$0xff]   ;;  %v11480_v14 = vld [vmem:[#allocation9 + $0x1d4] ss:$8 sps:$4 sm:$0xff]  }
 0x46c   :  { %4606 = vmatpush1.bf16.msra.mxu0 %v11424_v7  ;;  %5097 = vmatpush1.bf16.msra.mxu1 %v11427_v35  ;;  %v11475_v63 = vld [vmem:[#allocation9 + $0x3c0] ss:$8 sps:$4 sm:$0xff]   ;;  %v11483_v28 = vld [vmem:[#allocation9 + $0x3d4] ss:$8 sps:$4 sm:$0xff]   ;;  %v11478_v19 = vld [vmem:[#allocation9 + $0x1d0] ss:$8 sps:$4 sm:$0xff]  }
 0x46d   :  { %4629 = vmatprep.mubr.bf16.mxu0 %v13350_v20  ;;  %5120 = vmatprep.mubr.bf16.mxu1 %v13350_v20  ;;  %v11453_v20 = vld [vmem:[#allocation9 + $0x384] ss:$8 sps:$4 sm:$0xff]   ;;  %v11481_v55 = vld [vmem:[#allocation9 + $0x3d0] ss:$8 sps:$4 sm:$0xff]   ;;  %v11484_v16 = vld [vmem:[#allocation9 + $0x1e0] ss:$8 sps:$4 sm:$0xff]  }
 0x46e   :  { %4607 = vmatprep.subr.bf16.mxu0 %v11432_v52  ;;  %5098 = vmatprep.subr.bf16.mxu1 %v11435_v37  ;;  %v11486_v1 = vld [vmem:[#allocation9 + $0x1e4] ss:$8 sps:$4 sm:$0xff]   ;;  %v11487_v42 = vld [vmem:[#allocation9 + $0x3e0] ss:$8 sps:$4 sm:$0xff]   ;;  %v11492_v56 = vld [vmem:[#allocation9 + $0x1f4] ss:$8 sps:$4 sm:$0xff]  }
 0x46f   :  { %v11489_v26 = vld [vmem:[#allocation9 + $0x3e4] ss:$8 sps:$4 sm:$0xff]   ;;  %v11495_v2 = vld [vmem:[#allocation9 + $0x3f4] ss:$8 sps:$4 sm:$0xff]   ;;  %v11490_v60 = vld [vmem:[#allocation9 + $0x1f0] ss:$8 sps:$4 sm:$0xff]  }
 0x470   :  { %4608 = vmatpush1.bf16.msra.mxu0 %v11430_v22  ;;  %5099 = vmatpush1.bf16.msra.mxu1 %v11433_v29  ;;  %v11493_v3 = vld [vmem:[#allocation9 + $0x3f0] ss:$8 sps:$4 sm:$0xff]   ;;  %v11498_v57 = vld [vmem:[#allocation6 + $0x4] ss:$16 sps:$4 sm:$0xff]   ;;  %v11501_v5 = vld [vmem:[#allocation6 + $0xc] ss:$16 sps:$4 sm:$0xff]  }
 0x471   :  { %4609 = vmatprep.subr.bf16.mxu0 %v11438_v15  ;;  %5100 = vmatprep.subr.bf16.mxu1 %v11441_v30  ;;  %v11496_v44 = vld [vmem:[#allocation6] ss:$16 sps:$4 sm:$0xff]   ;;  %v11499_v38 = vld [vmem:[#allocation6 + $0x8] ss:$16 sps:$4 sm:$0xff]   ;;  %v11504_v4 = vld [vmem:[#allocation6 + $0x24] ss:$16 sps:$4 sm:$0xff]  }
 0x472   :  { %v11507_v24 = vld [vmem:[#allocation6 + $0x2c] ss:$16 sps:$4 sm:$0xff]   ;;  %v11502_v39 = vld [vmem:[#allocation6 + $0x20] ss:$16 sps:$4 sm:$0xff]   ;;  %v11505_v25 = vld [vmem:[#allocation6 + $0x28] ss:$16 sps:$4 sm:$0xff]  }
 0x473   :  { %v11510_v6 = vld [vmem:[#allocation6 + $0x44] ss:$16 sps:$4 sm:$0xff]   ;;  %v11513_v61 = vld [vmem:[#allocation6 + $0x4c] ss:$16 sps:$4 sm:$0xff]   ;;  %v11508_v7 = vld [vmem:[#allocation6 + $0x40] ss:$16 sps:$4 sm:$0xff]  }
 0x474   :  { %4610 = vmatpush1.bf16.msra.mxu0 %v11436_v47  ;;  %5101 = vmatpush1.bf16.msra.mxu1 %v11439_v58  ;;  %v11511_v35 = vld [vmem:[#allocation6 + $0x48] ss:$16 sps:$4 sm:$0xff]   ;;  %v11516_v52 = vld [vmem:[#allocation6 + $0x64] ss:$16 sps:$4 sm:$0xff]   ;;  %v11525_v29 = vld [vmem:[#allocation6 + $0x8c] ss:$16 sps:$4 sm:$0xff]  }
 0x475   :  { %4611 = vmatprep.subr.bf16.mxu0 %v11444_v23  ;;  %5102 = vmatprep.subr.bf16.mxu1 %v11447_v31  ;;  %v11517_v37 = vld [vmem:[#allocation6 + $0x68] ss:$16 sps:$4 sm:$0xff]   ;;  %v11522_v22 = vld [vmem:[#allocation6 + $0x84] ss:$16 sps:$4 sm:$0xff]   ;;  %v11520_v15 = vld [vmem:[#allocation6 + $0x80] ss:$16 sps:$4 sm:$0xff]  }
 0x476   :  { %v11523_v30 = vld [vmem:[#allocation6 + $0x88] ss:$16 sps:$4 sm:$0xff]   ;;  %v11528_v47 = vld [vmem:[#allocation6 + $0xa4] ss:$16 sps:$4 sm:$0xff]   ;;  %v11531_v58 = vld [vmem:[#allocation6 + $0xac] ss:$16 sps:$4 sm:$0xff]  }
 0x477   :  { %v11526_v23 = vld [vmem:[#allocation6 + $0xa0] ss:$16 sps:$4 sm:$0xff]   ;;  %v11534_v31 = vld [vmem:[#allocation6 + $0xc4] ss:$16 sps:$4 sm:$0xff]  }
 0x478   :  { %4612 = vmatpush1.bf16.msra.mxu0 %v11442_v32  ;;  %5103 = vmatpush1.bf16.msra.mxu1 %v11445_v17  ;;  %v11537_v32 = vld [vmem:[#allocation6 + $0xcc] ss:$16 sps:$4 sm:$0xff]   ;;  %v11532_v17 = vld [vmem:[#allocation6 + $0xc0] ss:$16 sps:$4 sm:$0xff]  }
 0x479   :  { %4613 = vmatprep.subr.bf16.mxu0 %v11450_v33  ;;  %5104 = vmatprep.subr.bf16.mxu1 %v11453_v20  ;;  %v11535_v33 = vld [vmem:[#allocation6 + $0xc8] ss:$16 sps:$4 sm:$0xff]   ;;  %v11540_v20 = vld [vmem:[#allocation6 + $0xe4] ss:$16 sps:$4 sm:$0xff]  }
 0x47c   :  { %4614 = vmatpush1.bf16.msra.mxu0 %v11448_v34  ;;  %5105 = vmatpush1.bf16.msra.mxu1 %v11451_v36  ;;  %v11543_v34 = vld [vmem:[#allocation6 + $0xec] ss:$16 sps:$4 sm:$0xff]   ;;  %v11538_v36 = vld [vmem:[#allocation6 + $0xe0] ss:$16 sps:$4 sm:$0xff]  }
 0x47d   :  { %4615 = vmatprep.subr.bf16.mxu0 %v11456_v40  ;;  %5106 = vmatprep.subr.bf16.mxu1 %v11459_v41  ;;  %v11541_v40 = vld [vmem:[#allocation6 + $0xe8] ss:$16 sps:$4 sm:$0xff]   ;;  %v11546_v41 = vld [vmem:[#allocation6 + $0x104] ss:$16 sps:$4 sm:$0xff]  }
 0x480   :  { %4616 = vmatpush1.bf16.msra.mxu0 %v11454_v43  ;;  %5107 = vmatpush1.bf16.msra.mxu1 %v11457_v46  ;;  %v11549_v43 = vld [vmem:[#allocation6 + $0x10c] ss:$16 sps:$4 sm:$0xff]   ;;  %v11544_v46 = vld [vmem:[#allocation6 + $0x100] ss:$16 sps:$4 sm:$0xff]  }
 0x481   :  { %4617 = vmatprep.subr.bf16.mxu0 %v11462_v45  ;;  %5108 = vmatprep.subr.bf16.mxu1 %v11465_v48  ;;  %v11547_v45 = vld [vmem:[#allocation6 + $0x108] ss:$16 sps:$4 sm:$0xff]   ;;  %v11552_v48 = vld [vmem:[#allocation6 + $0x124] ss:$16 sps:$4 sm:$0xff]  }
 0x484   :  { %4618 = vmatpush1.bf16.msra.mxu0 %v11460_v49  ;;  %5109 = vmatpush1.bf16.msra.mxu1 %v11463_v18  ;;  %v11555_v49 = vld [vmem:[#allocation6 + $0x12c] ss:$16 sps:$4 sm:$0xff]   ;;  %v11550_v18 = vld [vmem:[#allocation6 + $0x120] ss:$16 sps:$4 sm:$0xff]  }
 0x485   :  { %4619 = vmatprep.subr.bf16.mxu0 %v11468_v27  ;;  %5110 = vmatprep.subr.bf16.mxu1 %v11471_v50  ;;  %v11553_v27 = vld [vmem:[#allocation6 + $0x128] ss:$16 sps:$4 sm:$0xff]   ;;  %v11558_v50 = vld [vmem:[#allocation6 + $0x144] ss:$16 sps:$4 sm:$0xff]  }
 0x488   :  { %4620 = vmatpush1.bf16.msra.mxu0 %v11466_v51  ;;  %5111 = vmatpush1.bf16.msra.mxu1 %v11469_v53  ;;  %v11561_v51 = vld [vmem:[#allocation6 + $0x14c] ss:$16 sps:$4 sm:$0xff]   ;;  %v11556_v53 = vld [vmem:[#allocation6 + $0x140] ss:$16 sps:$4 sm:$0xff]  }
 0x489   :  { %4621 = vmatprep.subr.bf16.mxu0 %v11474_v54  ;;  %5112 = vmatprep.subr.bf16.mxu1 %v11477_v59  ;;  %v11559_v54 = vld [vmem:[#allocation6 + $0x148] ss:$16 sps:$4 sm:$0xff]   ;;  %v11564_v59 = vld [vmem:[#allocation6 + $0x164] ss:$16 sps:$4 sm:$0xff]  }
 0x48c   :  { %4622 = vmatpush1.bf16.msra.mxu0 %v11472_v62  ;;  %5113 = vmatpush1.bf16.msra.mxu1 %v11475_v63  ;;  %v11567_v62 = vld [vmem:[#allocation6 + $0x16c] ss:$16 sps:$4 sm:$0xff]   ;;  %v11562_v63 = vld [vmem:[#allocation6 + $0x160] ss:$16 sps:$4 sm:$0xff]  }
 0x48d   :  { %4623 = vmatprep.subr.bf16.mxu0 %v11480_v14  ;;  %5114 = vmatprep.subr.bf16.mxu1 %v11483_v28  ;;  %v11565_v14 = vld [vmem:[#allocation6 + $0x168] ss:$16 sps:$4 sm:$0xff]   ;;  %v11570_v28 = vld [vmem:[#allocation6 + $0x184] ss:$16 sps:$4 sm:$0xff]  }
 0x490   :  { %4624 = vmatpush1.bf16.msra.mxu0 %v11478_v19  ;;  %5115 = vmatpush1.bf16.msra.mxu1 %v11481_v55  ;;  %v11573_v19 = vld [vmem:[#allocation6 + $0x18c] ss:$16 sps:$4 sm:$0xff]   ;;  %v11568_v55 = vld [vmem:[#allocation6 + $0x180] ss:$16 sps:$4 sm:$0xff]  }
 0x491   :  { %4625 = vmatprep.subr.bf16.mxu0 %v11486_v1  ;;  %5116 = vmatprep.subr.bf16.mxu1 %v11489_v26  ;;  %v11571_v1 = vld [vmem:[#allocation6 + $0x188] ss:$16 sps:$4 sm:$0xff]   ;;  %v11576_v26 = vld [vmem:[#allocation6 + $0x1a4] ss:$16 sps:$4 sm:$0xff]  }
 0x494   :  { %4626 = vmatpush1.bf16.msra.mxu0 %v11484_v16  ;;  %5117 = vmatpush1.bf16.msra.mxu1 %v11487_v42  ;;  %v11579_v16 = vld [vmem:[#allocation6 + $0x1ac] ss:$16 sps:$4 sm:$0xff]   ;;  %v11574_v42 = vld [vmem:[#allocation6 + $0x1a0] ss:$16 sps:$4 sm:$0xff]  }
 0x495   :  { %4627 = vmatprep.subr.bf16.mxu0 %v11492_v56  ;;  %5118 = vmatprep.subr.bf16.mxu1 %v11495_v2  ;;  %v11577_v56 = vld [vmem:[#allocation6 + $0x1a8] ss:$16 sps:$4 sm:$0xff]   ;;  %v11582_v2 = vld [vmem:[#allocation6 + $0x1c4] ss:$16 sps:$4 sm:$0xff]  }
 0x498   :  { %4628 = vmatpush1.bf16.msra.mxu0 %v11490_v60  ;;  %5119 = vmatpush1.bf16.msra.mxu1 %v11493_v3  ;;  %v11585_v60 = vld [vmem:[#allocation6 + $0x1cc] ss:$16 sps:$4 sm:$0xff]   ;;  %v11580_v3 = vld [vmem:[#allocation6 + $0x1c0] ss:$16 sps:$4 sm:$0xff]  }
 0x499   :  { %6352 = vmatprep.subr.bf16.mxu0 %v11498_v57  ;;  %6511 = vmatprep.subr.bf16.mxu1 %v11501_v5  ;;  %v11583_v57 = vld [vmem:[#allocation6 + $0x1c8] ss:$16 sps:$4 sm:$0xff]   ;;  %v11588_v5 = vld [vmem:[#allocation6 + $0x1e4] ss:$16 sps:$4 sm:$0xff]  }
 0x49b   :  { %4630 = vmatmul.mubr.bf16.vlgmr.msra.gmra.mrb[64].mxu0 %v13344_v0  ;;  %5121 = vmatmul.mubr.bf16.vlgmr.msra.gmra.mrb[64].mxu1 %v13344_v0  ;;  %v11519_v0 = vld [vmem:[#allocation6 + $0x6c] ss:$16 sps:$4 sm:$0xff]  }
 0x49c   :  { %4639 = vmatprep.mubr.bf16.mxu0 %v13365_v21  ;;  %5130 = vmatprep.mubr.bf16.mxu1 %v13365_v21  ;;  %v11514_v21 = vld [vmem:[#allocation6 + $0x60] ss:$16 sps:$4 sm:$0xff]  }
 0x49d   :  { %6353 = vmatpush1.bf16.msra.mxu0 %v11496_v44  ;;  %6512 = vmatpush1.bf16.msra.mxu1 %v11499_v38  ;;  %v11591_v44 = vld [vmem:[#allocation6 + $0x1ec] ss:$16 sps:$4 sm:$0xff]   ;;  %v11586_v38 = vld [vmem:[#allocation6 + $0x1e0] ss:$16 sps:$4 sm:$0xff]  }
 0x49e   :  { %6354 = vmatprep.subr.bf16.mxu0 %v11504_v4  ;;  %6513 = vmatprep.subr.bf16.mxu1 %v11507_v24  ;;  %v11589_v4 = vld [vmem:[#allocation6 + $0x1e8] ss:$16 sps:$4 sm:$0xff]   ;;  %v11594_v24 = vld [vmem:[#allocation6 + $0x204] ss:$16 sps:$4 sm:$0xff]  }
 0x4a1   :  { %6355 = vmatpush1.bf16.msra.mxu0 %v11502_v39  ;;  %6514 = vmatpush1.bf16.msra.mxu1 %v11505_v25  ;;  %v11597_v39 = vld [vmem:[#allocation6 + $0x20c] ss:$16 sps:$4 sm:$0xff]  }
 0x4a2   :  { %6356 = vmatprep.subr.bf16.mxu0 %v11510_v6  ;;  %6515 = vmatprep.subr.bf16.mxu1 %v11513_v61 }
 0x4a3   :  { %4640 = vmatmul.mubr.bf16.gmra.mrb[68].mxu0 %v13363_v11  ;;  %5131 = vmatmul.mubr.bf16.gmra.mrb[68].mxu1 %v13363_v11  ;;  %v11529_v11 = vld [vmem:[#allocation6 + $0xa8] ss:$16 sps:$4 sm:$0xff]  }
 0x4a5   :  { %6357 = vmatpush1.bf16.msra.mxu0 %v11508_v7  ;;  %6516 = vmatpush1.bf16.msra.mxu1 %v11511_v35 }
 0x4a6   :  { %6358 = vmatprep.subr.bf16.mxu0 %v11516_v52  ;;  %6517 = vmatprep.subr.bf16.mxu1 %v11519_v0 }
 0x4a9   :  { %6359 = vmatpush1.bf16.msra.mxu0 %v11514_v21  ;;  %6518 = vmatpush1.bf16.msra.mxu1 %v11517_v37 }
 0x4aa   :  { %6360 = vmatprep.subr.bf16.mxu0 %v11522_v22  ;;  %6519 = vmatprep.subr.bf16.mxu1 %v11525_v29 }
 0x4ad   :  { %6361 = vmatpush1.bf16.msra.mxu0 %v11520_v15  ;;  %6520 = vmatpush1.bf16.msra.mxu1 %v11523_v30 }
 0x4ae   :  { %6362 = vmatprep.subr.bf16.mxu0 %v11528_v47  ;;  %6521 = vmatprep.subr.bf16.mxu1 %v11531_v58  ;;  %v11592_v58 = vld [vmem:[#allocation6 + $0x200] ss:$16 sps:$4 sm:$0xff]  }
 0x4b1   :  { %6363 = vmatpush1.bf16.msra.mxu0 %v11526_v23  ;;  %6522 = vmatpush1.bf16.msra.mxu1 %v11529_v11  ;;  %v11595_v23 = vld [vmem:[#allocation6 + $0x208] ss:$16 sps:$4 sm:$0xff]  }
 0x4b2   :  { %6364 = vmatprep.subr.bf16.mxu0 %v11534_v31  ;;  %6523 = vmatprep.subr.bf16.mxu1 %v11537_v32 }
 0x4b5   :  { %6365 = vmatpush1.bf16.msra.mxu0 %v11532_v17  ;;  %6524 = vmatpush1.bf16.msra.mxu1 %v11535_v33  ;;  %v11600_v17 = vld [vmem:[#allocation6 + $0x224] ss:$16 sps:$4 sm:$0xff]  }
 0x4b6   :  { %6366 = vmatprep.subr.bf16.mxu0 %v11540_v20  ;;  %6525 = vmatprep.subr.bf16.mxu1 %v11543_v34 }
 0x4b9   :  { %6367 = vmatpush1.bf16.msra.mxu0 %v11538_v36  ;;  %6526 = vmatpush1.bf16.msra.mxu1 %v11541_v40  ;;  %v11603_v40 = vld [vmem:[#allocation6 + $0x22c] ss:$16 sps:$4 sm:$0xff]  }
 0x4ba   :  { %6368 = vmatprep.subr.bf16.mxu0 %v11546_v41  ;;  %6527 = vmatprep.subr.bf16.mxu1 %v11549_v43 }
 0x4bd   :  { %6369 = vmatpush1.bf16.msra.mxu0 %v11544_v46  ;;  %6528 = vmatpush1.bf16.msra.mxu1 %v11547_v45 }
 0x4be   :  { %6370 = vmatprep.subr.bf16.mxu0 %v11552_v48  ;;  %6529 = vmatprep.subr.bf16.mxu1 %v11555_v49 }
 0x4c1   :  { %6371 = vmatpush1.bf16.msra.mxu0 %v11550_v18  ;;  %6530 = vmatpush1.bf16.msra.mxu1 %v11553_v27  ;;  %v11598_v27 = vld [vmem:[#allocation6 + $0x220] ss:$16 sps:$4 sm:$0xff]  }
 0x4c2   :  { %6372 = vmatprep.subr.bf16.mxu0 %v11558_v50  ;;  %6531 = vmatprep.subr.bf16.mxu1 %v11561_v51  ;;  %v11601_v50 = vld [vmem:[#allocation6 + $0x228] ss:$16 sps:$4 sm:$0xff]  }
 0x4c5   :  { %6373 = vmatpush1.bf16.msra.mxu0 %v11556_v53  ;;  %6532 = vmatpush1.bf16.msra.mxu1 %v11559_v54  ;;  %v11606_v53 = vld [vmem:[#allocation6 + $0x244] ss:$16 sps:$4 sm:$0xff]   ;;  %v11609_v54 = vld [vmem:[#allocation6 + $0x24c] ss:$16 sps:$4 sm:$0xff]  }
 0x4c6   :  { %6374 = vmatprep.subr.bf16.mxu0 %v11564_v59  ;;  %6533 = vmatprep.subr.bf16.mxu1 %v11567_v62 }
 0x4c9   :  { %6375 = vmatpush1.bf16.msra.mxu0 %v11562_v63  ;;  %6534 = vmatpush1.bf16.msra.mxu1 %v11565_v14  ;;  %v11604_v14 = vld [vmem:[#allocation6 + $0x240] ss:$16 sps:$4 sm:$0xff]  }
 0x4ca   :  { %6376 = vmatprep.subr.bf16.mxu0 %v11570_v28  ;;  %6535 = vmatprep.subr.bf16.mxu1 %v11573_v19  ;;  %v11607_v28 = vld [vmem:[#allocation6 + $0x248] ss:$16 sps:$4 sm:$0xff]  }
 0x4cd   :  { %6377 = vmatpush1.bf16.msra.mxu0 %v11568_v55  ;;  %6536 = vmatpush1.bf16.msra.mxu1 %v11571_v1  ;;  %v11612_v55 = vld [vmem:[#allocation6 + $0x264] ss:$16 sps:$4 sm:$0xff]   ;;  %v11615_v1 = vld [vmem:[#allocation6 + $0x26c] ss:$16 sps:$4 sm:$0xff]  }
 0x4ce   :  { %6378 = vmatprep.subr.bf16.mxu0 %v11576_v26  ;;  %6537 = vmatprep.subr.bf16.mxu1 %v11579_v16  ;;  %v11610_v16 = vld [vmem:[#allocation6 + $0x260] ss:$16 sps:$4 sm:$0xff]  }
 0x4d1   :  { %6379 = vmatpush1.bf16.msra.mxu0 %v11574_v42  ;;  %6538 = vmatpush1.bf16.msra.mxu1 %v11577_v56  ;;  %v11613_v42 = vld [vmem:[#allocation6 + $0x268] ss:$16 sps:$4 sm:$0xff]   ;;  %v11618_v56 = vld [vmem:[#allocation6 + $0x284] ss:$16 sps:$4 sm:$0xff]  }
 0x4d2   :  { %6380 = vmatprep.subr.bf16.mxu0 %v11582_v2  ;;  %6539 = vmatprep.subr.bf16.mxu1 %v11585_v60  ;;  %v11621_v2 = vld [vmem:[#allocation6 + $0x28c] ss:$16 sps:$4 sm:$0xff]   ;;  %v11616_v60 = vld [vmem:[#allocation6 + $0x280] ss:$16 sps:$4 sm:$0xff]  }
 0x4d5   :  { %6381 = vmatpush1.bf16.msra.mxu0 %v11580_v3  ;;  %6540 = vmatpush1.bf16.msra.mxu1 %v11583_v57  ;;  %v11619_v3 = vld [vmem:[#allocation6 + $0x288] ss:$16 sps:$4 sm:$0xff]   ;;  %v11624_v57 = vld [vmem:[#allocation6 + $0x2a4] ss:$16 sps:$4 sm:$0xff]  }
 0x4d6   :  { %6382 = vmatprep.subr.bf16.mxu0 %v11588_v5  ;;  %6541 = vmatprep.subr.bf16.mxu1 %v11591_v44  ;;  %v11627_v5 = vld [vmem:[#allocation6 + $0x2ac] ss:$16 sps:$4 sm:$0xff]   ;;  %v11622_v44 = vld [vmem:[#allocation6 + $0x2a0] ss:$16 sps:$4 sm:$0xff]  }
 0x4d9   :  { %6383 = vmatpush1.bf16.msra.mxu0 %v11586_v38  ;;  %6542 = vmatpush1.bf16.msra.mxu1 %v11589_v4  ;;  %v11625_v38 = vld [vmem:[#allocation6 + $0x2a8] ss:$16 sps:$4 sm:$0xff]   ;;  %v11630_v4 = vld [vmem:[#allocation6 + $0x2c4] ss:$16 sps:$4 sm:$0xff]  }
 0x4da   :  { %6405 = vmatprep.subr.bf16.mxu0 %v11594_v24  ;;  %6564 = vmatprep.subr.bf16.mxu1 %v11597_v39  ;;  %v11633_v24 = vld [vmem:[#allocation6 + $0x2cc] ss:$16 sps:$4 sm:$0xff]   ;;  %v11628_v39 = vld [vmem:[#allocation6 + $0x2c0] ss:$16 sps:$4 sm:$0xff]  }
 0x56e   :  { %v4631_v25 = vpop.f32.mrb[64].mxu0  ;;  %v5122_v6 = vpop.f32.mrb[64].mxu1 }
 0x56f   :  { %v5141_v61 = vmax.f32 %v4631_v25, %v5122_v6  ;;  %v4633_v7 = vpop.f32.mrb[65].mxu0  ;;  %v5124_v35 = vpop.f32.mrb[65].mxu1  ;;  %v11631_v25 = vld [vmem:[#allocation6 + $0x2c8] ss:$16 sps:$4 sm:$0xff]   ;;  %v11636_v6 = vld [vmem:[#allocation6 + $0x2e4] ss:$16 sps:$4 sm:$0xff]  }
 0x570   :  { %v5142_v52 = vmax.f32 %v4633_v7, %v5124_v35  ;;  %v4635_v0 = vpop.f32.mrb[66].mxu0  ;;  %v5126_v21 = vpop.f32.mrb[66].mxu1  ;;  %v11634_v7 = vld [vmem:[#allocation6 + $0x2e0] ss:$16 sps:$4 sm:$0xff]   ;;  %v11637_v35 = vld [vmem:[#allocation6 + $0x2e8] ss:$16 sps:$4 sm:$0xff]  }
 0x571   :  { %v5143_v37 = vmax.f32 %v4635_v0, %v5126_v21  ;;  %v4637_v22 = vpop.f32.mrb[67].mxu0  ;;  %v5128_v29 = vpop.f32.mrb[67].mxu1  ;;  %v11645_v0 = vld [vmem:[#allocation6 + $0x30c] ss:$16 sps:$4 sm:$0xff]   ;;  %v11640_v21 = vld [vmem:[#allocation6 + $0x300] ss:$16 sps:$4 sm:$0xff]  }
 0x572   :  { %v5144_v15 = vmax.f32 %v4637_v22, %v5128_v29  ;;  %v11648_v22 = vld [vmem:[#allocation6 + $0x324] ss:$16 sps:$4 sm:$0xff]   ;;  %v11651_v29 = vld [vmem:[#allocation6 + $0x32c] ss:$16 sps:$4 sm:$0xff]  }
 0x573   :  { %v13375_v30 = vpack.c.bf16 %v5143_v37, %v5141_v61  ;;  %v11639_v61 = vld [vmem:[#allocation6 + $0x2ec] ss:$16 sps:$4 sm:$0xff]   ;;  %v11643_v37 = vld [vmem:[#allocation6 + $0x308] ss:$16 sps:$4 sm:$0xff]  }
 0x574   :  { %v5150_v47 = vpack.c.bf16 %v5144_v15, %v5142_v52  ;;  %v11642_v52 = vld [vmem:[#allocation6 + $0x304] ss:$16 sps:$4 sm:$0xff]   ;;  %v11646_v15 = vld [vmem:[#allocation6 + $0x320] ss:$16 sps:$4 sm:$0xff]  }
 0x575   :  { %v5159_v33 = vrot.slane %v13375_v30, 4 }
 0x576   :  { %v5160_v11 = vrot.slane %v5150_v47, 4  ;;  %v4641_v31 = vpop.f32.mrb[68].mxu0  ;;  %v5132_v32 = vpop.f32.mrb[68].mxu1 }
 0x577   :  { %v5145_v20 = vmax.f32 %v4641_v31, %v5132_v32  ;;  %v4643_v34 = vpop.f32.mrb[69].mxu0  ;;  %v5134_v36 = vpop.f32.mrb[69].mxu1  ;;  %v11655_v31 = vld [vmem:[#allocation6 + $0x348] ss:$16 sps:$4 sm:$0xff]   ;;  %v11660_v32 = vld [vmem:[#allocation6 + $0x364] ss:$16 sps:$4 sm:$0xff]  }
 0x578   :  { %v5146_v41 = vmax.f32 %v4643_v34, %v5134_v36  ;;  %v4645_v43 = vpop.f32.mrb[70].mxu0  ;;  %v5136_v46 = vpop.f32.mrb[70].mxu1  ;;  %9956 = vmatprep.mubr.msk.bf16.mxu0 %vm12579_vm1, %v5160_v11  ;;  %9962 = vmatprep.mubr.msk.bf16.mxu1 %vm12579_vm1, %v5160_v11  ;;  %v11666_v34 = vld [vmem:[#allocation6 + $0x384] ss:$16 sps:$4 sm:$0xff]   ;;  %v11669_v36 = vld [vmem:[#allocation6 + $0x38c] ss:$16 sps:$4 sm:$0xff]  }
 0x579   :  { %v5147_v45 = vmax.f32 %v4645_v43, %v5136_v46  ;;  %v4647_v48 = vpop.f32.mrb[71].mxu0  ;;  %v5138_v49 = vpop.f32.mrb[71].mxu1  ;;  %9958 = vmatmul.mubr.msk.bf16.vlgmr.msra.gmra.mrb[72].mxu0 %vm12579_vm1, %v5159_v33  ;;  %9964 = vmatmul.mubr.msk.bf16.vlgmr.msra.gmra.mrb[72].mxu1 %vm12579_vm1, %v5159_v33  ;;  %v11672_v43 = vld [vmem:[#allocation6 + $0x3a4] ss:$16 sps:$4 sm:$0xff]   ;;  %v11675_v46 = vld [vmem:[#allocation6 + $0x3ac] ss:$16 sps:$4 sm:$0xff]  }
 0x57a   :  { %v5148_v18 = vmax.f32 %v4647_v48, %v5138_v49  ;;  %6406 = vmatpush1.bf16.msra.mxu0 %v11592_v58  ;;  %6565 = vmatpush1.bf16.msra.mxu1 %v11595_v23  ;;  %v11654_v58 = vld [vmem:[#allocation6 + $0x344] ss:$16 sps:$4 sm:$0xff]   ;;  %v11657_v23 = vld [vmem:[#allocation6 + $0x34c] ss:$16 sps:$4 sm:$0xff]   ;;  %v11673_v48 = vld [vmem:[#allocation6 + $0x3a8] ss:$16 sps:$4 sm:$0xff]  }
 0x57b   :  { %v13386_v51 = vpack.c.bf16 %v5147_v45, %v5145_v20  ;;  %6407 = vmatprep.subr.bf16.mxu0 %v11600_v17  ;;  %6566 = vmatprep.subr.bf16.mxu1 %v11603_v40  ;;  %v11663_v17 = vld [vmem:[#allocation6 + $0x36c] ss:$16 sps:$4 sm:$0xff]   ;;  %v11661_v20 = vld [vmem:[#allocation6 + $0x368] ss:$16 sps:$4 sm:$0xff]   ;;  %v11664_v40 = vld [vmem:[#allocation6 + $0x380] ss:$16 sps:$4 sm:$0xff]  }
 0x57c   :  { %v13388_v59 = vpack.c.bf16 %v5148_v18, %v5146_v41  ;;  %v11667_v41 = vld [vmem:[#allocation6 + $0x388] ss:$16 sps:$4 sm:$0xff]   ;;  %v11670_v45 = vld [vmem:[#allocation6 + $0x3a0] ss:$16 sps:$4 sm:$0xff]   ;;  %v11678_v49 = vld [vmem:[#allocation6 + $0x3c4] ss:$16 sps:$4 sm:$0xff]  }
 0x57d   :  { %v13391_v62 = vrot.slane %v13386_v51, 4  ;;  %v11681_v18 = vld [vmem:[#allocation6 + $0x3cc] ss:$16 sps:$4 sm:$0xff]  }
 0x57e   :  { %v13394_v63 = vrot.slane %v13388_v59, 4  ;;  %6408 = vmatpush1.bf16.msra.mxu0 %v11598_v27  ;;  %6567 = vmatpush1.bf16.msra.mxu1 %v11601_v50  ;;  %v11676_v27 = vld [vmem:[#allocation6 + $0x3c0] ss:$16 sps:$4 sm:$0xff]   ;;  %v11679_v50 = vld [vmem:[#allocation6 + $0x3c8] ss:$16 sps:$4 sm:$0xff]  }
 0x57f   :  { %6409 = vmatprep.subr.bf16.mxu0 %v11606_v53  ;;  %6568 = vmatprep.subr.bf16.mxu1 %v11609_v54  ;;  %v13404_v26 = vsel %vm177_vm0, %v5159_v33, %v13391_v62  ;;  %v11658_v33 = vld [vmem:[#allocation6 + $0x360] ss:$16 sps:$4 sm:$0xff]   ;;  %v11684_v53 = vld [vmem:[#allocation6 + $0x3e4] ss:$16 sps:$4 sm:$0xff]   ;;  %v11687_v54 = vld [vmem:[#allocation6 + $0x3ec] ss:$16 sps:$4 sm:$0xff]  }
 0x580   :  { %v13398_v19 = vsel %vm177_vm0, %v5160_v11, %v13394_v63  ;;  %v11652_v11 = vld [vmem:[#allocation6 + $0x340] ss:$16 sps:$4 sm:$0xff]  }
 0x581   :  { %6394 = vmatprep.mubr.bf16.mxu0 %v13398_v19  ;;  %6553 = vmatprep.mubr.bf16.mxu1 %v13398_v19 }
 0x582   :  { %6410 = vmatpush1.bf16.msra.mxu0 %v11604_v14  ;;  %6569 = vmatpush1.bf16.msra.mxu1 %v11607_v28  ;;  %v11682_v14 = vld [vmem:[#allocation6 + $0x3e0] ss:$16 sps:$4 sm:$0xff]   ;;  %v11685_v28 = vld [vmem:[#allocation6 + $0x3e8] ss:$16 sps:$4 sm:$0xff]  }
 0x583   :  { %6395 = vmatmul.mubr.bf16.gmra.mrb[76].mxu0 %v13404_v26  ;;  %6554 = vmatmul.mubr.bf16.gmra.mrb[76].mxu1 %v13404_v26 }
 0x584   :  { %6437 = vmatprep.mubr.bf16.mxu0 %v5150_v47  ;;  %6596 = vmatprep.mubr.bf16.mxu1 %v5150_v47  ;;  %v11649_v47 = vld [vmem:[#allocation6 + $0x328] ss:$16 sps:$4 sm:$0xff]  }
 0x585   :  { %6411 = vmatprep.subr.bf16.mxu0 %v11612_v55  ;;  %6570 = vmatprep.subr.bf16.mxu1 %v11615_v1  ;;  %v11690_v55 = vld [vmem:[#allocation6 + $0x404] ss:$16 sps:$4 sm:$0xff]   ;;  %v11693_v1 = vld [vmem:[#allocation6 + $0x40c] ss:$16 sps:$4 sm:$0xff]  }
 0x586   :  { %6412 = vmatpush1.bf16.msra.mxu0 %v11610_v16  ;;  %6571 = vmatpush1.bf16.msra.mxu1 %v11613_v42  ;;  %v11688_v16 = vld [vmem:[#allocation6 + $0x400] ss:$16 sps:$4 sm:$0xff]   ;;  %v11691_v42 = vld [vmem:[#allocation6 + $0x408] ss:$16 sps:$4 sm:$0xff]  }
 0x587   :  { %6413 = vmatprep.subr.bf16.mxu0 %v11618_v56  ;;  %6572 = vmatprep.subr.bf16.mxu1 %v11621_v2  ;;  %v11696_v56 = vld [vmem:[#allocation6 + $0x424] ss:$16 sps:$4 sm:$0xff]   ;;  %v11699_v2 = vld [vmem:[#allocation6 + $0x42c] ss:$16 sps:$4 sm:$0xff]  }
 0x58a   :  { %6414 = vmatpush1.bf16.msra.mxu0 %v11616_v60  ;;  %6573 = vmatpush1.bf16.msra.mxu1 %v11619_v3  ;;  %v11694_v60 = vld [vmem:[#allocation6 + $0x420] ss:$16 sps:$4 sm:$0xff]   ;;  %v11697_v3 = vld [vmem:[#allocation6 + $0x428] ss:$16 sps:$4 sm:$0xff]  }
 0x58b   :  { %6415 = vmatprep.subr.bf16.mxu0 %v11624_v57  ;;  %6574 = vmatprep.subr.bf16.mxu1 %v11627_v5  ;;  %v11702_v57 = vld [vmem:[#allocation6 + $0x444] ss:$16 sps:$4 sm:$0xff]   ;;  %v11705_v5 = vld [vmem:[#allocation6 + $0x44c] ss:$16 sps:$4 sm:$0xff]  }
 0x58e   :  { %6416 = vmatpush1.bf16.msra.mxu0 %v11622_v44  ;;  %6575 = vmatpush1.bf16.msra.mxu1 %v11625_v38  ;;  %v11700_v44 = vld [vmem:[#allocation6 + $0x440] ss:$16 sps:$4 sm:$0xff]   ;;  %v11703_v38 = vld [vmem:[#allocation6 + $0x448] ss:$16 sps:$4 sm:$0xff]  }
 0x58f   :  { %6417 = vmatprep.subr.bf16.mxu0 %v11630_v4  ;;  %6576 = vmatprep.subr.bf16.mxu1 %v11633_v24  ;;  %v11708_v4 = vld [vmem:[#allocation6 + $0x464] ss:$16 sps:$4 sm:$0xff]   ;;  %v11709_v24 = vld [vmem:[#allocation6 + $0x468] ss:$16 sps:$4 sm:$0xff]  }
 0x592   :  { %6418 = vmatpush1.bf16.msra.mxu0 %v11628_v39  ;;  %6577 = vmatpush1.bf16.msra.mxu1 %v11631_v25  ;;  %v11714_v39 = vld [vmem:[#allocation6 + $0x484] ss:$16 sps:$4 sm:$0xff]   ;;  %v11717_v25 = vld [vmem:[#allocation6 + $0x48c] ss:$16 sps:$4 sm:$0xff]  }
 0x593   :  { %6419 = vmatprep.subr.bf16.mxu0 %v11636_v6  ;;  %6578 = vmatprep.subr.bf16.mxu1 %v11639_v61  ;;  %v11712_v6 = vld [vmem:[#allocation6 + $0x480] ss:$16 sps:$4 sm:$0xff]   ;;  %v11715_v61 = vld [vmem:[#allocation6 + $0x488] ss:$16 sps:$4 sm:$0xff]  }
 0x596   :  { %6420 = vmatpush1.bf16.msra.mxu0 %v11634_v7  ;;  %6579 = vmatpush1.bf16.msra.mxu1 %v11637_v35  ;;  %v11720_v7 = vld [vmem:[#allocation6 + $0x4a4] ss:$16 sps:$4 sm:$0xff]   ;;  %v11718_v35 = vld [vmem:[#allocation6 + $0x4a0] ss:$16 sps:$4 sm:$0xff]  }
 0x597   :  { %6421 = vmatprep.subr.bf16.mxu0 %v11642_v52  ;;  %6580 = vmatprep.subr.bf16.mxu1 %v11645_v0  ;;  %v11721_v52 = vld [vmem:[#allocation6 + $0x4a8] ss:$16 sps:$4 sm:$0xff]   ;;  %v11726_v0 = vld [vmem:[#allocation6 + $0x4c4] ss:$16 sps:$4 sm:$0xff]  }
 0x59a   :  { %6422 = vmatpush1.bf16.msra.mxu0 %v11640_v21  ;;  %6581 = vmatpush1.bf16.msra.mxu1 %v11643_v37  ;;  %v11724_v21 = vld [vmem:[#allocation6 + $0x4c0] ss:$16 sps:$4 sm:$0xff]   ;;  %v11727_v37 = vld [vmem:[#allocation6 + $0x4c8] ss:$16 sps:$4 sm:$0xff]  }
 0x59b   :  { %6423 = vmatprep.subr.bf16.mxu0 %v11648_v22  ;;  %6582 = vmatprep.subr.bf16.mxu1 %v11651_v29  ;;  %v11732_v22 = vld [vmem:[#allocation6 + $0x4e4] ss:$16 sps:$4 sm:$0xff]   ;;  %v11735_v29 = vld [vmem:[#allocation6 + $0x4ec] ss:$16 sps:$4 sm:$0xff]  }
 0x59e   :  { %6424 = vmatpush1.bf16.msra.mxu0 %v11646_v15  ;;  %6583 = vmatpush1.bf16.msra.mxu1 %v11649_v47  ;;  %v11730_v15 = vld [vmem:[#allocation6 + $0x4e0] ss:$16 sps:$4 sm:$0xff]   ;;  %v11733_v47 = vld [vmem:[#allocation6 + $0x4e8] ss:$16 sps:$4 sm:$0xff]  }
 0x59f   :  { %6425 = vmatprep.subr.bf16.mxu0 %v11654_v58  ;;  %6584 = vmatprep.subr.bf16.mxu1 %v11657_v23  ;;  %v11738_v58 = vld [vmem:[#allocation6 + $0x504] ss:$16 sps:$4 sm:$0xff]   ;;  %v11741_v23 = vld [vmem:[#allocation6 + $0x50c] ss:$16 sps:$4 sm:$0xff]  }
 0x5a2   :  { %6426 = vmatpush1.bf16.msra.mxu0 %v11652_v11  ;;  %6585 = vmatpush1.bf16.msra.mxu1 %v11655_v31  ;;  %v11736_v11 = vld [vmem:[#allocation6 + $0x500] ss:$16 sps:$4 sm:$0xff]   ;;  %v11739_v31 = vld [vmem:[#allocation6 + $0x508] ss:$16 sps:$4 sm:$0xff]  }
 0x5a3   :  { %6427 = vmatprep.subr.bf16.mxu0 %v11660_v32  ;;  %6586 = vmatprep.subr.bf16.mxu1 %v11663_v17  ;;  %v11744_v32 = vld [vmem:[#allocation6 + $0x524] ss:$16 sps:$4 sm:$0xff]   ;;  %v11747_v17 = vld [vmem:[#allocation6 + $0x52c] ss:$16 sps:$4 sm:$0xff]  }
 0x5a6   :  { %6428 = vmatpush1.bf16.msra.mxu0 %v11658_v33  ;;  %6587 = vmatpush1.bf16.msra.mxu1 %v11661_v20  ;;  %v11742_v33 = vld [vmem:[#allocation6 + $0x520] ss:$16 sps:$4 sm:$0xff]   ;;  %v11745_v20 = vld [vmem:[#allocation6 + $0x528] ss:$16 sps:$4 sm:$0xff]  }
 0x5a7   :  { %6429 = vmatprep.subr.bf16.mxu0 %v11666_v34  ;;  %6588 = vmatprep.subr.bf16.mxu1 %v11669_v36  ;;  %v11750_v34 = vld [vmem:[#allocation6 + $0x544] ss:$16 sps:$4 sm:$0xff]   ;;  %v11753_v36 = vld [vmem:[#allocation6 + $0x54c] ss:$16 sps:$4 sm:$0xff]  }
 0x5aa   :  { %6430 = vmatpush1.bf16.msra.mxu0 %v11664_v40  ;;  %6589 = vmatpush1.bf16.msra.mxu1 %v11667_v41  ;;  %v11748_v40 = vld [vmem:[#allocation6 + $0x540] ss:$16 sps:$4 sm:$0xff]   ;;  %v11751_v41 = vld [vmem:[#allocation6 + $0x548] ss:$16 sps:$4 sm:$0xff]  }
 0x5ab   :  { %6431 = vmatprep.subr.bf16.mxu0 %v11672_v43  ;;  %6590 = vmatprep.subr.bf16.mxu1 %v11675_v46  ;;  %v11756_v43 = vld [vmem:[#allocation6 + $0x564] ss:$16 sps:$4 sm:$0xff]   ;;  %v11759_v46 = vld [vmem:[#allocation6 + $0x56c] ss:$16 sps:$4 sm:$0xff]  }
 0x5ae   :  { %6432 = vmatpush1.bf16.msra.mxu0 %v11670_v45  ;;  %6591 = vmatpush1.bf16.msra.mxu1 %v11673_v48  ;;  %v11754_v45 = vld [vmem:[#allocation6 + $0x560] ss:$16 sps:$4 sm:$0xff]   ;;  %v11757_v48 = vld [vmem:[#allocation6 + $0x568] ss:$16 sps:$4 sm:$0xff]  }
 0x5af   :  { %6433 = vmatprep.subr.bf16.mxu0 %v11678_v49  ;;  %6592 = vmatprep.subr.bf16.mxu1 %v11681_v18  ;;  %v11762_v49 = vld [vmem:[#allocation6 + $0x584] ss:$16 sps:$4 sm:$0xff]   ;;  %v11765_v18 = vld [vmem:[#allocation6 + $0x58c] ss:$16 sps:$4 sm:$0xff]  }
 0x5b2   :  { %6434 = vmatpush1.bf16.msra.mxu0 %v11676_v27  ;;  %6593 = vmatpush1.bf16.msra.mxu1 %v11679_v50  ;;  %v11760_v27 = vld [vmem:[#allocation6 + $0x580] ss:$16 sps:$4 sm:$0xff]   ;;  %v11763_v50 = vld [vmem:[#allocation6 + $0x588] ss:$16 sps:$4 sm:$0xff]  }
 0x5b3   :  { %6435 = vmatprep.subr.bf16.mxu0 %v11684_v53  ;;  %6594 = vmatprep.subr.bf16.mxu1 %v11687_v54  ;;  %v11768_v53 = vld [vmem:[#allocation6 + $0x5a4] ss:$16 sps:$4 sm:$0xff]   ;;  %v11771_v54 = vld [vmem:[#allocation6 + $0x5ac] ss:$16 sps:$4 sm:$0xff]  }
 0x5b6   :  { %6436 = vmatpush1.bf16.msra.mxu0 %v11682_v14  ;;  %6595 = vmatpush1.bf16.msra.mxu1 %v11685_v28  ;;  %v11766_v14 = vld [vmem:[#allocation6 + $0x5a0] ss:$16 sps:$4 sm:$0xff]   ;;  %v11769_v28 = vld [vmem:[#allocation6 + $0x5a8] ss:$16 sps:$4 sm:$0xff]  }
 0x5b7   :  { %6458 = vmatprep.subr.bf16.mxu0 %v11690_v55  ;;  %6617 = vmatprep.subr.bf16.mxu1 %v11693_v1  ;;  %v11774_v55 = vld [vmem:[#allocation6 + $0x5c4] ss:$16 sps:$4 sm:$0xff]   ;;  %v11777_v1 = vld [vmem:[#allocation6 + $0x5cc] ss:$16 sps:$4 sm:$0xff]  }
 0x5b9   :  { %6438 = vmatmul.mubr.bf16.vlgmr.msra.gmra.mrb[72].mxu0 %v13375_v30  ;;  %6597 = vmatmul.mubr.bf16.vlgmr.msra.gmra.mrb[72].mxu1 %v13375_v30  ;;  %v11711_v30 = vld [vmem:[#allocation6 + $0x46c] ss:$16 sps:$4 sm:$0xff]  }
 0x5ba   :  { %6447 = vmatprep.mubr.bf16.mxu0 %v13388_v59  ;;  %6459 = vmatpush1.bf16.msra.mxu0 %v11688_v16  ;;  %v11772_v16 = vld [vmem:[#allocation6 + $0x5c0] ss:$16 sps:$4 sm:$0xff]  }
 0x5bb   :  { %6606 = vmatprep.mubr.bf16.mxu1 %v13388_v59  ;;  %6618 = vmatpush1.bf16.msra.mxu1 %v11691_v42  ;;  %v11706_v59 = vld [vmem:[#allocation6 + $0x460] ss:$16 sps:$4 sm:$0xff]   ;;  %v11775_v42 = vld [vmem:[#allocation6 + $0x5c8] ss:$16 sps:$4 sm:$0xff]  }
 0x5bc   :  { %6460 = vmatprep.subr.bf16.mxu0 %v11696_v56  ;;  %6619 = vmatprep.subr.bf16.mxu1 %v11699_v2  ;;  %v11780_v56 = vld [vmem:[#allocation6 + $0x5e4] ss:$16 sps:$4 sm:$0xff]   ;;  %v11783_v2 = vld [vmem:[#allocation6 + $0x5ec] ss:$16 sps:$4 sm:$0xff]  }
 0x5be   :  { %6461 = vmatpush1.bf16.msra.mxu0 %v11694_v60  ;;  %v11778_v60 = vld [vmem:[#allocation6 + $0x5e0] ss:$16 sps:$4 sm:$0xff]  }
 0x5bf   :  { %6620 = vmatpush1.bf16.msra.mxu1 %v11697_v3  ;;  %6462 = vmatprep.subr.bf16.mxu0 %v11702_v57  ;;  %v11781_v3 = vld [vmem:[#allocation6 + $0x5e8] ss:$16 sps:$4 sm:$0xff]   ;;  %v11786_v57 = vld [vmem:[#allocation10 + $0x4] ss:$8 sps:$4 sm:$0xff]  }
 0x5c0   :  { %6621 = vmatprep.subr.bf16.mxu1 %v11705_v5  ;;  %v11789_v5 = vld [vmem:[#allocation10 + $0x204] ss:$8 sps:$4 sm:$0xff]  }
 0x5c1   :  { %6448 = vmatmul.mubr.bf16.gmra.mrb[76].mxu0 %v13386_v51  ;;  %6607 = vmatmul.mubr.bf16.gmra.mrb[76].mxu1 %v13386_v51  ;;  %v11723_v51 = vld [vmem:[#allocation6 + $0x4ac] ss:$16 sps:$4 sm:$0xff]  }
 0x5c2   :  { %6463 = vmatpush1.bf16.msra.mxu0 %v11700_v44  ;;  %6490 = vmatprep.mubr.bf16.mxu0 %v13398_v19  ;;  %v11784_v44 = vld [vmem:[#allocation10] ss:$8 sps:$4 sm:$0xff]  }
 0x5c3   :  { %6622 = vmatpush1.bf16.msra.mxu1 %v11703_v38  ;;  %6649 = vmatprep.mubr.bf16.mxu1 %v13398_v19  ;;  %v11729_v19 = vld [vmem:[#allocation6 + $0x4cc] ss:$16 sps:$4 sm:$0xff]   ;;  %v11787_v38 = vld [vmem:[#allocation10 + $0x200] ss:$8 sps:$4 sm:$0xff]  }
 0x5c4   :  { %6464 = vmatprep.subr.bf16.mxu0 %v11708_v4  ;;  %6623 = vmatprep.subr.bf16.mxu1 %v11711_v30  ;;  %v11792_v4 = vld [vmem:[#allocation10 + $0x14] ss:$8 sps:$4 sm:$0xff]  }
 0x5c5   :  { %v11795_v30 = vld [vmem:[#allocation10 + $0x214] ss:$8 sps:$4 sm:$0xff]  }
 0x5c6   :  { %6465 = vmatpush1.bf16.msra.mxu0 %v11706_v59  ;;  %v11790_v59 = vld [vmem:[#allocation10 + $0x10] ss:$8 sps:$4 sm:$0xff]  }
 0x5c7   :  { %6624 = vmatpush1.bf16.msra.mxu1 %v11709_v24  ;;  %6466 = vmatprep.subr.bf16.mxu0 %v11714_v39  ;;  %v11793_v24 = vld [vmem:[#allocation10 + $0x210] ss:$8 sps:$4 sm:$0xff]   ;;  %v11798_v39 = vld [vmem:[#allocation10 + $0x24] ss:$8 sps:$4 sm:$0xff]  }
 0x5c8   :  { %6625 = vmatprep.subr.bf16.mxu1 %v11717_v25  ;;  %v11801_v25 = vld [vmem:[#allocation10 + $0x224] ss:$8 sps:$4 sm:$0xff]  }
 0x5ca   :  { %6467 = vmatpush1.bf16.msra.mxu0 %v11712_v6  ;;  %v11796_v6 = vld [vmem:[#allocation10 + $0x20] ss:$8 sps:$4 sm:$0xff]  }
 0x5cb   :  { %6626 = vmatpush1.bf16.msra.mxu1 %v11715_v61  ;;  %6468 = vmatprep.subr.bf16.mxu0 %v11720_v7  ;;  %v11799_v61 = vld [vmem:[#allocation10 + $0x220] ss:$8 sps:$4 sm:$0xff]   ;;  %v11807_v7 = vld [vmem:[#allocation10 + $0x234] ss:$8 sps:$4 sm:$0xff]  }
 0x5cc   :  { %6627 = vmatprep.subr.bf16.mxu1 %v11723_v51  ;;  %v11805_v51 = vld [vmem:[#allocation10 + $0x230] ss:$8 sps:$4 sm:$0xff]  }
 0x5ce   :  { %6469 = vmatpush1.bf16.msra.mxu0 %v11718_v35  ;;  %v11810_v35 = vld [vmem:[#allocation10 + $0x44] ss:$8 sps:$4 sm:$0xff]  }
 0x5cf   :  { %6628 = vmatpush1.bf16.msra.mxu1 %v11721_v52  ;;  %6470 = vmatprep.subr.bf16.mxu0 %v11726_v0  ;;  %v11813_v52 = vld [vmem:[#allocation10 + $0x244] ss:$8 sps:$4 sm:$0xff]   ;;  %v11808_v0 = vld [vmem:[#allocation10 + $0x40] ss:$8 sps:$4 sm:$0xff]  }
 0x5d0   :  { %6629 = vmatprep.subr.bf16.mxu1 %v11729_v19  ;;  %v11811_v19 = vld [vmem:[#allocation10 + $0x240] ss:$8 sps:$4 sm:$0xff]  }
 0x5d2   :  { %6471 = vmatpush1.bf16.msra.mxu0 %v11724_v21  ;;  %v11816_v21 = vld [vmem:[#allocation10 + $0x54] ss:$8 sps:$4 sm:$0xff]  }
 0x5d3   :  { %6630 = vmatpush1.bf16.msra.mxu1 %v11727_v37  ;;  %6472 = vmatprep.subr.bf16.mxu0 %v11732_v22  ;;  %v11819_v37 = vld [vmem:[#allocation10 + $0x254] ss:$8 sps:$4 sm:$0xff]   ;;  %v11814_v22 = vld [vmem:[#allocation10 + $0x50] ss:$8 sps:$4 sm:$0xff]  }
 0x5d4   :  { %6631 = vmatprep.subr.bf16.mxu1 %v11735_v29  ;;  %v11822_v29 = vld [vmem:[#allocation10 + $0x64] ss:$8 sps:$4 sm:$0xff]  }
 0x5d6   :  { %6473 = vmatpush1.bf16.msra.mxu0 %v11730_v15  ;;  %v11825_v15 = vld [vmem:[#allocation10 + $0x264] ss:$8 sps:$4 sm:$0xff]  }
 0x5d7   :  { %6632 = vmatpush1.bf16.msra.mxu1 %v11733_v47  ;;  %6474 = vmatprep.subr.bf16.mxu0 %v11738_v58  ;;  %v11820_v47 = vld [vmem:[#allocation10 + $0x60] ss:$8 sps:$4 sm:$0xff]  }
 0x5d8   :  { %6633 = vmatprep.subr.bf16.mxu1 %v11741_v23  ;;  %v11823_v58 = vld [vmem:[#allocation10 + $0x260] ss:$8 sps:$4 sm:$0xff]   ;;  %v11828_v23 = vld [vmem:[#allocation10 + $0x74] ss:$8 sps:$4 sm:$0xff]  }
 0x5da   :  { %6475 = vmatpush1.bf16.msra.mxu0 %v11736_v11  ;;  %v11831_v11 = vld [vmem:[#allocation10 + $0x274] ss:$8 sps:$4 sm:$0xff]  }
 0x5db   :  { %6634 = vmatpush1.bf16.msra.mxu1 %v11739_v31  ;;  %6476 = vmatprep.subr.bf16.mxu0 %v11744_v32  ;;  %v11826_v31 = vld [vmem:[#allocation10 + $0x70] ss:$8 sps:$4 sm:$0xff]  }
 0x5dc   :  { %6635 = vmatprep.subr.bf16.mxu1 %v11747_v17  ;;  %v11829_v32 = vld [vmem:[#allocation10 + $0x270] ss:$8 sps:$4 sm:$0xff]   ;;  %v11834_v17 = vld [vmem:[#allocation10 + $0x84] ss:$8 sps:$4 sm:$0xff]  }
 0x5de   :  { %6477 = vmatpush1.bf16.msra.mxu0 %v11742_v33  ;;  %v11837_v33 = vld [vmem:[#allocation10 + $0x284] ss:$8 sps:$4 sm:$0xff]  }
 0x5df   :  { %6636 = vmatpush1.bf16.msra.mxu1 %v11745_v20  ;;  %6478 = vmatprep.subr.bf16.mxu0 %v11750_v34  ;;  %v11832_v20 = vld [vmem:[#allocation10 + $0x80] ss:$8 sps:$4 sm:$0xff]  }
 0x5e0   :  { %6637 = vmatprep.subr.bf16.mxu1 %v11753_v36  ;;  %v11835_v34 = vld [vmem:[#allocation10 + $0x280] ss:$8 sps:$4 sm:$0xff]   ;;  %v11840_v36 = vld [vmem:[#allocation10 + $0x94] ss:$8 sps:$4 sm:$0xff]  }
 0x5e2   :  { %6479 = vmatpush1.bf16.msra.mxu0 %v11748_v40  ;;  %v11843_v40 = vld [vmem:[#allocation10 + $0x294] ss:$8 sps:$4 sm:$0xff]  }
 0x5e3   :  { %6638 = vmatpush1.bf16.msra.mxu1 %v11751_v41  ;;  %6480 = vmatprep.subr.bf16.mxu0 %v11756_v43  ;;  %v11838_v41 = vld [vmem:[#allocation10 + $0x90] ss:$8 sps:$4 sm:$0xff]  }
 0x5e4   :  { %6639 = vmatprep.subr.bf16.mxu1 %v11759_v46  ;;  %v11841_v43 = vld [vmem:[#allocation10 + $0x290] ss:$8 sps:$4 sm:$0xff]   ;;  %v11846_v46 = vld [vmem:[#allocation10 + $0xa4] ss:$8 sps:$4 sm:$0xff]  }
 0x5e6   :  { %6481 = vmatpush1.bf16.msra.mxu0 %v11754_v45  ;;  %v11849_v45 = vld [vmem:[#allocation10 + $0x2a4] ss:$8 sps:$4 sm:$0xff]  }
 0x5e7   :  { %6640 = vmatpush1.bf16.msra.mxu1 %v11757_v48  ;;  %6482 = vmatprep.subr.bf16.mxu0 %v11762_v49  ;;  %v11844_v48 = vld [vmem:[#allocation10 + $0xa0] ss:$8 sps:$4 sm:$0xff]  }
 0x5e8   :  { %6641 = vmatprep.subr.bf16.mxu1 %v11765_v18  ;;  %v11847_v49 = vld [vmem:[#allocation10 + $0x2a0] ss:$8 sps:$4 sm:$0xff]   ;;  %v11852_v18 = vld [vmem:[#allocation10 + $0xb4] ss:$8 sps:$4 sm:$0xff]  }
 0x5ea   :  { %6483 = vmatpush1.bf16.msra.mxu0 %v11760_v27  ;;  %v11855_v27 = vld [vmem:[#allocation10 + $0x2b4] ss:$8 sps:$4 sm:$0xff]  }
 0x5eb   :  { %6642 = vmatpush1.bf16.msra.mxu1 %v11763_v50  ;;  %6484 = vmatprep.subr.bf16.mxu0 %v11768_v53  ;;  %v11850_v50 = vld [vmem:[#allocation10 + $0xb0] ss:$8 sps:$4 sm:$0xff]  }
 0x5ec   :  { %6643 = vmatprep.subr.bf16.mxu1 %v11771_v54  ;;  %v11853_v53 = vld [vmem:[#allocation10 + $0x2b0] ss:$8 sps:$4 sm:$0xff]   ;;  %v11858_v54 = vld [vmem:[#allocation10 + $0xc4] ss:$8 sps:$4 sm:$0xff]  }
 0x5ee   :  { %6485 = vmatpush1.bf16.msra.mxu0 %v11766_v14  ;;  %v11861_v14 = vld [vmem:[#allocation10 + $0x2c4] ss:$8 sps:$4 sm:$0xff]  }
 0x5ef   :  { %6644 = vmatpush1.bf16.msra.mxu1 %v11769_v28  ;;  %6486 = vmatprep.subr.bf16.mxu0 %v11774_v55  ;;  %v11856_v28 = vld [vmem:[#allocation10 + $0xc0] ss:$8 sps:$4 sm:$0xff]  }
 0x5f0   :  { %6645 = vmatprep.subr.bf16.mxu1 %v11777_v1  ;;  %v11859_v55 = vld [vmem:[#allocation10 + $0x2c0] ss:$8 sps:$4 sm:$0xff]   ;;  %v11864_v1 = vld [vmem:[#allocation10 + $0xd4] ss:$8 sps:$4 sm:$0xff]  }
 0x5f2   :  { %6487 = vmatpush1.bf16.msra.mxu0 %v11772_v16  ;;  %v11867_v16 = vld [vmem:[#allocation10 + $0x2d4] ss:$8 sps:$4 sm:$0xff]  }
 0x5f3   :  { %6646 = vmatpush1.bf16.msra.mxu1 %v11775_v42  ;;  %6488 = vmatprep.subr.bf16.mxu0 %v11780_v56  ;;  %v11862_v42 = vld [vmem:[#allocation10 + $0xd0] ss:$8 sps:$4 sm:$0xff]  }
 0x5f4   :  { %6647 = vmatprep.subr.bf16.mxu1 %v11783_v2  ;;  %v11865_v56 = vld [vmem:[#allocation10 + $0x2d0] ss:$8 sps:$4 sm:$0xff]   ;;  %v11870_v2 = vld [vmem:[#allocation10 + $0xe4] ss:$8 sps:$4 sm:$0xff]  }
 0x5f6   :  { %6489 = vmatpush1.bf16.msra.mxu0 %v11778_v60  ;;  %v11873_v60 = vld [vmem:[#allocation10 + $0x2e4] ss:$8 sps:$4 sm:$0xff]  }
 0x5f7   :  { %6648 = vmatpush1.bf16.msra.mxu1 %v11781_v3  ;;  %7082 = vmatprep.subr.bf16.mxu0 %v11786_v57  ;;  %v11868_v3 = vld [vmem:[#allocation10 + $0xe0] ss:$8 sps:$4 sm:$0xff]  }
 0x5f8   :  { %7553 = vmatprep.subr.bf16.mxu1 %v11789_v5  ;;  %v11871_v57 = vld [vmem:[#allocation10 + $0x2e0] ss:$8 sps:$4 sm:$0xff]   ;;  %v11876_v5 = vld [vmem:[#allocation10 + $0xf4] ss:$8 sps:$4 sm:$0xff]  }
 0x5f9   :  { %6491 = vmatmul.mubr.bf16.vlgmr.msra.gmra.mrb[72].mxu0 %v13404_v26 }
 0x5fa   :  { %6650 = vmatmul.mubr.bf16.vlgmr.msra.gmra.mrb[72].mxu1 %v13404_v26  ;;  %9959 = vmatprep.mubr.msk.bf16.mxu0 %vm177_vm0, %v13394_v63  ;;  %v11804_v26 = vld [vmem:[#allocation10 + $0x34] ss:$8 sps:$4 sm:$0xff]  }
 0x5fb   :  { %9965 = vmatprep.mubr.msk.bf16.mxu1 %vm177_vm0, %v13394_v63  ;;  %7083 = vmatpush1.bf16.msra.mxu0 %v11784_v44  ;;  %v11802_v63 = vld [vmem:[#allocation10 + $0x30] ss:$8 sps:$4 sm:$0xff]   ;;  %v11879_v44 = vld [vmem:[#allocation10 + $0x2f4] ss:$8 sps:$4 sm:$0xff]  }
 0x5fc   :  { %7554 = vmatpush1.bf16.msra.mxu1 %v11787_v38  ;;  %7084 = vmatprep.subr.bf16.mxu0 %v11792_v4  ;;  %v11874_v38 = vld [vmem:[#allocation10 + $0xf0] ss:$8 sps:$4 sm:$0xff]  }
 0x5fd   :  { %7555 = vmatprep.subr.bf16.mxu1 %v11795_v30  ;;  %v11877_v4 = vld [vmem:[#allocation10 + $0x2f0] ss:$8 sps:$4 sm:$0xff]   ;;  %v11882_v30 = vld [vmem:[#allocation10 + $0x104] ss:$8 sps:$4 sm:$0xff]  }
 0x5ff   :  { %7085 = vmatpush1.bf16.msra.mxu0 %v11790_v59  ;;  %v11885_v59 = vld [vmem:[#allocation10 + $0x304] ss:$8 sps:$4 sm:$0xff]  }
 0x600   :  { %7556 = vmatpush1.bf16.msra.mxu1 %v11793_v24  ;;  %7086 = vmatprep.subr.bf16.mxu0 %v11798_v39  ;;  %v9762_v24 = vld [vmem:[%s13487_s8 + $0x8] sm:$0xf] }
 0x601   :  { %9960 = vmatmul.mubr.msk.bf16.gmra.mrb[76].mxu0 %vm177_vm0, %v13391_v62  ;;  %7557 = vmatprep.subr.bf16.mxu1 %v11801_v25  ;;  %v5375_v39 = vrot.slane %v9762_v24, %v12887_v9  ;;  %v5383_v25 = vrot.slane %v9762_v24, %v12889_v10 }
 0x602   :  { %9966 = vmatmul.mubr.msk.bf16.gmra.mrb[76].mxu1 %vm177_vm0, %v13391_v62  ;;  %v11817_v62 = vld [vmem:[#allocation10 + $0x250] ss:$8 sps:$4 sm:$0xff]  }
 0x603   :  { %7087 = vmatpush1.bf16.msra.mxu0 %v11796_v6  ;;  %v5379_v6 = vrot.slane %v9762_v24, %v12894_v12 }
 0x604   :  { %7558 = vmatpush1.bf16.msra.mxu1 %v11799_v61  ;;  %7088 = vmatprep.subr.bf16.mxu0 %v11804_v26  ;;  %v5387_v61 = vrot.slane %v9762_v24, %v12896_v13 }
 0x605   :  { %7559 = vmatprep.subr.bf16.mxu1 %v11807_v7 }
 0x607   :  { %7089 = vmatpush1.bf16.msra.mxu0 %v11802_v63 }
 0x608   :  { %7560 = vmatpush1.bf16.msra.mxu1 %v11805_v51  ;;  %7090 = vmatprep.subr.bf16.mxu0 %v11810_v35 }
 0x609   :  { %7561 = vmatprep.subr.bf16.mxu1 %v11813_v52 }
 0x60b   :  { %7091 = vmatpush1.bf16.msra.mxu0 %v11808_v0 }
 0x60c   :  { %7562 = vmatpush1.bf16.msra.mxu1 %v11811_v19  ;;  %7092 = vmatprep.subr.bf16.mxu0 %v11816_v21 }
 0x60d   :  { %7563 = vmatprep.subr.bf16.mxu1 %v11819_v37 }
 0x60f   :  { %7093 = vmatpush1.bf16.msra.mxu0 %v11814_v22 }
 0x610   :  { %7564 = vmatpush1.bf16.msra.mxu1 %v11817_v62  ;;  %7094 = vmatprep.subr.bf16.mxu0 %v11822_v29 }
 0x611   :  { %7565 = vmatprep.subr.bf16.mxu1 %v11825_v15 }
 0x613   :  { %7095 = vmatpush1.bf16.msra.mxu0 %v11820_v47 }
 0x614   :  { %7566 = vmatpush1.bf16.msra.mxu1 %v11823_v58  ;;  %7096 = vmatprep.subr.bf16.mxu0 %v11828_v23 }
 0x615   :  { %7567 = vmatprep.subr.bf16.mxu1 %v11831_v11 }
 0x617   :  { %7097 = vmatpush1.bf16.msra.mxu0 %v11826_v31 }
 0x618   :  { %7568 = vmatpush1.bf16.msra.mxu1 %v11829_v32  ;;  %7098 = vmatprep.subr.bf16.mxu0 %v11834_v17 }
 0x619   :  { %7569 = vmatprep.subr.bf16.mxu1 %v11837_v33 }
 0x61b   :  { %7099 = vmatpush1.bf16.msra.mxu0 %v11832_v20 }
 0x61c   :  { %7570 = vmatpush1.bf16.msra.mxu1 %v11835_v34  ;;  %7100 = vmatprep.subr.bf16.mxu0 %v11840_v36 }
 0x61d   :  { %7571 = vmatprep.subr.bf16.mxu1 %v11843_v40 }
 0x61f   :  { %7101 = vmatpush1.bf16.msra.mxu0 %v11838_v41 }
 0x620   :  { %7572 = vmatpush1.bf16.msra.mxu1 %v11841_v43  ;;  %7102 = vmatprep.subr.bf16.mxu0 %v11846_v46 }
 0x621   :  { %7573 = vmatprep.subr.bf16.mxu1 %v11849_v45 }
 0x623   :  { %7103 = vmatpush1.bf16.msra.mxu0 %v11844_v48 }
 0x624   :  { %7574 = vmatpush1.bf16.msra.mxu1 %v11847_v49  ;;  %7104 = vmatprep.subr.bf16.mxu0 %v11852_v18 }
 0x625   :  { %7575 = vmatprep.subr.bf16.mxu1 %v11855_v27 }
 0x627   :  { %7105 = vmatpush1.bf16.msra.mxu0 %v11850_v50 }
 0x628   :  { %7576 = vmatpush1.bf16.msra.mxu1 %v11853_v53  ;;  %7106 = vmatprep.subr.bf16.mxu0 %v11858_v54 }
 0x629   :  { %7577 = vmatprep.subr.bf16.mxu1 %v11861_v14 }
 0x62b   :  { %7107 = vmatpush1.bf16.msra.mxu0 %v11856_v28 }
 0x62c   :  { %7578 = vmatpush1.bf16.msra.mxu1 %v11859_v55  ;;  %7108 = vmatprep.subr.bf16.mxu0 %v11864_v1 }
 0x62d   :  { %7579 = vmatprep.subr.bf16.mxu1 %v11867_v16 }
 0x62f   :  { %7109 = vmatpush1.bf16.msra.mxu0 %v11862_v42 }
 0x630   :  { %7580 = vmatpush1.bf16.msra.mxu1 %v11865_v56  ;;  %7110 = vmatprep.subr.bf16.mxu0 %v11870_v2 }
 0x631   :  { %7581 = vmatprep.subr.bf16.mxu1 %v11873_v60 }
 0x633   :  { %7111 = vmatpush1.bf16.msra.mxu0 %v11868_v3 }
 0x634   :  { %7582 = vmatpush1.bf16.msra.mxu1 %v11871_v57  ;;  %7112 = vmatprep.subr.bf16.mxu0 %v11876_v5 }
 0x635   :  { %7583 = vmatprep.subr.bf16.mxu1 %v11879_v44 }
 0x637   :  { %7113 = vmatpush1.bf16.msra.mxu0 %v11874_v38 }
 0x638   :  { %7584 = vmatpush1.bf16.msra.mxu1 %v11877_v4  ;;  %7125 = vmatprep.subr.bf16.mxu0 %v11882_v30 }
 0x639   :  { %7596 = vmatprep.subr.bf16.mxu1 %v11885_v59 }
 0x6cc   :  { %v6492_v26 = vpop.f32.mrb[72].mxu0 }
 0x6cd   :  { %v10396_v7 = vadd.f32 %v6492_v26, %v5375_v39  ;;  %v6651_v63 = vpop.f32.mrb[72].mxu1  ;;  %v6494_v51 = vpop.f32.mrb[73].mxu0 }
 0x6ce   :  { %v10404_v35 = vadd.f32 %v6651_v63, %v5383_v25  ;;  %v10397_v52 = vadd.f32 %v6494_v51, %v5379_v6  ;;  %v6653_v0 = vpop.f32.mrb[73].mxu1  ;;  %v6496_v19 = vpop.f32.mrb[74].mxu0 }
 0x6cf   :  { %v10405_v21 = vadd.f32 %v6653_v0, %v5387_v61  ;;  %v10398_v37 = vadd.f32 %v6496_v19, %v5375_v39  ;;  %v6655_v22 = vpop.f32.mrb[74].mxu1  ;;  %v6498_v62 = vpop.f32.mrb[75].mxu0  ;;  %v6670_v58 = vmax.f32 %v10396_v7, 0.0  ;;  %v11889_v0 = vld [vmem:[#allocation10 + $0x310] ss:$8 sps:$4 sm:$0xff]  }
 0x6d0   :  { %v10406_v29 = vadd.f32 %v6655_v22, %v5383_v25  ;;  %v10399_v15 = vadd.f32 %v6498_v62, %v5379_v6  ;;  %v6657_v47 = vpop.f32.mrb[75].mxu1  ;;  %v6672_v31 = vmax.f32 %v10404_v35, 0.0  ;;  %v6671_v32 = vmax.f32 %v10397_v52, 0.0  ;;  %v11891_v35 = vld [vmem:[#allocation10 + $0x314] ss:$8 sps:$4 sm:$0xff]  }
 0x6d1   :  { %v6674_v23 = vmax.f32 %v10398_v37, 0.0  ;;  %v10407_v11 = vadd.f32 %v6657_v47, %v5387_v61  ;;  %v6673_v20 = vmax.f32 %v10405_v21, 0.0  ;;  %v11886_v52 = vld [vmem:[#allocation10 + $0x110] ss:$8 sps:$4 sm:$0xff]   ;;  %v11894_v19 = vld [vmem:[#allocation10 + $0x124] ss:$8 sps:$4 sm:$0xff]  }
 0x6d2   :  { %v6676_v17 = vmax.f32 %v10406_v29, 0.0  ;;  %v6675_v33 = vmax.f32 %v10399_v15, 0.0  ;;  %v11897_v21 = vld [vmem:[#allocation10 + $0x324] ss:$8 sps:$4 sm:$0xff]   ;;  %v11892_v37 = vld [vmem:[#allocation10 + $0x120] ss:$8 sps:$4 sm:$0xff]  }
 0x6d3   :  { %v6686_v34 = vmax.f32 %v6670_v58, %v6674_v23  ;;  %v6677_v36 = vmax.f32 %v10407_v11, 0.0  ;;  %v11895_v22 = vld [vmem:[#allocation10 + $0x320] ss:$8 sps:$4 sm:$0xff]   ;;  %v11900_v62 = vld [vmem:[#allocation10 + $0x134] ss:$8 sps:$4 sm:$0xff]  }
 0x6d4   :  { %v6688_v40 = vmax.f32 %v6672_v31, %v6676_v17  ;;  %v6687_v41 = vmax.f32 %v6671_v32, %v6675_v33  ;;  %v6502_v43 = vpop.f32.mrb[76].mxu0  ;;  %v11903_v29 = vld [vmem:[#allocation10 + $0x334] ss:$8 sps:$4 sm:$0xff]   ;;  %v11898_v15 = vld [vmem:[#allocation10 + $0x130] ss:$8 sps:$4 sm:$0xff]  }
 0x6d5   :  { %v6689_v46 = vmax.f32 %v6673_v20, %v6677_v36  ;;  %v10400_v45 = vadd.f32 %v6502_v43, %v5375_v39  ;;  %v6661_v48 = vpop.f32.mrb[76].mxu1  ;;  %v6504_v49 = vpop.f32.mrb[77].mxu0  ;;  %v11901_v47 = vld [vmem:[#allocation10 + $0x330] ss:$8 sps:$4 sm:$0xff]   ;;  %v11906_v58 = vld [vmem:[#allocation10 + $0x144] ss:$8 sps:$4 sm:$0xff]  }
 0x6d6   :  { %v10408_v18 = vadd.f32 %v6661_v48, %v5383_v25  ;;  %v10401_v27 = vadd.f32 %v6504_v49, %v5379_v6  ;;  %v6663_v50 = vpop.f32.mrb[77].mxu1  ;;  %v6506_v53 = vpop.f32.mrb[78].mxu0  ;;  %v11909_v23 = vld [vmem:[#allocation10 + $0x344] ss:$8 sps:$4 sm:$0xff]   ;;  %v11904_v11 = vld [vmem:[#allocation10 + $0x140] ss:$8 sps:$4 sm:$0xff]  }
 0x6d7   :  { %v10409_v54 = vadd.f32 %v6663_v50, %v5387_v61  ;;  %v10402_v14 = vadd.f32 %v6506_v53, %v5375_v39  ;;  %v6665_v28 = vpop.f32.mrb[78].mxu1  ;;  %v6508_v55 = vpop.f32.mrb[79].mxu0  ;;  %v6678_v56 = vmax.f32 %v10400_v45, 0.0  ;;  %v11907_v31 = vld [vmem:[#allocation10 + $0x340] ss:$8 sps:$4 sm:$0xff]  }
 0x6d8   :  { %v10410_v1 = vadd.f32 %v6665_v28, %v5383_v25  ;;  %v10403_v16 = vadd.f32 %v6508_v55, %v5379_v6  ;;  %v6667_v42 = vpop.f32.mrb[79].mxu1  ;;  %v6680_v3 = vmax.f32 %v10408_v18, 0.0  ;;  %v6679_v57 = vmax.f32 %v10401_v27, 0.0  ;;  %v11880_v25 = vld [vmem:[#allocation10 + $0x100] ss:$8 sps:$4 sm:$0xff]  }
 0x6d9   :  { %v6682_v2 = vmax.f32 %v10402_v14, 0.0  ;;  %v10411_v60 = vadd.f32 %v6667_v42, %v5387_v61  ;;  %v6681_v38 = vmax.f32 %v10409_v54, 0.0  ;;  %v11883_v6 = vld [vmem:[#allocation10 + $0x300] ss:$8 sps:$4 sm:$0xff]   ;;  %v11888_v61 = vld [vmem:[#allocation10 + $0x114] ss:$8 sps:$4 sm:$0xff]  }
 0x6da   :  { %v6684_v5 = vmax.f32 %v10410_v1, 0.0  ;;  %v6683_v44 = vmax.f32 %v10403_v16, 0.0  ;;  %v11912_v32 = vld [vmem:[#allocation10 + $0x154] ss:$8 sps:$4 sm:$0xff]   ;;  %v11910_v33 = vld [vmem:[#allocation10 + $0x150] ss:$8 sps:$4 sm:$0xff]  }
 0x6db   :  { %v6690_v4 = vmax.f32 %v6678_v56, %v6682_v2  ;;  %v6685_v30 = vmax.f32 %v10411_v60, 0.0  ;;  %v11915_v17 = vld [vmem:[#allocation10 + $0x354] ss:$8 sps:$4 sm:$0xff]   ;;  %v11913_v20 = vld [vmem:[#allocation10 + $0x350] ss:$8 sps:$4 sm:$0xff]  }
 0x6dc   :  { %v6692_v59 = vmax.f32 %v6680_v3, %v6684_v5  ;;  %v6691_v24 = vmax.f32 %v6679_v57, %v6683_v44  ;;  %v11921_v36 = vld [vmem:[#allocation10 + $0x364] ss:$8 sps:$4 sm:$0xff]   ;;  %v11924_v43 = vld [vmem:[#allocation10 + $0x174] ss:$8 sps:$4 sm:$0xff]   ;;  %v11922_v45 = vld [vmem:[#allocation10 + $0x170] ss:$8 sps:$4 sm:$0xff]  }
 0x6dd   :  { %v6694_v26 = vpack.c.bf16 %v6690_v4, %v6686_v34  ;;  %v6693_v7 = vmax.f32 %v6681_v38, %v6685_v30  ;;  %v11918_v34 = vld [vmem:[#allocation10 + $0x164] ss:$8 sps:$4 sm:$0xff]   ;;  %v11925_v48 = vld [vmem:[#allocation10 + $0x370] ss:$8 sps:$4 sm:$0xff]   ;;  %v11928_v27 = vld [vmem:[#allocation10 + $0x180] ss:$8 sps:$4 sm:$0xff]  }
 0x6de   :  { %v13433_v39 = vpack.c.bf16 %v6692_v59, %v6688_v40  ;;  %v6695_v63 = vpack.c.bf16 %v6691_v24, %v6687_v41  ;;  %v11916_v40 = vld [vmem:[#allocation10 + $0x160] ss:$8 sps:$4 sm:$0xff]   ;;  %v11930_v49 = vld [vmem:[#allocation10 + $0x184] ss:$8 sps:$4 sm:$0xff]   ;;  %v11936_v53 = vld [vmem:[#allocation10 + $0x194] ss:$8 sps:$4 sm:$0xff]  }
 0x6df   :  { %v6697_v51 = vpack.c.bf16 %v6693_v7, %v6689_v46  ;;  %v11919_v41 = vld [vmem:[#allocation10 + $0x360] ss:$8 sps:$4 sm:$0xff]   ;;  %v11927_v46 = vld [vmem:[#allocation10 + $0x374] ss:$8 sps:$4 sm:$0xff]   ;;  %v11933_v18 = vld [vmem:[#allocation10 + $0x384] ss:$8 sps:$4 sm:$0xff]  }
 0x6e0   :  { %7114 = vmatprep.mubr.bf16.mxu0 %v6695_v63  ;;  %7585 = vmatprep.mubr.bf16.mxu1 %v6695_v63  ;;  %v11931_v50 = vld [vmem:[#allocation10 + $0x380] ss:$8 sps:$4 sm:$0xff]   ;;  %v11939_v54 = vld [vmem:[#allocation10 + $0x394] ss:$8 sps:$4 sm:$0xff]   ;;  %v11934_v14 = vld [vmem:[#allocation10 + $0x190] ss:$8 sps:$4 sm:$0xff]  }
 0x6e1   :  { %7115 = vmatmul.mubr.bf16.vlgmr.msra.gmra.mrb[80].mxu0 %v6694_v26  ;;  %7586 = vmatmul.mubr.bf16.vlgmr.msra.gmra.mrb[80].mxu1 %v6694_v26  ;;  %v11937_v28 = vld [vmem:[#allocation10 + $0x390] ss:$8 sps:$4 sm:$0xff]   ;;  %v11942_v55 = vld [vmem:[#allocation10 + $0x1a4] ss:$8 sps:$4 sm:$0xff]   ;;  %v11940_v16 = vld [vmem:[#allocation10 + $0x1a0] ss:$8 sps:$4 sm:$0xff]  }
 0x6e2   :  { %7126 = vmatpush1.bf16.msra.mxu0 %v11880_v25  ;;  %7597 = vmatpush1.bf16.msra.mxu1 %v11883_v6  ;;  %v11945_v1 = vld [vmem:[#allocation10 + $0x3a4] ss:$8 sps:$4 sm:$0xff]   ;;  %v11943_v42 = vld [vmem:[#allocation10 + $0x3a0] ss:$8 sps:$4 sm:$0xff]   ;;  %v11948_v56 = vld [vmem:[#allocation10 + $0x1b4] ss:$8 sps:$4 sm:$0xff]  }
 0x6e3   :  { %7157 = vmatprep.mubr.bf16.mxu0 %v6697_v51  ;;  %7628 = vmatprep.mubr.bf16.mxu1 %v6697_v51  ;;  %v11951_v2 = vld [vmem:[#allocation10 + $0x3b4] ss:$8 sps:$4 sm:$0xff]   ;;  %v11946_v60 = vld [vmem:[#allocation10 + $0x1b0] ss:$8 sps:$4 sm:$0xff]   ;;  %v11954_v57 = vld [vmem:[#allocation10 + $0x1c4] ss:$8 sps:$4 sm:$0xff]  }
 0x6e4   :  { %7127 = vmatprep.subr.bf16.mxu0 %v11888_v61  ;;  %7598 = vmatprep.subr.bf16.mxu1 %v11891_v35  ;;  %v11949_v3 = vld [vmem:[#allocation10 + $0x3b0] ss:$8 sps:$4 sm:$0xff]   ;;  %v11957_v5 = vld [vmem:[#allocation10 + $0x3c4] ss:$8 sps:$4 sm:$0xff]   ;;  %v11952_v44 = vld [vmem:[#allocation10 + $0x1c0] ss:$8 sps:$4 sm:$0xff]  }
 0x6e5   :  { %v11955_v38 = vld [vmem:[#allocation10 + $0x3c0] ss:$8 sps:$4 sm:$0xff]   ;;  %v11960_v4 = vld [vmem:[#allocation10 + $0x1d4] ss:$8 sps:$4 sm:$0xff]   ;;  %v11958_v59 = vld [vmem:[#allocation10 + $0x1d0] ss:$8 sps:$4 sm:$0xff]  }
 0x6e6   :  { %7128 = vmatpush1.bf16.msra.mxu0 %v11886_v52  ;;  %7599 = vmatpush1.bf16.msra.mxu1 %v11889_v0  ;;  %v11963_v30 = vld [vmem:[#allocation10 + $0x3d4] ss:$8 sps:$4 sm:$0xff]   ;;  %v11961_v24 = vld [vmem:[#allocation10 + $0x3d0] ss:$8 sps:$4 sm:$0xff]   ;;  %v11966_v26 = vld [vmem:[#allocation10 + $0x1e4] ss:$8 sps:$4 sm:$0xff]  }
 0x6e7   :  { %7129 = vmatprep.subr.bf16.mxu0 %v11894_v19  ;;  %7600 = vmatprep.subr.bf16.mxu1 %v11897_v21  ;;  %v11969_v7 = vld [vmem:[#allocation10 + $0x3e4] ss:$8 sps:$4 sm:$0xff]   ;;  %v11964_v63 = vld [vmem:[#allocation10 + $0x1e0] ss:$8 sps:$4 sm:$0xff]   ;;  %v11972_v6 = vld [vmem:[#allocation10 + $0x1f4] ss:$8 sps:$4 sm:$0xff]  }
 0x6e8   :  { %v11967_v25 = vld [vmem:[#allocation10 + $0x3e0] ss:$8 sps:$4 sm:$0xff]   ;;  %v11975_v51 = vld [vmem:[#allocation10 + $0x3f4] ss:$8 sps:$4 sm:$0xff]   ;;  %v11970_v61 = vld [vmem:[#allocation10 + $0x1f0] ss:$8 sps:$4 sm:$0xff]  }
 0x6e9   :  { %v11973_v35 = vld [vmem:[#allocation10 + $0x3f0] ss:$8 sps:$4 sm:$0xff]   ;;  %v11978_v52 = vld [vmem:[#allocation7 + $0x4] ss:$16 sps:$4 sm:$0xff]   ;;  %v11981_v0 = vld [vmem:[#allocation7 + $0xc] ss:$16 sps:$4 sm:$0xff]  }
 0x6ea   :  { %7130 = vmatpush1.bf16.msra.mxu0 %v11892_v37  ;;  %7601 = vmatpush1.bf16.msra.mxu1 %v11895_v22  ;;  %v11976_v19 = vld [vmem:[#allocation7] ss:$16 sps:$4 sm:$0xff]   ;;  %v11979_v21 = vld [vmem:[#allocation7 + $0x8] ss:$16 sps:$4 sm:$0xff]   ;;  %v11984_v37 = vld [vmem:[#allocation7 + $0x24] ss:$16 sps:$4 sm:$0xff]  }
 0x6eb   :  { %7131 = vmatprep.subr.bf16.mxu0 %v11900_v62  ;;  %7602 = vmatprep.subr.bf16.mxu1 %v11903_v29  ;;  %v11987_v22 = vld [vmem:[#allocation7 + $0x2c] ss:$16 sps:$4 sm:$0xff]   ;;  %v11982_v62 = vld [vmem:[#allocation7 + $0x20] ss:$16 sps:$4 sm:$0xff]   ;;  %v11985_v29 = vld [vmem:[#allocation7 + $0x28] ss:$16 sps:$4 sm:$0xff]  }
 0x6ee   :  { %7132 = vmatpush1.bf16.msra.mxu0 %v11898_v15  ;;  %7603 = vmatpush1.bf16.msra.mxu1 %v11901_v47  ;;  %v11990_v15 = vld [vmem:[#allocation7 + $0x44] ss:$16 sps:$4 sm:$0xff]   ;;  %v11993_v47 = vld [vmem:[#allocation7 + $0x4c] ss:$16 sps:$4 sm:$0xff]  }
 0x6ef   :  { %7133 = vmatprep.subr.bf16.mxu0 %v11906_v58  ;;  %7604 = vmatprep.subr.bf16.mxu1 %v11909_v23  ;;  %v11988_v58 = vld [vmem:[#allocation7 + $0x40] ss:$16 sps:$4 sm:$0xff]   ;;  %v11991_v23 = vld [vmem:[#allocation7 + $0x48] ss:$16 sps:$4 sm:$0xff]  }
 0x6f2   :  { %7134 = vmatpush1.bf16.msra.mxu0 %v11904_v11  ;;  %7605 = vmatpush1.bf16.msra.mxu1 %v11907_v31  ;;  %v11996_v11 = vld [vmem:[#allocation7 + $0x64] ss:$16 sps:$4 sm:$0xff]   ;;  %v11999_v31 = vld [vmem:[#allocation7 + $0x6c] ss:$16 sps:$4 sm:$0xff]  }
 0x6f3   :  { %7135 = vmatprep.subr.bf16.mxu0 %v11912_v32  ;;  %7606 = vmatprep.subr.bf16.mxu1 %v11915_v17  ;;  %v11994_v32 = vld [vmem:[#allocation7 + $0x60] ss:$16 sps:$4 sm:$0xff]   ;;  %v12002_v17 = vld [vmem:[#allocation7 + $0x84] ss:$16 sps:$4 sm:$0xff]  }
 0x6f6   :  { %7136 = vmatpush1.bf16.msra.mxu0 %v11910_v33  ;;  %7607 = vmatpush1.bf16.msra.mxu1 %v11913_v20  ;;  %v12005_v33 = vld [vmem:[#allocation7 + $0x8c] ss:$16 sps:$4 sm:$0xff]   ;;  %v12000_v20 = vld [vmem:[#allocation7 + $0x80] ss:$16 sps:$4 sm:$0xff]  }
 0x6f7   :  { %7137 = vmatprep.subr.bf16.mxu0 %v11918_v34  ;;  %7608 = vmatprep.subr.bf16.mxu1 %v11921_v36  ;;  %v12003_v34 = vld [vmem:[#allocation7 + $0x88] ss:$16 sps:$4 sm:$0xff]   ;;  %v12008_v36 = vld [vmem:[#allocation7 + $0xa4] ss:$16 sps:$4 sm:$0xff]  }
 0x6fa   :  { %7138 = vmatpush1.bf16.msra.mxu0 %v11916_v40  ;;  %7609 = vmatpush1.bf16.msra.mxu1 %v11919_v41  ;;  %v12011_v40 = vld [vmem:[#allocation7 + $0xac] ss:$16 sps:$4 sm:$0xff]   ;;  %v12006_v41 = vld [vmem:[#allocation7 + $0xa0] ss:$16 sps:$4 sm:$0xff]  }
 0x6fb   :  { %7139 = vmatprep.subr.bf16.mxu0 %v11924_v43  ;;  %7610 = vmatprep.subr.bf16.mxu1 %v11927_v46  ;;  %v12009_v43 = vld [vmem:[#allocation7 + $0xa8] ss:$16 sps:$4 sm:$0xff]   ;;  %v12014_v46 = vld [vmem:[#allocation7 + $0xc4] ss:$16 sps:$4 sm:$0xff]  }
 0x6fe   :  { %7140 = vmatpush1.bf16.msra.mxu0 %v11922_v45  ;;  %7611 = vmatpush1.bf16.msra.mxu1 %v11925_v48  ;;  %v12017_v45 = vld [vmem:[#allocation7 + $0xcc] ss:$16 sps:$4 sm:$0xff]   ;;  %v12012_v48 = vld [vmem:[#allocation7 + $0xc0] ss:$16 sps:$4 sm:$0xff]  }
 0x6ff   :  { %7141 = vmatprep.subr.bf16.mxu0 %v11930_v49  ;;  %7612 = vmatprep.subr.bf16.mxu1 %v11933_v18  ;;  %v12015_v49 = vld [vmem:[#allocation7 + $0xc8] ss:$16 sps:$4 sm:$0xff]   ;;  %v12020_v18 = vld [vmem:[#allocation7 + $0xe4] ss:$16 sps:$4 sm:$0xff]  }
 0x702   :  { %7142 = vmatpush1.bf16.msra.mxu0 %v11928_v27  ;;  %7613 = vmatpush1.bf16.msra.mxu1 %v11931_v50  ;;  %v12023_v27 = vld [vmem:[#allocation7 + $0xec] ss:$16 sps:$4 sm:$0xff]   ;;  %v12018_v50 = vld [vmem:[#allocation7 + $0xe0] ss:$16 sps:$4 sm:$0xff]  }
 0x703   :  { %7143 = vmatprep.subr.bf16.mxu0 %v11936_v53  ;;  %7614 = vmatprep.subr.bf16.mxu1 %v11939_v54  ;;  %v12021_v53 = vld [vmem:[#allocation7 + $0xe8] ss:$16 sps:$4 sm:$0xff]   ;;  %v12026_v54 = vld [vmem:[#allocation7 + $0x104] ss:$16 sps:$4 sm:$0xff]  }
 0x706   :  { %7144 = vmatpush1.bf16.msra.mxu0 %v11934_v14  ;;  %7615 = vmatpush1.bf16.msra.mxu1 %v11937_v28  ;;  %v12029_v14 = vld [vmem:[#allocation7 + $0x10c] ss:$16 sps:$4 sm:$0xff]   ;;  %v12024_v28 = vld [vmem:[#allocation7 + $0x100] ss:$16 sps:$4 sm:$0xff]  }
 0x707   :  { %7145 = vmatprep.subr.bf16.mxu0 %v11942_v55  ;;  %7616 = vmatprep.subr.bf16.mxu1 %v11945_v1  ;;  %v12027_v55 = vld [vmem:[#allocation7 + $0x108] ss:$16 sps:$4 sm:$0xff]   ;;  %v12032_v1 = vld [vmem:[#allocation7 + $0x124] ss:$16 sps:$4 sm:$0xff]  }
 0x70a   :  { %7146 = vmatpush1.bf16.msra.mxu0 %v11940_v16  ;;  %7617 = vmatpush1.bf16.msra.mxu1 %v11943_v42  ;;  %v12035_v16 = vld [vmem:[#allocation7 + $0x12c] ss:$16 sps:$4 sm:$0xff]   ;;  %v12030_v42 = vld [vmem:[#allocation7 + $0x120] ss:$16 sps:$4 sm:$0xff]  }
 0x70b   :  { %7147 = vmatprep.subr.bf16.mxu0 %v11948_v56  ;;  %7618 = vmatprep.subr.bf16.mxu1 %v11951_v2  ;;  %v12033_v56 = vld [vmem:[#allocation7 + $0x128] ss:$16 sps:$4 sm:$0xff]   ;;  %v12038_v2 = vld [vmem:[#allocation7 + $0x144] ss:$16 sps:$4 sm:$0xff]  }
 0x70e   :  { %7148 = vmatpush1.bf16.msra.mxu0 %v11946_v60  ;;  %7619 = vmatpush1.bf16.msra.mxu1 %v11949_v3  ;;  %v12041_v60 = vld [vmem:[#allocation7 + $0x14c] ss:$16 sps:$4 sm:$0xff]   ;;  %v12036_v3 = vld [vmem:[#allocation7 + $0x140] ss:$16 sps:$4 sm:$0xff]  }
 0x70f   :  { %7149 = vmatprep.subr.bf16.mxu0 %v11954_v57  ;;  %7620 = vmatprep.subr.bf16.mxu1 %v11957_v5  ;;  %v12039_v57 = vld [vmem:[#allocation7 + $0x148] ss:$16 sps:$4 sm:$0xff]   ;;  %v12044_v5 = vld [vmem:[#allocation7 + $0x164] ss:$16 sps:$4 sm:$0xff]  }
 0x712   :  { %7150 = vmatpush1.bf16.msra.mxu0 %v11952_v44  ;;  %7621 = vmatpush1.bf16.msra.mxu1 %v11955_v38  ;;  %v12047_v44 = vld [vmem:[#allocation7 + $0x16c] ss:$16 sps:$4 sm:$0xff]   ;;  %v12042_v38 = vld [vmem:[#allocation7 + $0x160] ss:$16 sps:$4 sm:$0xff]  }
 0x713   :  { %7151 = vmatprep.subr.bf16.mxu0 %v11960_v4  ;;  %7622 = vmatprep.subr.bf16.mxu1 %v11963_v30  ;;  %v12045_v4 = vld [vmem:[#allocation7 + $0x168] ss:$16 sps:$4 sm:$0xff]   ;;  %v12050_v30 = vld [vmem:[#allocation7 + $0x184] ss:$16 sps:$4 sm:$0xff]  }
 0x716   :  { %7152 = vmatpush1.bf16.msra.mxu0 %v11958_v59  ;;  %7623 = vmatpush1.bf16.msra.mxu1 %v11961_v24  ;;  %v12053_v59 = vld [vmem:[#allocation7 + $0x18c] ss:$16 sps:$4 sm:$0xff]   ;;  %v12048_v24 = vld [vmem:[#allocation7 + $0x180] ss:$16 sps:$4 sm:$0xff]  }
 0x717   :  { %7153 = vmatprep.subr.bf16.mxu0 %v11966_v26  ;;  %7624 = vmatprep.subr.bf16.mxu1 %v11969_v7  ;;  %v12051_v26 = vld [vmem:[#allocation7 + $0x188] ss:$16 sps:$4 sm:$0xff]   ;;  %v12056_v7 = vld [vmem:[#allocation7 + $0x1a4] ss:$16 sps:$4 sm:$0xff]  }
 0x71a   :  { %7154 = vmatpush1.bf16.msra.mxu0 %v11964_v63  ;;  %7625 = vmatpush1.bf16.msra.mxu1 %v11967_v25  ;;  %v12059_v63 = vld [vmem:[#allocation7 + $0x1ac] ss:$16 sps:$4 sm:$0xff]   ;;  %v12054_v25 = vld [vmem:[#allocation7 + $0x1a0] ss:$16 sps:$4 sm:$0xff]  }
 0x71b   :  { %7155 = vmatprep.subr.bf16.mxu0 %v11972_v6  ;;  %7626 = vmatprep.subr.bf16.mxu1 %v11975_v51  ;;  %v12057_v6 = vld [vmem:[#allocation7 + $0x1a8] ss:$16 sps:$4 sm:$0xff]   ;;  %v12062_v51 = vld [vmem:[#allocation7 + $0x1c4] ss:$16 sps:$4 sm:$0xff]  }
 0x71e   :  { %7156 = vmatpush1.bf16.msra.mxu0 %v11970_v61  ;;  %7627 = vmatpush1.bf16.msra.mxu1 %v11973_v35  ;;  %v12065_v61 = vld [vmem:[#allocation7 + $0x1cc] ss:$16 sps:$4 sm:$0xff]   ;;  %v12060_v35 = vld [vmem:[#allocation7 + $0x1c0] ss:$16 sps:$4 sm:$0xff]  }
 0x71f   :  { %8834 = vmatprep.subr.bf16.mxu0 %v11978_v52  ;;  %8963 = vmatprep.subr.bf16.mxu1 %v11981_v0  ;;  %v12063_v52 = vld [vmem:[#allocation7 + $0x1c8] ss:$16 sps:$4 sm:$0xff]   ;;  %v12068_v0 = vld [vmem:[#allocation7 + $0x1e4] ss:$16 sps:$4 sm:$0xff]  }
 0x721   :  { %7158 = vmatmul.mubr.bf16.vlgmr.msra.gmra.mrb[80].mxu0 %v13433_v39  ;;  %7629 = vmatmul.mubr.bf16.vlgmr.msra.gmra.mrb[80].mxu1 %v13433_v39  ;;  %v11997_v39 = vld [vmem:[#allocation7 + $0x68] ss:$16 sps:$4 sm:$0xff]  }
 0x722   :  { %8835 = vmatpush1.bf16.msra.mxu0 %v11976_v19  ;;  %8964 = vmatpush1.bf16.msra.mxu1 %v11979_v21  ;;  %v12071_v19 = vld [vmem:[#allocation7 + $0x1ec] ss:$16 sps:$4 sm:$0xff]   ;;  %v12066_v21 = vld [vmem:[#allocation7 + $0x1e0] ss:$16 sps:$4 sm:$0xff]  }
 0x723   :  { %8836 = vmatprep.subr.bf16.mxu0 %v11984_v37  ;;  %8965 = vmatprep.subr.bf16.mxu1 %v11987_v22  ;;  %v12069_v37 = vld [vmem:[#allocation7 + $0x1e8] ss:$16 sps:$4 sm:$0xff]   ;;  %v12074_v22 = vld [vmem:[#allocation7 + $0x204] ss:$16 sps:$4 sm:$0xff]  }
 0x726   :  { %8837 = vmatpush1.bf16.msra.mxu0 %v11982_v62  ;;  %8966 = vmatpush1.bf16.msra.mxu1 %v11985_v29  ;;  %v12077_v62 = vld [vmem:[#allocation7 + $0x20c] ss:$16 sps:$4 sm:$0xff]  }
 0x727   :  { %8838 = vmatprep.subr.bf16.mxu0 %v11990_v15  ;;  %8967 = vmatprep.subr.bf16.mxu1 %v11993_v47 }
 0x72a   :  { %8839 = vmatpush1.bf16.msra.mxu0 %v11988_v58  ;;  %8968 = vmatpush1.bf16.msra.mxu1 %v11991_v23 }
 0x72b   :  { %8840 = vmatprep.subr.bf16.mxu0 %v11996_v11  ;;  %8969 = vmatprep.subr.bf16.mxu1 %v11999_v31 }
 0x72e   :  { %8841 = vmatpush1.bf16.msra.mxu0 %v11994_v32  ;;  %8970 = vmatpush1.bf16.msra.mxu1 %v11997_v39 }
 0x72f   :  { %8842 = vmatprep.subr.bf16.mxu0 %v12002_v17  ;;  %8971 = vmatprep.subr.bf16.mxu1 %v12005_v33 }
 0x732   :  { %8843 = vmatpush1.bf16.msra.mxu0 %v12000_v20  ;;  %8972 = vmatpush1.bf16.msra.mxu1 %v12003_v34 }
 0x733   :  { %8844 = vmatprep.subr.bf16.mxu0 %v12008_v36  ;;  %8973 = vmatprep.subr.bf16.mxu1 %v12011_v40 }
 0x736   :  { %8845 = vmatpush1.bf16.msra.mxu0 %v12006_v41  ;;  %8974 = vmatpush1.bf16.msra.mxu1 %v12009_v43  ;;  %v12072_v41 = vld [vmem:[#allocation7 + $0x200] ss:$16 sps:$4 sm:$0xff]   ;;  %v12075_v43 = vld [vmem:[#allocation7 + $0x208] ss:$16 sps:$4 sm:$0xff]  }
 0x737   :  { %8846 = vmatprep.subr.bf16.mxu0 %v12014_v46  ;;  %8975 = vmatprep.subr.bf16.mxu1 %v12017_v45  ;;  %v12080_v45 = vld [vmem:[#allocation7 + $0x224] ss:$16 sps:$4 sm:$0xff]  }
 0x73a   :  { %8847 = vmatpush1.bf16.msra.mxu0 %v12012_v48  ;;  %8976 = vmatpush1.bf16.msra.mxu1 %v12015_v49  ;;  %v12083_v48 = vld [vmem:[#allocation7 + $0x22c] ss:$16 sps:$4 sm:$0xff]   ;;  %v12078_v49 = vld [vmem:[#allocation7 + $0x220] ss:$16 sps:$4 sm:$0xff]  }
 0x73b   :  { %8848 = vmatprep.subr.bf16.mxu0 %v12020_v18  ;;  %8977 = vmatprep.subr.bf16.mxu1 %v12023_v27  ;;  %v12081_v18 = vld [vmem:[#allocation7 + $0x228] ss:$16 sps:$4 sm:$0xff]   ;;  %v12086_v27 = vld [vmem:[#allocation7 + $0x244] ss:$16 sps:$4 sm:$0xff]  }
 0x73e   :  { %8849 = vmatpush1.bf16.msra.mxu0 %v12018_v50  ;;  %8978 = vmatpush1.bf16.msra.mxu1 %v12021_v53  ;;  %v12089_v50 = vld [vmem:[#allocation7 + $0x24c] ss:$16 sps:$4 sm:$0xff]   ;;  %v12084_v53 = vld [vmem:[#allocation7 + $0x240] ss:$16 sps:$4 sm:$0xff]  }
 0x73f   :  { %8850 = vmatprep.subr.bf16.mxu0 %v12026_v54  ;;  %8979 = vmatprep.subr.bf16.mxu1 %v12029_v14  ;;  %v12087_v54 = vld [vmem:[#allocation7 + $0x248] ss:$16 sps:$4 sm:$0xff]   ;;  %v12092_v14 = vld [vmem:[#allocation7 + $0x264] ss:$16 sps:$4 sm:$0xff]  }
 0x742   :  { %8851 = vmatpush1.bf16.msra.mxu0 %v12024_v28  ;;  %8980 = vmatpush1.bf16.msra.mxu1 %v12027_v55  ;;  %v12095_v28 = vld [vmem:[#allocation7 + $0x26c] ss:$16 sps:$4 sm:$0xff]   ;;  %v12093_v55 = vld [vmem:[#allocation7 + $0x268] ss:$16 sps:$4 sm:$0xff]  }
 0x743   :  { %8852 = vmatprep.subr.bf16.mxu0 %v12032_v1  ;;  %8981 = vmatprep.subr.bf16.mxu1 %v12035_v16  ;;  %v12098_v1 = vld [vmem:[#allocation7 + $0x284] ss:$16 sps:$4 sm:$0xff]   ;;  %v12101_v16 = vld [vmem:[#allocation7 + $0x28c] ss:$16 sps:$4 sm:$0xff]  }
 0x746   :  { %8853 = vmatpush1.bf16.msra.mxu0 %v12030_v42  ;;  %8982 = vmatpush1.bf16.msra.mxu1 %v12033_v56  ;;  %v12096_v42 = vld [vmem:[#allocation7 + $0x280] ss:$16 sps:$4 sm:$0xff]   ;;  %v12099_v56 = vld [vmem:[#allocation7 + $0x288] ss:$16 sps:$4 sm:$0xff]  }
 0x747   :  { %8854 = vmatprep.subr.bf16.mxu0 %v12038_v2  ;;  %8983 = vmatprep.subr.bf16.mxu1 %v12041_v60  ;;  %v12104_v2 = vld [vmem:[#allocation7 + $0x2a4] ss:$16 sps:$4 sm:$0xff]   ;;  %v12107_v60 = vld [vmem:[#allocation7 + $0x2ac] ss:$16 sps:$4 sm:$0xff]  }
 0x74a   :  { %8855 = vmatpush1.bf16.msra.mxu0 %v12036_v3  ;;  %8984 = vmatpush1.bf16.msra.mxu1 %v12039_v57  ;;  %v12102_v3 = vld [vmem:[#allocation7 + $0x2a0] ss:$16 sps:$4 sm:$0xff]   ;;  %v12105_v57 = vld [vmem:[#allocation7 + $0x2a8] ss:$16 sps:$4 sm:$0xff]  }
 0x74b   :  { %8856 = vmatprep.subr.bf16.mxu0 %v12044_v5  ;;  %8985 = vmatprep.subr.bf16.mxu1 %v12047_v44  ;;  %v12110_v5 = vld [vmem:[#allocation7 + $0x2c4] ss:$16 sps:$4 sm:$0xff]   ;;  %v12113_v44 = vld [vmem:[#allocation7 + $0x2cc] ss:$16 sps:$4 sm:$0xff]  }
 0x74e   :  { %8857 = vmatpush1.bf16.msra.mxu0 %v12042_v38  ;;  %8986 = vmatpush1.bf16.msra.mxu1 %v12045_v4  ;;  %v12108_v38 = vld [vmem:[#allocation7 + $0x2c0] ss:$16 sps:$4 sm:$0xff]   ;;  %v12111_v4 = vld [vmem:[#allocation7 + $0x2c8] ss:$16 sps:$4 sm:$0xff]  }
 0x74f   :  { %8858 = vmatprep.subr.bf16.mxu0 %v12050_v30  ;;  %8987 = vmatprep.subr.bf16.mxu1 %v12053_v59  ;;  %v12116_v30 = vld [vmem:[#allocation7 + $0x2e4] ss:$16 sps:$4 sm:$0xff]   ;;  %v12119_v59 = vld [vmem:[#allocation7 + $0x2ec] ss:$16 sps:$4 sm:$0xff]  }
 0x752   :  { %8859 = vmatpush1.bf16.msra.mxu0 %v12048_v24  ;;  %8988 = vmatpush1.bf16.msra.mxu1 %v12051_v26  ;;  %v12114_v24 = vld [vmem:[#allocation7 + $0x2e0] ss:$16 sps:$4 sm:$0xff]   ;;  %v12117_v26 = vld [vmem:[#allocation7 + $0x2e8] ss:$16 sps:$4 sm:$0xff]  }
 0x753   :  { %8860 = vmatprep.subr.bf16.mxu0 %v12056_v7  ;;  %8989 = vmatprep.subr.bf16.mxu1 %v12059_v63  ;;  %v12122_v7 = vld [vmem:[#allocation7 + $0x304] ss:$16 sps:$4 sm:$0xff]   ;;  %v12125_v63 = vld [vmem:[#allocation7 + $0x30c] ss:$16 sps:$4 sm:$0xff]  }
 0x756   :  { %8861 = vmatpush1.bf16.msra.mxu0 %v12054_v25  ;;  %8990 = vmatpush1.bf16.msra.mxu1 %v12057_v6  ;;  %v12120_v25 = vld [vmem:[#allocation7 + $0x300] ss:$16 sps:$4 sm:$0xff]   ;;  %v12123_v6 = vld [vmem:[#allocation7 + $0x308] ss:$16 sps:$4 sm:$0xff]  }
 0x757   :  { %8862 = vmatprep.subr.bf16.mxu0 %v12062_v51  ;;  %8991 = vmatprep.subr.bf16.mxu1 %v12065_v61  ;;  %v12128_v51 = vld [vmem:[#allocation7 + $0x324] ss:$16 sps:$4 sm:$0xff]   ;;  %v12131_v61 = vld [vmem:[#allocation7 + $0x32c] ss:$16 sps:$4 sm:$0xff]  }
 0x75a   :  { %8863 = vmatpush1.bf16.msra.mxu0 %v12060_v35  ;;  %8992 = vmatpush1.bf16.msra.mxu1 %v12063_v52  ;;  %v12126_v35 = vld [vmem:[#allocation7 + $0x320] ss:$16 sps:$4 sm:$0xff]   ;;  %v12129_v52 = vld [vmem:[#allocation7 + $0x328] ss:$16 sps:$4 sm:$0xff]  }
 0x75b   :  { %8864 = vmatprep.subr.bf16.mxu0 %v12068_v0  ;;  %8993 = vmatprep.subr.bf16.mxu1 %v12071_v19  ;;  %v12134_v0 = vld [vmem:[#allocation7 + $0x344] ss:$16 sps:$4 sm:$0xff]   ;;  %v12137_v19 = vld [vmem:[#allocation7 + $0x34c] ss:$16 sps:$4 sm:$0xff]  }
 0x75e   :  { %8865 = vmatpush1.bf16.msra.mxu0 %v12066_v21  ;;  %8994 = vmatpush1.bf16.msra.mxu1 %v12069_v37  ;;  %v12132_v21 = vld [vmem:[#allocation7 + $0x340] ss:$16 sps:$4 sm:$0xff]   ;;  %v12135_v37 = vld [vmem:[#allocation7 + $0x348] ss:$16 sps:$4 sm:$0xff]  }
 0x75f   :  { %8877 = vmatprep.subr.bf16.mxu0 %v12074_v22  ;;  %9006 = vmatprep.subr.bf16.mxu1 %v12077_v62  ;;  %v12140_v22 = vld [vmem:[#allocation7 + $0x364] ss:$16 sps:$4 sm:$0xff]   ;;  %v12143_v62 = vld [vmem:[#allocation7 + $0x36c] ss:$16 sps:$4 sm:$0xff]  }
 0x7f4   :  { %v7159_v29 = vpop.f32.mrb[80].mxu0  ;;  %v7630_v15 = vpop.f32.mrb[80].mxu1 }
 0x7f5   :  { %v7639_v47 = vmax.f32 %v7159_v29, %v7630_v15  ;;  %v7161_v58 = vpop.f32.mrb[81].mxu0  ;;  %v7632_v23 = vpop.f32.mrb[81].mxu1  ;;  %v12138_v29 = vld [vmem:[#allocation7 + $0x360] ss:$16 sps:$4 sm:$0xff]   ;;  %v12141_v15 = vld [vmem:[#allocation7 + $0x368] ss:$16 sps:$4 sm:$0xff]  }
 0x7f6   :  { %v7640_v11 = vmax.f32 %v7161_v58, %v7632_v23  ;;  %v7163_v31 = vpop.f32.mrb[82].mxu0  ;;  %v7634_v32 = vpop.f32.mrb[82].mxu1  ;;  %v12149_v58 = vld [vmem:[#allocation7 + $0x38c] ss:$16 sps:$4 sm:$0xff]   ;;  %v12144_v23 = vld [vmem:[#allocation7 + $0x380] ss:$16 sps:$4 sm:$0xff]  }
 0x7f7   :  { %v7641_v39 = vmax.f32 %v7163_v31, %v7634_v32  ;;  %v7165_v17 = vpop.f32.mrb[83].mxu0  ;;  %v7636_v33 = vpop.f32.mrb[83].mxu1  ;;  %v12152_v31 = vld [vmem:[#allocation7 + $0x3a4] ss:$16 sps:$4 sm:$0xff]   ;;  %v12155_v32 = vld [vmem:[#allocation7 + $0x3ac] ss:$16 sps:$4 sm:$0xff]  }
 0x7f8   :  { %v7642_v20 = vmax.f32 %v7165_v17, %v7636_v33  ;;  %v12153_v17 = vld [vmem:[#allocation7 + $0x3a8] ss:$16 sps:$4 sm:$0xff]   ;;  %v12158_v33 = vld [vmem:[#allocation7 + $0x3c4] ss:$16 sps:$4 sm:$0xff]  }
 0x7f9   :  { %v13437_v34 = vpack.c.bf16 %v7641_v39, %v7639_v47  ;;  %v12146_v47 = vld [vmem:[#allocation7 + $0x384] ss:$16 sps:$4 sm:$0xff]   ;;  %v12150_v39 = vld [vmem:[#allocation7 + $0x3a0] ss:$16 sps:$4 sm:$0xff]  }
 0x7fa   :  { %v7644_v36 = vpack.c.bf16 %v7642_v20, %v7640_v11  ;;  %v12147_v11 = vld [vmem:[#allocation7 + $0x388] ss:$16 sps:$4 sm:$0xff]   ;;  %v12161_v20 = vld [vmem:[#allocation7 + $0x3cc] ss:$16 sps:$4 sm:$0xff]  }
 0x7fb   :  { %v13442_v46 = vrot.slane %v13437_v34, 4 }
 0x7fc   :  { %v13439_v40 = vrot.slane %v7644_v36, 4 }
 0x7fe   :  { %10289 = vmatprep.mubr.msk.bf16.mxu0 %vm12579_vm1, %v13439_v40  ;;  %10295 = vmatprep.mubr.msk.bf16.mxu1 %vm12579_vm1, %v13439_v40 }
 0x7ff   :  { %10291 = vmatmul.mubr.msk.bf16.vlgmr.msra.gmra.mrb[84].mxu0 %vm12579_vm1, %v13442_v46  ;;  %10297 = vmatmul.mubr.msk.bf16.vlgmr.msra.gmra.mrb[84].mxu1 %vm12579_vm1, %v13442_v46 }
 0x800   :  { %8878 = vmatpush1.bf16.msra.mxu0 %v12072_v41  ;;  %9007 = vmatpush1.bf16.msra.mxu1 %v12075_v43  ;;  %v12159_v41 = vld [vmem:[#allocation7 + $0x3c8] ss:$16 sps:$4 sm:$0xff]   ;;  %v12164_v43 = vld [vmem:[#allocation7 + $0x3e4] ss:$16 sps:$4 sm:$0xff]  }
 0x801   :  { %8909 = vmatprep.mubr.bf16.mxu0 %v7644_v36  ;;  %9038 = vmatprep.mubr.bf16.mxu1 %v7644_v36  ;;  %v12156_v36 = vld [vmem:[#allocation7 + $0x3c0] ss:$16 sps:$4 sm:$0xff]  }
 0x802   :  { %8879 = vmatprep.subr.bf16.mxu0 %v12080_v45  ;;  %9008 = vmatprep.subr.bf16.mxu1 %v12083_v48  ;;  %v12167_v45 = vld [vmem:[#allocation7 + $0x3ec] ss:$16 sps:$4 sm:$0xff]   ;;  %v12162_v48 = vld [vmem:[#allocation7 + $0x3e0] ss:$16 sps:$4 sm:$0xff]  }
 0x804   :  { %8880 = vmatpush1.bf16.msra.mxu0 %v12078_v49  ;;  %9009 = vmatpush1.bf16.msra.mxu1 %v12081_v18  ;;  %v12165_v49 = vld [vmem:[#allocation7 + $0x3e8] ss:$16 sps:$4 sm:$0xff]   ;;  %v12170_v18 = vld [vmem:[#allocation7 + $0x404] ss:$16 sps:$4 sm:$0xff]  }
 0x805   :  { %8881 = vmatprep.subr.bf16.mxu0 %v12086_v27  ;;  %9010 = vmatprep.subr.bf16.mxu1 %v12089_v50  ;;  %v12173_v27 = vld [vmem:[#allocation7 + $0x40c] ss:$16 sps:$4 sm:$0xff]   ;;  %v12168_v50 = vld [vmem:[#allocation7 + $0x400] ss:$16 sps:$4 sm:$0xff]  }
 0x808   :  { %8882 = vmatpush1.bf16.msra.mxu0 %v12084_v53  ;;  %9011 = vmatpush1.bf16.msra.mxu1 %v12087_v54  ;;  %v12171_v53 = vld [vmem:[#allocation7 + $0x408] ss:$16 sps:$4 sm:$0xff]   ;;  %v12176_v54 = vld [vmem:[#allocation7 + $0x424] ss:$16 sps:$4 sm:$0xff]  }
 0x809   :  { %8883 = vmatprep.subr.bf16.mxu0 %v12092_v14  ;;  %9012 = vmatprep.subr.bf16.mxu1 %v12095_v28  ;;  %v12179_v14 = vld [vmem:[#allocation7 + $0x42c] ss:$16 sps:$4 sm:$0xff]   ;;  %v12174_v28 = vld [vmem:[#allocation7 + $0x420] ss:$16 sps:$4 sm:$0xff]  }
 0x80c   :  { %8884 = vmatpush1.bf16.msra.mxu0 %v12090_v8  ;;  %9013 = vmatpush1.bf16.msra.mxu1 %v12093_v55  ;;  %v12177_v8 = vld [vmem:[#allocation7 + $0x428] ss:$16 sps:$4 sm:$0xff]   ;;  %v12182_v55 = vld [vmem:[#allocation7 + $0x444] ss:$16 sps:$4 sm:$0xff]  }
 0x80d   :  { %8885 = vmatprep.subr.bf16.mxu0 %v12098_v1  ;;  %9014 = vmatprep.subr.bf16.mxu1 %v12101_v16  ;;  %v12185_v1 = vld [vmem:[#allocation7 + $0x44c] ss:$16 sps:$4 sm:$0xff]   ;;  %v12180_v16 = vld [vmem:[#allocation7 + $0x440] ss:$16 sps:$4 sm:$0xff]  }
 0x810   :  { %8886 = vmatpush1.bf16.msra.mxu0 %v12096_v42  ;;  %9015 = vmatpush1.bf16.msra.mxu1 %v12099_v56  ;;  %v12183_v42 = vld [vmem:[#allocation7 + $0x448] ss:$16 sps:$4 sm:$0xff]   ;;  %v12191_v56 = vld [vmem:[#allocation7 + $0x46c] ss:$16 sps:$4 sm:$0xff]  }
 0x811   :  { %8887 = vmatprep.subr.bf16.mxu0 %v12104_v2  ;;  %9016 = vmatprep.subr.bf16.mxu1 %v12107_v60  ;;  %v12186_v2 = vld [vmem:[#allocation7 + $0x460] ss:$16 sps:$4 sm:$0xff]   ;;  %v12189_v60 = vld [vmem:[#allocation7 + $0x468] ss:$16 sps:$4 sm:$0xff]  }
 0x814   :  { %8888 = vmatpush1.bf16.msra.mxu0 %v12102_v3  ;;  %9017 = vmatpush1.bf16.msra.mxu1 %v12105_v57  ;;  %v12194_v3 = vld [vmem:[#allocation7 + $0x484] ss:$16 sps:$4 sm:$0xff]   ;;  %v12192_v57 = vld [vmem:[#allocation7 + $0x480] ss:$16 sps:$4 sm:$0xff]  }
 0x815   :  { %8889 = vmatprep.subr.bf16.mxu0 %v12110_v5  ;;  %9018 = vmatprep.subr.bf16.mxu1 %v12113_v44  ;;  %v12195_v5 = vld [vmem:[#allocation7 + $0x488] ss:$16 sps:$4 sm:$0xff]   ;;  %v12200_v44 = vld [vmem:[#allocation7 + $0x4a4] ss:$16 sps:$4 sm:$0xff]  }
 0x818   :  { %8890 = vmatpush1.bf16.msra.mxu0 %v12108_v38  ;;  %9019 = vmatpush1.bf16.msra.mxu1 %v12111_v4  ;;  %v12203_v38 = vld [vmem:[#allocation7 + $0x4ac] ss:$16 sps:$4 sm:$0xff]   ;;  %v12198_v4 = vld [vmem:[#allocation7 + $0x4a0] ss:$16 sps:$4 sm:$0xff]  }
 0x819   :  { %8891 = vmatprep.subr.bf16.mxu0 %v12116_v30  ;;  %9020 = vmatprep.subr.bf16.mxu1 %v12119_v59  ;;  %v12201_v30 = vld [vmem:[#allocation7 + $0x4a8] ss:$16 sps:$4 sm:$0xff]   ;;  %v12206_v59 = vld [vmem:[#allocation7 + $0x4c4] ss:$16 sps:$4 sm:$0xff]  }
 0x81c   :  { %8892 = vmatpush1.bf16.msra.mxu0 %v12114_v24  ;;  %9021 = vmatpush1.bf16.msra.mxu1 %v12117_v26  ;;  %v12209_v24 = vld [vmem:[#allocation7 + $0x4cc] ss:$16 sps:$4 sm:$0xff]   ;;  %v12204_v26 = vld [vmem:[#allocation7 + $0x4c0] ss:$16 sps:$4 sm:$0xff]  }
 0x81d   :  { %8893 = vmatprep.subr.bf16.mxu0 %v12122_v7  ;;  %9022 = vmatprep.subr.bf16.mxu1 %v12125_v63  ;;  %v12207_v7 = vld [vmem:[#allocation7 + $0x4c8] ss:$16 sps:$4 sm:$0xff]   ;;  %v12212_v63 = vld [vmem:[#allocation7 + $0x4e4] ss:$16 sps:$4 sm:$0xff]  }
 0x820   :  { %8894 = vmatpush1.bf16.msra.mxu0 %v12120_v25  ;;  %9023 = vmatpush1.bf16.msra.mxu1 %v12123_v6  ;;  %v12215_v25 = vld [vmem:[#allocation7 + $0x4ec] ss:$16 sps:$4 sm:$0xff]   ;;  %v12210_v6 = vld [vmem:[#allocation7 + $0x4e0] ss:$16 sps:$4 sm:$0xff]  }
 0x821   :  { %8895 = vmatprep.subr.bf16.mxu0 %v12128_v51  ;;  %9024 = vmatprep.subr.bf16.mxu1 %v12131_v61  ;;  %v12213_v51 = vld [vmem:[#allocation7 + $0x4e8] ss:$16 sps:$4 sm:$0xff]   ;;  %v12218_v61 = vld [vmem:[#allocation7 + $0x504] ss:$16 sps:$4 sm:$0xff]  }
 0x824   :  { %8896 = vmatpush1.bf16.msra.mxu0 %v12126_v35  ;;  %9025 = vmatpush1.bf16.msra.mxu1 %v12129_v52  ;;  %v12221_v35 = vld [vmem:[#allocation7 + $0x50c] ss:$16 sps:$4 sm:$0xff]   ;;  %v12216_v52 = vld [vmem:[#allocation7 + $0x500] ss:$16 sps:$4 sm:$0xff]  }
 0x825   :  { %8897 = vmatprep.subr.bf16.mxu0 %v12134_v0  ;;  %9026 = vmatprep.subr.bf16.mxu1 %v12137_v19  ;;  %v12219_v0 = vld [vmem:[#allocation7 + $0x508] ss:$16 sps:$4 sm:$0xff]   ;;  %v12224_v19 = vld [vmem:[#allocation7 + $0x524] ss:$16 sps:$4 sm:$0xff]  }
 0x828   :  { %8898 = vmatpush1.bf16.msra.mxu0 %v12132_v21  ;;  %9027 = vmatpush1.bf16.msra.mxu1 %v12135_v37  ;;  %v12227_v21 = vld [vmem:[#allocation7 + $0x52c] ss:$16 sps:$4 sm:$0xff]   ;;  %v12222_v37 = vld [vmem:[#allocation7 + $0x520] ss:$16 sps:$4 sm:$0xff]  }
 0x829   :  { %8899 = vmatprep.subr.bf16.mxu0 %v12140_v22  ;;  %9028 = vmatprep.subr.bf16.mxu1 %v12143_v62  ;;  %v12225_v22 = vld [vmem:[#allocation7 + $0x528] ss:$16 sps:$4 sm:$0xff]   ;;  %v12230_v62 = vld [vmem:[#allocation7 + $0x544] ss:$16 sps:$4 sm:$0xff]  }
 0x82c   :  { %8900 = vmatpush1.bf16.msra.mxu0 %v12138_v29  ;;  %9029 = vmatpush1.bf16.msra.mxu1 %v12141_v15  ;;  %v12233_v29 = vld [vmem:[#allocation7 + $0x54c] ss:$16 sps:$4 sm:$0xff]   ;;  %v12228_v15 = vld [vmem:[#allocation7 + $0x540] ss:$16 sps:$4 sm:$0xff]  }
 0x82d   :  { %8901 = vmatprep.subr.bf16.mxu0 %v12146_v47  ;;  %9030 = vmatprep.subr.bf16.mxu1 %v12149_v58  ;;  %v12231_v47 = vld [vmem:[#allocation7 + $0x548] ss:$16 sps:$4 sm:$0xff]   ;;  %v12236_v58 = vld [vmem:[#allocation7 + $0x564] ss:$16 sps:$4 sm:$0xff]  }
 0x830   :  { %8902 = vmatpush1.bf16.msra.mxu0 %v12144_v23  ;;  %9031 = vmatpush1.bf16.msra.mxu1 %v12147_v11  ;;  %v12239_v23 = vld [vmem:[#allocation7 + $0x56c] ss:$16 sps:$4 sm:$0xff]   ;;  %v12234_v11 = vld [vmem:[#allocation7 + $0x560] ss:$16 sps:$4 sm:$0xff]  }
 0x831   :  { %8903 = vmatprep.subr.bf16.mxu0 %v12152_v31  ;;  %9032 = vmatprep.subr.bf16.mxu1 %v12155_v32  ;;  %v12237_v31 = vld [vmem:[#allocation7 + $0x568] ss:$16 sps:$4 sm:$0xff]   ;;  %v12242_v32 = vld [vmem:[#allocation7 + $0x584] ss:$16 sps:$4 sm:$0xff]  }
 0x834   :  { %8904 = vmatpush1.bf16.msra.mxu0 %v12150_v39  ;;  %9033 = vmatpush1.bf16.msra.mxu1 %v12153_v17  ;;  %v12245_v39 = vld [vmem:[#allocation7 + $0x58c] ss:$16 sps:$4 sm:$0xff]   ;;  %v12240_v17 = vld [vmem:[#allocation7 + $0x580] ss:$16 sps:$4 sm:$0xff]  }
 0x835   :  { %8905 = vmatprep.subr.bf16.mxu0 %v12158_v33  ;;  %9034 = vmatprep.subr.bf16.mxu1 %v12161_v20  ;;  %v12243_v33 = vld [vmem:[#allocation7 + $0x588] ss:$16 sps:$4 sm:$0xff]   ;;  %v12248_v20 = vld [vmem:[#allocation7 + $0x5a4] ss:$16 sps:$4 sm:$0xff]  }
 0x838   :  { %8906 = vmatpush1.bf16.msra.mxu0 %v12156_v36  ;;  %9035 = vmatpush1.bf16.msra.mxu1 %v12159_v41  ;;  %v12251_v36 = vld [vmem:[#allocation7 + $0x5ac] ss:$16 sps:$4 sm:$0xff]   ;;  %v12246_v41 = vld [vmem:[#allocation7 + $0x5a0] ss:$16 sps:$4 sm:$0xff]  }
 0x839   :  { %8907 = vmatprep.subr.bf16.mxu0 %v12164_v43  ;;  %9036 = vmatprep.subr.bf16.mxu1 %v12167_v45  ;;  %v12249_v43 = vld [vmem:[#allocation7 + $0x5a8] ss:$16 sps:$4 sm:$0xff]   ;;  %v12254_v45 = vld [vmem:[#allocation7 + $0x5c4] ss:$16 sps:$4 sm:$0xff]  }
 0x83c   :  { %8908 = vmatpush1.bf16.msra.mxu0 %v12162_v48  ;;  %9037 = vmatpush1.bf16.msra.mxu1 %v12165_v49  ;;  %v12257_v48 = vld [vmem:[#allocation7 + $0x5cc] ss:$16 sps:$4 sm:$0xff]   ;;  %v12252_v49 = vld [vmem:[#allocation7 + $0x5c0] ss:$16 sps:$4 sm:$0xff]  }
 0x83d   :  { %8920 = vmatprep.subr.bf16.mxu0 %v12170_v18  ;;  %9049 = vmatprep.subr.bf16.mxu1 %v12173_v27  ;;  %v12255_v18 = vld [vmem:[#allocation7 + $0x5c8] ss:$16 sps:$4 sm:$0xff]   ;;  %v12260_v27 = vld [vmem:[#allocation7 + $0x5e4] ss:$16 sps:$4 sm:$0xff]  }
 0x83f   :  { %8910 = vmatmul.mubr.bf16.vlgmr.msra.gmra.mrb[84].mxu0 %v13437_v34  ;;  %9039 = vmatmul.mubr.bf16.vlgmr.msra.gmra.mrb[84].mxu1 %v13437_v34  ;;  %v12188_v34 = vld [vmem:[#allocation7 + $0x464] ss:$16 sps:$4 sm:$0xff]  }
 0x840   :  { %8921 = vmatpush1.bf16.msra.mxu0 %v12168_v50  ;;  %10292 = vmatprep.mubr.msk.bf16.mxu0 %vm177_vm0, %v13439_v40  ;;  %v12263_v50 = vld [vmem:[#allocation7 + $0x5ec] ss:$16 sps:$4 sm:$0xff]  }
 0x841   :  { %9050 = vmatpush1.bf16.msra.mxu1 %v12171_v53  ;;  %10298 = vmatprep.mubr.msk.bf16.mxu1 %vm177_vm0, %v13439_v40  ;;  %v12197_v40 = vld [vmem:[#allocation7 + $0x48c] ss:$16 sps:$4 sm:$0xff]   ;;  %v12258_v53 = vld [vmem:[#allocation7 + $0x5e0] ss:$16 sps:$4 sm:$0xff]  }
 0x842   :  { %8922 = vmatprep.subr.bf16.mxu0 %v12176_v54  ;;  %9051 = vmatprep.subr.bf16.mxu1 %v12179_v14  ;;  %v12261_v54 = vld [vmem:[#allocation7 + $0x5e8] ss:$16 sps:$4 sm:$0xff]   ;;  %v10095_v14 = vld [vmem:[%s13487_s8 + $0xc] sm:$0xf] }
 0x844   :  { %8923 = vmatpush1.bf16.msra.mxu0 %v12174_v28  ;;  %v7857_v28 = vrot.slane %v10095_v14, %v12887_v9 }
 0x845   :  { %9052 = vmatpush1.bf16.msra.mxu1 %v12177_v8  ;;  %8924 = vmatprep.subr.bf16.mxu0 %v12182_v55  ;;  %v7865_v8 = vrot.slane %v10095_v14, %v12889_v10  ;;  %v7861_v55 = vrot.slane %v10095_v14, %v12894_v12 }
 0x846   :  { %9053 = vmatprep.subr.bf16.mxu1 %v12185_v1  ;;  %v7869_v1 = vrot.slane %v10095_v14, %v12896_v13 }
 0x848   :  { %8925 = vmatpush1.bf16.msra.mxu0 %v12180_v16 }
 0x849   :  { %9054 = vmatpush1.bf16.msra.mxu1 %v12183_v42  ;;  %8926 = vmatprep.subr.bf16.mxu0 %v12188_v34 }
 0x84a   :  { %9055 = vmatprep.subr.bf16.mxu1 %v12191_v56 }
 0x84c   :  { %8927 = vmatpush1.bf16.msra.mxu0 %v12186_v2 }
 0x84d   :  { %9056 = vmatpush1.bf16.msra.mxu1 %v12189_v60  ;;  %8928 = vmatprep.subr.bf16.mxu0 %v12194_v3 }
 0x84e   :  { %9057 = vmatprep.subr.bf16.mxu1 %v12197_v40 }
 0x850   :  { %8929 = vmatpush1.bf16.msra.mxu0 %v12192_v57 }
 0x851   :  { %9058 = vmatpush1.bf16.msra.mxu1 %v12195_v5  ;;  %8930 = vmatprep.subr.bf16.mxu0 %v12200_v44 }
 0x852   :  { %9059 = vmatprep.subr.bf16.mxu1 %v12203_v38 }
 0x854   :  { %8931 = vmatpush1.bf16.msra.mxu0 %v12198_v4 }
 0x855   :  { %9060 = vmatpush1.bf16.msra.mxu1 %v12201_v30  ;;  %8932 = vmatprep.subr.bf16.mxu0 %v12206_v59 }
 0x856   :  { %9061 = vmatprep.subr.bf16.mxu1 %v12209_v24 }
 0x858   :  { %8933 = vmatpush1.bf16.msra.mxu0 %v12204_v26 }
 0x859   :  { %9062 = vmatpush1.bf16.msra.mxu1 %v12207_v7  ;;  %8934 = vmatprep.subr.bf16.mxu0 %v12212_v63 }
 0x85a   :  { %9063 = vmatprep.subr.bf16.mxu1 %v12215_v25 }
 0x85c   :  { %8935 = vmatpush1.bf16.msra.mxu0 %v12210_v6 }
 0x85d   :  { %9064 = vmatpush1.bf16.msra.mxu1 %v12213_v51  ;;  %8936 = vmatprep.subr.bf16.mxu0 %v12218_v61 }
 0x85e   :  { %9065 = vmatprep.subr.bf16.mxu1 %v12221_v35 }
 0x860   :  { %8937 = vmatpush1.bf16.msra.mxu0 %v12216_v52 }
 0x861   :  { %9066 = vmatpush1.bf16.msra.mxu1 %v12219_v0  ;;  %8938 = vmatprep.subr.bf16.mxu0 %v12224_v19 }
 0x862   :  { %9067 = vmatprep.subr.bf16.mxu1 %v12227_v21 }
 0x864   :  { %8939 = vmatpush1.bf16.msra.mxu0 %v12222_v37 }
 0x865   :  { %9068 = vmatpush1.bf16.msra.mxu1 %v12225_v22  ;;  %8940 = vmatprep.subr.bf16.mxu0 %v12230_v62 }
 0x866   :  { %9069 = vmatprep.subr.bf16.mxu1 %v12233_v29 }
 0x868   :  { %8941 = vmatpush1.bf16.msra.mxu0 %v12228_v15 }
 0x869   :  { %9070 = vmatpush1.bf16.msra.mxu1 %v12231_v47  ;;  %8942 = vmatprep.subr.bf16.mxu0 %v12236_v58 }
 0x86a   :  { %9071 = vmatprep.subr.bf16.mxu1 %v12239_v23 }
 0x86c   :  { %8943 = vmatpush1.bf16.msra.mxu0 %v12234_v11 }
 0x86d   :  { %9072 = vmatpush1.bf16.msra.mxu1 %v12237_v31  ;;  %8944 = vmatprep.subr.bf16.mxu0 %v12242_v32 }
 0x86e   :  { %9073 = vmatprep.subr.bf16.mxu1 %v12245_v39 }
 0x870   :  { %8945 = vmatpush1.bf16.msra.mxu0 %v12240_v17 }
 0x871   :  { %9074 = vmatpush1.bf16.msra.mxu1 %v12243_v33  ;;  %8946 = vmatprep.subr.bf16.mxu0 %v12248_v20 }
 0x872   :  { %9075 = vmatprep.subr.bf16.mxu1 %v12251_v36 }
 0x874   :  { %8947 = vmatpush1.bf16.msra.mxu0 %v12246_v41 }
 0x875   :  { %9076 = vmatpush1.bf16.msra.mxu1 %v12249_v43  ;;  %8948 = vmatprep.subr.bf16.mxu0 %v12254_v45 }
 0x876   :  { %9077 = vmatprep.subr.bf16.mxu1 %v12257_v48 }
 0x878   :  { %8949 = vmatpush1.bf16.msra.mxu0 %v12252_v49 }
 0x879   :  { %9078 = vmatpush1.bf16.msra.mxu1 %v12255_v18  ;;  %8950 = vmatprep.subr.bf16.mxu0 %v12260_v27 }
 0x87a   :  { %9079 = vmatprep.subr.bf16.mxu1 %v12263_v50 }
 0x87c   :  { %8951 = vmatpush1.bf16.msra.mxu0 %v12258_v53 }
 0x87d   :  { %9080 = vmatpush1.bf16.msra.mxu1 %v12261_v54 }
 0x87f   :  { %10293 = vmatmul.mubr.msk.bf16.vlgmr.msra.gmra.mrb[84].mxu0 %vm177_vm0, %v13442_v46 }
 0x880   :  { %10299 = vmatmul.mubr.msk.bf16.vlgmr.msra.gmra.mrb[84].mxu1 %vm177_vm0, %v13442_v46 }
 0x952   :  { %v8954_v16 = vpop.f32.mrb[84].mxu0 }
 0x953   :  { %v10412_v42 = vadd.f32 %v8954_v16, %v7857_v28  ;;  %v9083_v34 = vpop.f32.mrb[84].mxu1  ;;  %v8956_v56 = vpop.f32.mrb[85].mxu0 }
 0x954   :  { %v10416_v2 = vadd.f32 %v9083_v34, %v7865_v8  ;;  %v10413_v60 = vadd.f32 %v8956_v56, %v7861_v55  ;;  %v9085_v3 = vpop.f32.mrb[85].mxu1  ;;  %v8958_v46 = vpop.f32.mrb[86].mxu0 }
 0x955   :  { %v9092_v40 = vmax.f32 %v10412_v42, 0.0  ;;  %v10417_v57 = vadd.f32 %v9085_v3, %v7869_v1  ;;  %v10414_v5 = vadd.f32 %v8958_v46, %v7857_v28  ;;  %v9087_v44 = vpop.f32.mrb[86].mxu1  ;;  %v8960_v38 = vpop.f32.mrb[87].mxu0 }
 0x956   :  { %v9094_v9 = vmax.f32 %v10416_v2, 0.0  ;;  %v9093_v4 = vmax.f32 %v10413_v60, 0.0  ;;  %v10418_v10 = vadd.f32 %v9087_v44, %v7865_v8  ;;  %v10415_v30 = vadd.f32 %v8960_v38, %v7861_v55  ;;  %v9089_v12 = vpop.f32.mrb[87].mxu1 }
 0x957   :  { %v9095_v59 = vmax.f32 %v10417_v57, 0.0  ;;  %v9096_v13 = vmax.f32 %v10414_v5, 0.0  ;;  %v10419_v24 = vadd.f32 %v9089_v12, %v7869_v1 }
 0x958   :  { %v9100_v26 = vadd.f32 %v9094_v9, %v9092_v40  ;;  %v9097_v7 = vmax.f32 %v10415_v30, 0.0  ;;  %v9098_v6 = vmax.f32 %v10418_v10, 0.0 }
 0x959   :  { %v9101_v63 = vadd.f32 %v9095_v59, %v9093_v4  ;;  %v9099_v61 = vmax.f32 %v10419_v24, 0.0 }
 0x95a   :  { %v9102_v25 = vadd.f32 %v9100_v26, %v9096_v13 }
 0x95b   :  { %v9103_v51 = vadd.f32 %v9101_v63, %v9097_v7 }
 0x95c   :  { %v9104_v35 = vadd.f32 %v9102_v25, %v9098_v6 }
 0x95d   :  { %v9105_v52 = vadd.f32 %v9103_v51, %v9099_v61 }
 0x95e   :  { %v9106_v0 = vmul.f32 0.25, %v9104_v35 }
 0x95f   :  { %v9107_v19 = vmul.f32 0.25, %v9105_v52 }
 0x960   :  { %9108 = vst [vmem:[%s13488_s9] sm:$0xff] %v9106_v0 }
 0x961   :  { %9109 = vst [vmem:[%s13488_s9 + $0x8] sm:$0xff] %v9107_v19 }
 0x962   :  { %9114 = vsyncpa [#allocation3], 1 }
 0x963   :  { %9115 = vsyncpa [#allocation5], 1 }
 0x964   :  { %9116 = vsyncpa [#allocation8], 1 }
 0x965   :  { %9117 = vsyncpa [#allocation11], 1 }

</bundles_post_ra>
